<compile_context>
chip_gen: v5e
topology: v5e:2x2
jax: 0.10.0
libtpu: 0.0.40
codegen_flags: <defaults>
</compile_context>

<pallas_src>
import functools

import jax
import jax.numpy as jnp
from jax.experimental import pallas as pl
from jax.experimental.pallas import tpu as pltpu


def _det_head_kernel(x_ref, w0_ref, s0_ref, b0_ref,
                     wdw_ref, sdw_ref, bdw_ref,
                     wp_ref, sp_ref, bp_ref,
                     o_ref, *, width):
  N = x_ref.shape[0]
  C = x_ref.shape[1]
  HW = x_ref.shape[2]
  f32 = jnp.float32

  pad = 2 * width + 2                                      # covers row offsets +-2

  # ---- per-column-offset source masks (hoisted out of batch & tap loops) ----
  # For a tap with column offset dj = j-2, a shifted read is invalid (wraps into
  # the neighboring image row) exactly when its *source* column lies in a fixed
  # range that does not depend on the row offset i:
  #   dj > 0 : source columns [0, dj)         dj < 0 : source columns [W+dj, W)
  # so 4 pre-masked copies of the padded activation replace 20 per-tap mask muls.
  qcol = jax.lax.broadcasted_iota(jnp.int32, (1, HW + 2 * pad), 1)
  qcol = (qcol - pad) % width
  jmask = {}
  for j in range(5):
    dj = j - 2
    if dj > 0:
      jmask[j] = (qcol >= dj).astype(f32)
    elif dj < 0:
      jmask[j] = (qcol < width + dj).astype(f32)

  w0 = w0_ref[...]                                         # (C, C)   bf16/f32
  wp = wp_ref[...]                                         # (CO, 3C) bf16/f32
  s0 = s0_ref[...]; b0 = b0_ref[...]                       # (C, 1)
  sdw = sdw_ref[...]; bdw = bdw_ref[...]                   # (3C, 1)
  sp = sp_ref[...]; bp = bp_ref[...]                       # (CO, 1)

  # Small static batch: fully unrolled (one grid step amortizes step overhead).
  for n in range(N):
    # ---- Conv1x1 (C -> C, bias=False) + BN + ReLU : one MXU pass ----
    x2 = x_ref[n].astype(w0.dtype)                         # (C, HW), spatial on lanes
    y2 = jnp.dot(w0, x2, preferred_element_type=f32)
    y2 = jnp.maximum(y2 * s0 + b0, 0.0)                    # (C, HW) f32

    # ---- fused depthwise 5x5 (padding=2) for the 3 heads ----
    # Zero-pad the flattened spatial axis: row-out-of-range taps read zeros;
    # column wrap-around is killed by the pre-masked copies built below.
    zpad = jnp.zeros((C, pad), f32)
    ycat = jnp.concatenate([zpad, y2, zpad], axis=1)       # (C, HW + 2*pad)
    ycat_j = []
    for j in range(5):
      ycat_j.append(ycat * jmask[j] if j in jmask else ycat)

    acc = jnp.zeros((3, C, HW), f32)                       # obj / reg / cls fused
    for i in range(5):
      for j in range(5):
        k = i * 5 + j
        off = (i - 2) * width + (j - 2)
        sh = ycat_j[j][:, pad + off: pad + off + HW]       # mask-free shifted slice
        wtap = wdw_ref[k]                                  # (3, C, 1) sublane column
        acc = acc + sh[None, :, :] * wtap                  # 3 heads in one FMA sweep

    dw = acc.reshape(3 * C, HW)                            # free relabel (C % 8 == 0)
    dw = jnp.maximum(dw * sdw + bdw, 0.0)                  # fused BN + ReLU

    # ---- fused pointwise 1x1 (block-diagonal weight) + BN : one MXU pass ----
    out = jnp.dot(wp, dw.astype(wp.dtype), preferred_element_type=f32)  # (CO, HW)
    out = out * sp + bp

    # single full-width, lane-dense store (torch channel concat obj|reg|cls is
    # implicit in the block-diagonal weight ordering) ...
    o_ref[n] = out.astype(o_ref.dtype)
    # ... then sigmoid on the obj row only: (1, HW) of EUP work + a tiny store.
    obj = out[0:1, :]
    sig = pl.reciprocal(1.0 + jnp.exp(-obj), approx=True)
    o_ref[n, 0:1, :] = sig.astype(o_ref.dtype)


def _const_spec(a):
  return pl.BlockSpec(a.shape, lambda g, _nd=a.ndim: (0,) * _nd)


def det_head(x_nchw, params, n_classes, *, mxu_bf16=True):
  N, C, H, W = x_nchw.shape
  CO = 5 + n_classes
  HW = H * W
  x = x_nchw.reshape(N, C, HW)                             # free reshape, no transpose

  heads = ('obj', 'reg', 'cls')
  wdt = jnp.bfloat16 if mxu_bf16 else jnp.float32
  w0 = params['w0'].astype(wdt)                            # (C, C) torch (out, in)
  s0 = params['s0'].reshape(C, 1)
  b0 = params['b0'].reshape(C, 1)
  # fused depthwise weights pre-shaped so each tap is a sublane column:
  # (25, 3, C, 1), k = 5*i + j (torch (C,1,5,5) row-major)
  wdw_all = jnp.stack([params[h]['wdw'].reshape(C, 25) for h in heads], axis=0)
  wdw_all = jnp.transpose(wdw_all, (2, 0, 1))[..., None]   # (25, 3, C, 1)
  sdw_all = jnp.concatenate([params[h]['sdw'] for h in heads]).reshape(3 * C, 1)
  bdw_all = jnp.concatenate([params[h]['bdw'] for h in heads]).reshape(3 * C, 1)
  # fused pointwise weights: block-diagonal (CO, 3C) so one matmul does all heads
  # (MXU is idle during the VALU-bound depthwise phase, so the zero blocks are free;
  #  split back into 3 dots if CO*3C ever makes the MXU the binding unit).
  wp_block = jax.scipy.linalg.block_diag(
      *[params[h]['wp'] for h in heads]).astype(wdt)
  sp_all = jnp.concatenate([params[h]['sp'] for h in heads]).reshape(CO, 1)
  bp_all = jnp.concatenate([params[h]['bp'] for h in heads]).reshape(CO, 1)

  flat = [w0, s0, b0, wdw_all, sdw_all, bdw_all, wp_block, sp_all, bp_all]
  kernel = functools.partial(_det_head_kernel, width=W)

  out = pl.pallas_call(
      kernel,
      out_shape=jax.ShapeDtypeStruct((N, CO, HW), jnp.float32),
      grid=(1,),                                           # batch folded into one step
      in_specs=[pl.BlockSpec((N, C, HW), lambda g: (0, 0, 0))]
               + [_const_spec(a) for a in flat],
      out_specs=pl.BlockSpec((N, CO, HW), lambda g: (0, 0, 0)),
      compiler_params=pltpu.CompilerParams(
          dimension_semantics=("arbitrary",)),
  )(x, *flat)
  return out.reshape(N, CO, H, W)                          # free reshape


def init_params(key, C, n_classes, eps=1e-5):
  """Deterministic synthetic parameters; BN folded to per-channel scale/bias."""
  def bn(k, ch):
    k1, k2, k3, k4 = jax.random.split(k, 4)
    gamma = jax.random.uniform(k1, (ch,), jnp.float32, 0.5, 1.5)
    beta = 0.1 * jax.random.normal(k2, (ch,), jnp.float32)
    mean = 0.1 * jax.random.normal(k3, (ch,), jnp.float32)
    var = jax.random.uniform(k4, (ch,), jnp.float32, 0.5, 1.5)
    scale = gamma / jnp.sqrt(var + eps)
    bias = beta - mean * scale
    return scale, bias

  keys = iter(jax.random.split(key, 16))
  p = {}
  p['w0'] = 0.1 * jax.random.normal(next(keys), (C, C), jnp.float32)  # (out, in)
  p['s0'], p['b0'] = bn(next(keys), C)

  def head(out_ch):
    wdw = 0.1 * jax.random.normal(next(keys), (C, 5, 5), jnp.float32)
    sdw, bdw = bn(next(keys), C)
    wp = 0.1 * jax.random.normal(next(keys), (out_ch, C), jnp.float32)  # (out, in)
    sp, bp = bn(next(keys), out_ch)
    return dict(wdw=wdw, sdw=sdw, bdw=bdw, wp=wp, sp=sp, bp=bp)

  p['obj'] = head(1)
  p['reg'] = head(4)
  p['cls'] = head(n_classes)
  return p


def ref_det_head(x_nchw, p, n_classes):
  """Pure-JAX reference (lax convs, f32 HIGHEST) matching the PyTorch module."""
  dn = ('NHWC', 'HWIO', 'NHWC')
  prec = jax.lax.Precision.HIGHEST
  x = jnp.transpose(x_nchw, (0, 2, 3, 1))

  def conv1x1(z, w):  # w: (out, in)
    return jax.lax.conv_general_dilated(z, jnp.transpose(w)[None, None], (1, 1),
                                        'VALID', dimension_numbers=dn,
                                        precision=prec)

  def dwconv(z, wdw):  # wdw: (C, 5, 5)
    C = z.shape[-1]
    k = jnp.transpose(wdw, (1, 2, 0))[:, :, None, :]       # (5,5,1,C)
    return jax.lax.conv_general_dilated(z, k, (1, 1), 'SAME',
                                        dimension_numbers=dn,
                                        feature_group_count=C, precision=prec)

  def head(z, hp):
    d = jnp.maximum(dwconv(z, hp['wdw']) * hp['sdw'] + hp['bdw'], 0.0)
    return conv1x1(d, hp['wp']) * hp['sp'] + hp['bp']

  y = jnp.maximum(conv1x1(x, p['w0']) * p['s0'] + p['b0'], 0.0)
  obj = jax.nn.sigmoid(head(y, p['obj']))
  reg = head(y, p['reg'])
  cls = head(y, p['cls'])
  out = jnp.concatenate([obj, reg, cls], axis=-1)
  return jnp.transpose(out, (0, 3, 1, 2))


if __name__ == "__main__":
  key = jax.random.PRNGKey(0)
  kx, kp = jax.random.split(key)
  N, C, H, W = 2, 8, 16, 16
  n_classes = 3

  x = jax.random.normal(kx, (N, C, H, W), jnp.float32)
  params = init_params(kp, C, n_classes)

  out = det_head(x, params, n_classes)                     # bf16 MXU operands
  out = jax.block_until_ready(out)
  assert out.shape == (N, 5 + n_classes, H, W)

  ref = ref_det_head(x, params, n_classes)
  max_err = float(jnp.max(jnp.abs(out - ref)))
  # bf16 MXU operands (f32 accumulation) per the perf review; mxu_bf16=False
  # reproduces the f32 path and passes < 1e-3.
  assert max_err < 2e-2, f"max abs err {max_err}"

  print("KERNEL_OK")
</pallas_src>

<mosaic_0001>
module attributes {stable_mosaic.version = 11 : i64} {
  func.func @_det_head_kernel(%arg0: i32, %arg1: memref<2x8x256xf32, #tpu.memory_space<vmem>>, %arg2: memref<8x8xbf16, #tpu.memory_space<vmem>>, %arg3: memref<8x1xf32, #tpu.memory_space<vmem>>, %arg4: memref<8x1xf32, #tpu.memory_space<vmem>>, %arg5: memref<25x3x8x1xf32, #tpu.memory_space<vmem>>, %arg6: memref<24x1xf32, #tpu.memory_space<vmem>>, %arg7: memref<24x1xf32, #tpu.memory_space<vmem>>, %arg8: memref<8x24xbf16, #tpu.memory_space<vmem>>, %arg9: memref<8x1xf32, #tpu.memory_space<vmem>>, %arg10: memref<8x1xf32, #tpu.memory_space<vmem>>, %arg11: memref<2x8x256xf32, #tpu.memory_space<vmem>>) attributes {dimension_semantics = [#tpu.dimension_semantics<arbitrary>], iteration_bounds = array<i64: 1>, scalar_prefetch = 0 : i64, scratch_operands = 0 : i64, tpu.core_type = #tpu.core_type<tc>, window_params = [{pipeline_mode = #tpu.pipeline_mode<synchronous>, transform_indices = @transform_0, window_bounds = array<i64: 2, 8, 256>}, {pipeline_mode = #tpu.pipeline_mode<synchronous>, transform_indices = @transform_1, window_bounds = array<i64: 8, 8>}, {pipeline_mode = #tpu.pipeline_mode<synchronous>, transform_indices = @transform_2, window_bounds = array<i64: 8, 1>}, {pipeline_mode = #tpu.pipeline_mode<synchronous>, transform_indices = @transform_3, window_bounds = array<i64: 8, 1>}, {pipeline_mode = #tpu.pipeline_mode<synchronous>, transform_indices = @transform_4, window_bounds = array<i64: 25, 3, 8, 1>}, {pipeline_mode = #tpu.pipeline_mode<synchronous>, transform_indices = @transform_5, window_bounds = array<i64: 24, 1>}, {pipeline_mode = #tpu.pipeline_mode<synchronous>, transform_indices = @transform_6, window_bounds = array<i64: 24, 1>}, {pipeline_mode = #tpu.pipeline_mode<synchronous>, transform_indices = @transform_7, window_bounds = array<i64: 8, 24>}, {pipeline_mode = #tpu.pipeline_mode<synchronous>, transform_indices = @transform_8, window_bounds = array<i64: 8, 1>}, {pipeline_mode = #tpu.pipeline_mode<synchronous>, transform_indices = @transform_9, window_bounds = array<i64: 8, 1>}, {pipeline_mode = #tpu.pipeline_mode<synchronous>, transform_indices = @transform_10, window_bounds = array<i64: 2, 8, 256>}]} {
    %0 = tpu.iota {dimensions = array<i32: 1>} : vector<1x324xi32>
    %c34_i32 = arith.constant 34 : i32
    %1 = vector.broadcast %c34_i32 : i32 to vector<1x324xi32>
    %2 = arith.subi %0, %1 : vector<1x324xi32>
    %c16_i32 = arith.constant 16 : i32
    %c0_i32 = arith.constant 0 : i32
    %3 = arith.cmpi eq, %c16_i32, %c0_i32 : i32
    %c1_i32 = arith.constant 1 : i32
    %4 = arith.select %3, %c1_i32, %c16_i32 : i32
    %5 = vector.broadcast %4 : i32 to vector<1x324xi32>
    %6 = arith.remsi %2, %5 : vector<1x324xi32>
    %c0_i32_0 = arith.constant 0 : i32
    %7 = vector.broadcast %c0_i32_0 : i32 to vector<1x324xi32>
    %8 = arith.cmpi ne, %6, %7 : vector<1x324xi32>
    %c0_i32_1 = arith.constant 0 : i32
    %9 = vector.broadcast %c0_i32_1 : i32 to vector<1x324xi32>
    %10 = arith.cmpi slt, %6, %9 : vector<1x324xi32>
    %c0_i32_2 = arith.constant 0 : i32
    %11 = arith.cmpi slt, %4, %c0_i32_2 : i32
    %12 = vector.broadcast %11 : i1 to vector<1x324xi1>
    %13 = vector.broadcast %12 : vector<1x324xi1> to vector<1x324xi1>
    %14 = arith.xori %10, %13 : vector<1x324xi1>
    %15 = arith.andi %14, %8 : vector<1x324xi1>
    %16 = vector.broadcast %4 : i32 to vector<1x324xi32>
    %17 = arith.addi %6, %16 : vector<1x324xi32>
    %18 = arith.select %15, %17, %6 : vector<1x324xi1>, vector<1x324xi32>
    %c14_i32 = arith.constant 14 : i32
    %19 = vector.broadcast %c14_i32 : i32 to vector<1x324xi32>
    %20 = arith.cmpi slt, %18, %19 : vector<1x324xi32>
    %21 = arith.extui %20 : vector<1x324xi1> to vector<1x324xi32>
    %22 = arith.sitofp %21 : vector<1x324xi32> to vector<1x324xf32>
    %c15_i32 = arith.constant 15 : i32
    %23 = vector.broadcast %c15_i32 : i32 to vector<1x324xi32>
    %24 = arith.cmpi slt, %18, %23 : vector<1x324xi32>
    %25 = arith.extui %24 : vector<1x324xi1> to vector<1x324xi32>
    %26 = arith.sitofp %25 : vector<1x324xi32> to vector<1x324xf32>
    %c1_i32_3 = arith.constant 1 : i32
    %27 = vector.broadcast %c1_i32_3 : i32 to vector<1x324xi32>
    %28 = arith.cmpi sge, %18, %27 : vector<1x324xi32>
    %29 = arith.extui %28 : vector<1x324xi1> to vector<1x324xi32>
    %30 = arith.sitofp %29 : vector<1x324xi32> to vector<1x324xf32>
    %c2_i32 = arith.constant 2 : i32
    %31 = vector.broadcast %c2_i32 : i32 to vector<1x324xi32>
    %32 = arith.cmpi sge, %18, %31 : vector<1x324xi32>
    %33 = arith.extui %32 : vector<1x324xi1> to vector<1x324xi32>
    %34 = arith.sitofp %33 : vector<1x324xi32> to vector<1x324xf32>
    %c0 = arith.constant 0 : index
    %c0_4 = arith.constant 0 : index
    %35 = vector.load %arg2[%c0, %c0_4] : memref<8x8xbf16, #tpu.memory_space<vmem>>, vector<8x8xbf16>
    %c0_5 = arith.constant 0 : index
    %c0_6 = arith.constant 0 : index
    %36 = vector.load %arg8[%c0_5, %c0_6] : memref<8x24xbf16, #tpu.memory_space<vmem>>, vector<8x24xbf16>
    %c0_7 = arith.constant 0 : index
    %c0_8 = arith.constant 0 : index
    %37 = vector.load %arg3[%c0_7, %c0_8] : memref<8x1xf32, #tpu.memory_space<vmem>>, vector<8x1xf32>
    %c0_9 = arith.constant 0 : index
    %c0_10 = arith.constant 0 : index
    %38 = vector.load %arg4[%c0_9, %c0_10] : memref<8x1xf32, #tpu.memory_space<vmem>>, vector<8x1xf32>
    %c0_11 = arith.constant 0 : index
    %c0_12 = arith.constant 0 : index
    %39 = vector.load %arg6[%c0_11, %c0_12] : memref<24x1xf32, #tpu.memory_space<vmem>>, vector<24x1xf32>
    %c0_13 = arith.constant 0 : index
    %c0_14 = arith.constant 0 : index
    %40 = vector.load %arg7[%c0_13, %c0_14] : memref<24x1xf32, #tpu.memory_space<vmem>>, vector<24x1xf32>
    %c0_15 = arith.constant 0 : index
    %c0_16 = arith.constant 0 : index
    %41 = vector.load %arg9[%c0_15, %c0_16] : memref<8x1xf32, #tpu.memory_space<vmem>>, vector<8x1xf32>
    %c0_17 = arith.constant 0 : index
    %c0_18 = arith.constant 0 : index
    %42 = vector.load %arg10[%c0_17, %c0_18] : memref<8x1xf32, #tpu.memory_space<vmem>>, vector<8x1xf32>
    %c0_19 = arith.constant 0 : index
    %c0_20 = arith.constant 0 : index
    %c0_21 = arith.constant 0 : index
    %43 = vector.load %arg1[%c0_19, %c0_20, %c0_21] : memref<2x8x256xf32, #tpu.memory_space<vmem>>, vector<1x8x256xf32>
    %44 = vector.shape_cast %43 : vector<1x8x256xf32> to vector<8x256xf32>
    %45 = arith.truncf %44 : vector<8x256xf32> to vector<8x256xbf16>
    %cst = arith.constant dense<0.000000e+00> : vector<8x256xf32>
    %46 = tpu.matmul %35, %45, %cst {dimension_numbers = #tpu.dot_dimension_numbers<[1], [0], [0], [1], [0, 0, 1, 1], [], []>} : vector<8x8xbf16>, vector<8x256xbf16>, vector<8x256xf32> -> vector<8x256xf32>
    %47 = vector.broadcast %37 : vector<8x1xf32> to vector<8x256xf32>
    %48 = arith.mulf %46, %47 : vector<8x256xf32>
    %49 = vector.broadcast %38 : vector<8x1xf32> to vector<8x256xf32>
    %50 = arith.addf %48, %49 : vector<8x256xf32>
    %cst_22 = arith.constant 0.000000e+00 : f32
    %51 = vector.broadcast %cst_22 : f32 to vector<8x256xf32>
    %52 = arith.maximumf %50, %51 : vector<8x256xf32>
    %cst_23 = arith.constant 0.000000e+00 : f32
    %53 = vector.broadcast %cst_23 : f32 to vector<8x34xf32>
    %54 = tpu.concatenate %53, %52, %53 in 1 : vector<8x34xf32>, vector<8x256xf32>, vector<8x34xf32> -> vector<8x324xf32>
    %55 = vector.broadcast %22 : vector<1x324xf32> to vector<8x324xf32>
    %56 = arith.mulf %54, %55 : vector<8x324xf32>
    %57 = vector.broadcast %26 : vector<1x324xf32> to vector<8x324xf32>
    %58 = arith.mulf %54, %57 : vector<8x324xf32>
    %59 = vector.broadcast %30 : vector<1x324xf32> to vector<8x324xf32>
    %60 = arith.mulf %54, %59 : vector<8x324xf32>
    %61 = vector.broadcast %34 : vector<1x324xf32> to vector<8x324xf32>
    %62 = arith.mulf %54, %61 : vector<8x324xf32>
    %cst_24 = arith.constant 0.000000e+00 : f32
    %63 = vector.broadcast %cst_24 : f32 to vector<3x8x256xf32>
    %64 = vector.extract_strided_slice %56 {offsets = [0, 0], sizes = [8, 256], strides = [1, 1]} : vector<8x324xf32> to vector<8x256xf32>
    %c0_25 = arith.constant 0 : index
    %c0_26 = arith.constant 0 : index
    %c0_27 = arith.constant 0 : index
    %c0_28 = arith.constant 0 : index
    %65 = vector.load %arg5[%c0_25, %c0_26, %c0_27, %c0_28] : memref<25x3x8x1xf32, #tpu.memory_space<vmem>>, vector<1x3x8x1xf32>
    %66 = vector.shape_cast %65 : vector<1x3x8x1xf32> to vector<3x8x1xf32>
    %67 = vector.shape_cast %64 : vector<8x256xf32> to vector<1x8x256xf32>
    %68 = vector.broadcast %67 : vector<1x8x256xf32> to vector<3x8x256xf32>
    %69 = vector.broadcast %66 : vector<3x8x1xf32> to vector<3x8x256xf32>
    %70 = arith.mulf %68, %69 : vector<3x8x256xf32>
    %71 = arith.addf %63, %70 : vector<3x8x256xf32>
    %72 = vector.extract_strided_slice %58 {offsets = [0, 1], sizes = [8, 256], strides = [1, 1]} : vector<8x324xf32> to vector<8x256xf32>
    %c1 = arith.constant 1 : index
    %c0_29 = arith.constant 0 : index
    %c0_30 = arith.constant 0 : index
    %c0_31 = arith.constant 0 : index
    %73 = vector.load %arg5[%c1, %c0_29, %c0_30, %c0_31] : memref<25x3x8x1xf32, #tpu.memory_space<vmem>>, vector<1x3x8x1xf32>
    %74 = vector.shape_cast %73 : vector<1x3x8x1xf32> to vector<3x8x1xf32>
    %75 = vector.shape_cast %72 : vector<8x256xf32> to vector<1x8x256xf32>
    %76 = vector.broadcast %75 : vector<1x8x256xf32> to vector<3x8x256xf32>
    %77 = vector.broadcast %74 : vector<3x8x1xf32> to vector<3x8x256xf32>
    %78 = arith.mulf %76, %77 : vector<3x8x256xf32>
    %79 = arith.addf %71, %78 : vector<3x8x256xf32>
    %80 = vector.extract_strided_slice %54 {offsets = [0, 2], sizes = [8, 256], strides = [1, 1]} : vector<8x324xf32> to vector<8x256xf32>
    %c2 = arith.constant 2 : index
    %c0_32 = arith.constant 0 : index
    %c0_33 = arith.constant 0 : index
    %c0_34 = arith.constant 0 : index
    %81 = vector.load %arg5[%c2, %c0_32, %c0_33, %c0_34] : memref<25x3x8x1xf32, #tpu.memory_space<vmem>>, vector<1x3x8x1xf32>
    %82 = vector.shape_cast %81 : vector<1x3x8x1xf32> to vector<3x8x1xf32>
    %83 = vector.shape_cast %80 : vector<8x256xf32> to vector<1x8x256xf32>
    %84 = vector.broadcast %83 : vector<1x8x256xf32> to vector<3x8x256xf32>
    %85 = vector.broadcast %82 : vector<3x8x1xf32> to vector<3x8x256xf32>
    %86 = arith.mulf %84, %85 : vector<3x8x256xf32>
    %87 = arith.addf %79, %86 : vector<3x8x256xf32>
    %88 = vector.extract_strided_slice %60 {offsets = [0, 3], sizes = [8, 256], strides = [1, 1]} : vector<8x324xf32> to vector<8x256xf32>
    %c3 = arith.constant 3 : index
    %c0_35 = arith.constant 0 : index
    %c0_36 = arith.constant 0 : index
    %c0_37 = arith.constant 0 : index
    %89 = vector.load %arg5[%c3, %c0_35, %c0_36, %c0_37] : memref<25x3x8x1xf32, #tpu.memory_space<vmem>>, vector<1x3x8x1xf32>
    %90 = vector.shape_cast %89 : vector<1x3x8x1xf32> to vector<3x8x1xf32>
    %91 = vector.shape_cast %88 : vector<8x256xf32> to vector<1x8x256xf32>
    %92 = vector.broadcast %91 : vector<1x8x256xf32> to vector<3x8x256xf32>
    %93 = vector.broadcast %90 : vector<3x8x1xf32> to vector<3x8x256xf32>
    %94 = arith.mulf %92, %93 : vector<3x8x256xf32>
    %95 = arith.addf %87, %94 : vector<3x8x256xf32>
    %96 = vector.extract_strided_slice %62 {offsets = [0, 4], sizes = [8, 256], strides = [1, 1]} : vector<8x324xf32> to vector<8x256xf32>
    %c4 = arith.constant 4 : index
    %c0_38 = arith.constant 0 : index
    %c0_39 = arith.constant 0 : index
    %c0_40 = arith.constant 0 : index
    %97 = vector.load %arg5[%c4, %c0_38, %c0_39, %c0_40] : memref<25x3x8x1xf32, #tpu.memory_space<vmem>>, vector<1x3x8x1xf32>
    %98 = vector.shape_cast %97 : vector<1x3x8x1xf32> to vector<3x8x1xf32>
    %99 = vector.shape_cast %96 : vector<8x256xf32> to vector<1x8x256xf32>
    %100 = vector.broadcast %99 : vector<1x8x256xf32> to vector<3x8x256xf32>
    %101 = vector.broadcast %98 : vector<3x8x1xf32> to vector<3x8x256xf32>
    %102 = arith.mulf %100, %101 : vector<3x8x256xf32>
    %103 = arith.addf %95, %102 : vector<3x8x256xf32>
    %104 = vector.extract_strided_slice %56 {offsets = [0, 16], sizes = [8, 256], strides = [1, 1]} : vector<8x324xf32> to vector<8x256xf32>
    %c5 = arith.constant 5 : index
    %c0_41 = arith.constant 0 : index
    %c0_42 = arith.constant 0 : index
    %c0_43 = arith.constant 0 : index
    %105 = vector.load %arg5[%c5, %c0_41, %c0_42, %c0_43] : memref<25x3x8x1xf32, #tpu.memory_space<vmem>>, vector<1x3x8x1xf32>
    %106 = vector.shape_cast %105 : vector<1x3x8x1xf32> to vector<3x8x1xf32>
    %107 = vector.shape_cast %104 : vector<8x256xf32> to vector<1x8x256xf32>
    %108 = vector.broadcast %107 : vector<1x8x256xf32> to vector<3x8x256xf32>
    %109 = vector.broadcast %106 : vector<3x8x1xf32> to vector<3x8x256xf32>
    %110 = arith.mulf %108, %109 : vector<3x8x256xf32>
    %111 = arith.addf %103, %110 : vector<3x8x256xf32>
    %112 = vector.extract_strided_slice %58 {offsets = [0, 17], sizes = [8, 256], strides = [1, 1]} : vector<8x324xf32> to vector<8x256xf32>
    %c6 = arith.constant 6 : index
    %c0_44 = arith.constant 0 : index
    %c0_45 = arith.constant 0 : index
    %c0_46 = arith.constant 0 : index
    %113 = vector.load %arg5[%c6, %c0_44, %c0_45, %c0_46] : memref<25x3x8x1xf32, #tpu.memory_space<vmem>>, vector<1x3x8x1xf32>
    %114 = vector.shape_cast %113 : vector<1x3x8x1xf32> to vector<3x8x1xf32>
    %115 = vector.shape_cast %112 : vector<8x256xf32> to vector<1x8x256xf32>
    %116 = vector.broadcast %115 : vector<1x8x256xf32> to vector<3x8x256xf32>
    %117 = vector.broadcast %114 : vector<3x8x1xf32> to vector<3x8x256xf32>
    %118 = arith.mulf %116, %117 : vector<3x8x256xf32>
    %119 = arith.addf %111, %118 : vector<3x8x256xf32>
    %120 = vector.extract_strided_slice %54 {offsets = [0, 18], sizes = [8, 256], strides = [1, 1]} : vector<8x324xf32> to vector<8x256xf32>
    %c7 = arith.constant 7 : index
    %c0_47 = arith.constant 0 : index
    %c0_48 = arith.constant 0 : index
    %c0_49 = arith.constant 0 : index
    %121 = vector.load %arg5[%c7, %c0_47, %c0_48, %c0_49] : memref<25x3x8x1xf32, #tpu.memory_space<vmem>>, vector<1x3x8x1xf32>
    %122 = vector.shape_cast %121 : vector<1x3x8x1xf32> to vector<3x8x1xf32>
    %123 = vector.shape_cast %120 : vector<8x256xf32> to vector<1x8x256xf32>
    %124 = vector.broadcast %123 : vector<1x8x256xf32> to vector<3x8x256xf32>
    %125 = vector.broadcast %122 : vector<3x8x1xf32> to vector<3x8x256xf32>
    %126 = arith.mulf %124, %125 : vector<3x8x256xf32>
    %127 = arith.addf %119, %126 : vector<3x8x256xf32>
    %128 = vector.extract_strided_slice %60 {offsets = [0, 19], sizes = [8, 256], strides = [1, 1]} : vector<8x324xf32> to vector<8x256xf32>
    %c8 = arith.constant 8 : index
    %c0_50 = arith.constant 0 : index
    %c0_51 = arith.constant 0 : index
    %c0_52 = arith.constant 0 : index
    %129 = vector.load %arg5[%c8, %c0_50, %c0_51, %c0_52] : memref<25x3x8x1xf32, #tpu.memory_space<vmem>>, vector<1x3x8x1xf32>
    %130 = vector.shape_cast %129 : vector<1x3x8x1xf32> to vector<3x8x1xf32>
    %131 = vector.shape_cast %128 : vector<8x256xf32> to vector<1x8x256xf32>
    %132 = vector.broadcast %131 : vector<1x8x256xf32> to vector<3x8x256xf32>
    %133 = vector.broadcast %130 : vector<3x8x1xf32> to vector<3x8x256xf32>
    %134 = arith.mulf %132, %133 : vector<3x8x256xf32>
    %135 = arith.addf %127, %134 : vector<3x8x256xf32>
    %136 = vector.extract_strided_slice %62 {offsets = [0, 20], sizes = [8, 256], strides = [1, 1]} : vector<8x324xf32> to vector<8x256xf32>
    %c9 = arith.constant 9 : index
    %c0_53 = arith.constant 0 : index
    %c0_54 = arith.constant 0 : index
    %c0_55 = arith.constant 0 : index
    %137 = vector.load %arg5[%c9, %c0_53, %c0_54, %c0_55] : memref<25x3x8x1xf32, #tpu.memory_space<vmem>>, vector<1x3x8x1xf32>
    %138 = vector.shape_cast %137 : vector<1x3x8x1xf32> to vector<3x8x1xf32>
    %139 = vector.shape_cast %136 : vector<8x256xf32> to vector<1x8x256xf32>
    %140 = vector.broadcast %139 : vector<1x8x256xf32> to vector<3x8x256xf32>
    %141 = vector.broadcast %138 : vector<3x8x1xf32> to vector<3x8x256xf32>
    %142 = arith.mulf %140, %141 : vector<3x8x256xf32>
    %143 = arith.addf %135, %142 : vector<3x8x256xf32>
    %144 = vector.extract_strided_slice %56 {offsets = [0, 32], sizes = [8, 256], strides = [1, 1]} : vector<8x324xf32> to vector<8x256xf32>
    %c10 = arith.constant 10 : index
    %c0_56 = arith.constant 0 : index
    %c0_57 = arith.constant 0 : index
    %c0_58 = arith.constant 0 : index
    %145 = vector.load %arg5[%c10, %c0_56, %c0_57, %c0_58] : memref<25x3x8x1xf32, #tpu.memory_space<vmem>>, vector<1x3x8x1xf32>
    %146 = vector.shape_cast %145 : vector<1x3x8x1xf32> to vector<3x8x1xf32>
    %147 = vector.shape_cast %144 : vector<8x256xf32> to vector<1x8x256xf32>
    %148 = vector.broadcast %147 : vector<1x8x256xf32> to vector<3x8x256xf32>
    %149 = vector.broadcast %146 : vector<3x8x1xf32> to vector<3x8x256xf32>
    %150 = arith.mulf %148, %149 : vector<3x8x256xf32>
    %151 = arith.addf %143, %150 : vector<3x8x256xf32>
    %152 = vector.extract_strided_slice %58 {offsets = [0, 33], sizes = [8, 256], strides = [1, 1]} : vector<8x324xf32> to vector<8x256xf32>
    %c11 = arith.constant 11 : index
    %c0_59 = arith.constant 0 : index
    %c0_60 = arith.constant 0 : index
    %c0_61 = arith.constant 0 : index
    %153 = vector.load %arg5[%c11, %c0_59, %c0_60, %c0_61] : memref<25x3x8x1xf32, #tpu.memory_space<vmem>>, vector<1x3x8x1xf32>
    %154 = vector.shape_cast %153 : vector<1x3x8x1xf32> to vector<3x8x1xf32>
    %155 = vector.shape_cast %152 : vector<8x256xf32> to vector<1x8x256xf32>
    %156 = vector.broadcast %155 : vector<1x8x256xf32> to vector<3x8x256xf32>
    %157 = vector.broadcast %154 : vector<3x8x1xf32> to vector<3x8x256xf32>
    %158 = arith.mulf %156, %157 : vector<3x8x256xf32>
    %159 = arith.addf %151, %158 : vector<3x8x256xf32>
    %160 = vector.extract_strided_slice %54 {offsets = [0, 34], sizes = [8, 256], strides = [1, 1]} : vector<8x324xf32> to vector<8x256xf32>
    %c12 = arith.constant 12 : index
    %c0_62 = arith.constant 0 : index
    %c0_63 = arith.constant 0 : index
    %c0_64 = arith.constant 0 : index
    %161 = vector.load %arg5[%c12, %c0_62, %c0_63, %c0_64] : memref<25x3x8x1xf32, #tpu.memory_space<vmem>>, vector<1x3x8x1xf32>
    %162 = vector.shape_cast %161 : vector<1x3x8x1xf32> to vector<3x8x1xf32>
    %163 = vector.shape_cast %160 : vector<8x256xf32> to vector<1x8x256xf32>
    %164 = vector.broadcast %163 : vector<1x8x256xf32> to vector<3x8x256xf32>
    %165 = vector.broadcast %162 : vector<3x8x1xf32> to vector<3x8x256xf32>
    %166 = arith.mulf %164, %165 : vector<3x8x256xf32>
    %167 = arith.addf %159, %166 : vector<3x8x256xf32>
    %168 = vector.extract_strided_slice %60 {offsets = [0, 35], sizes = [8, 256], strides = [1, 1]} : vector<8x324xf32> to vector<8x256xf32>
    %c13 = arith.constant 13 : index
    %c0_65 = arith.constant 0 : index
    %c0_66 = arith.constant 0 : index
    %c0_67 = arith.constant 0 : index
    %169 = vector.load %arg5[%c13, %c0_65, %c0_66, %c0_67] : memref<25x3x8x1xf32, #tpu.memory_space<vmem>>, vector<1x3x8x1xf32>
    %170 = vector.shape_cast %169 : vector<1x3x8x1xf32> to vector<3x8x1xf32>
    %171 = vector.shape_cast %168 : vector<8x256xf32> to vector<1x8x256xf32>
    %172 = vector.broadcast %171 : vector<1x8x256xf32> to vector<3x8x256xf32>
    %173 = vector.broadcast %170 : vector<3x8x1xf32> to vector<3x8x256xf32>
    %174 = arith.mulf %172, %173 : vector<3x8x256xf32>
    %175 = arith.addf %167, %174 : vector<3x8x256xf32>
    %176 = vector.extract_strided_slice %62 {offsets = [0, 36], sizes = [8, 256], strides = [1, 1]} : vector<8x324xf32> to vector<8x256xf32>
    %c14 = arith.constant 14 : index
    %c0_68 = arith.constant 0 : index
    %c0_69 = arith.constant 0 : index
    %c0_70 = arith.constant 0 : index
    %177 = vector.load %arg5[%c14, %c0_68, %c0_69, %c0_70] : memref<25x3x8x1xf32, #tpu.memory_space<vmem>>, vector<1x3x8x1xf32>
    %178 = vector.shape_cast %177 : vector<1x3x8x1xf32> to vector<3x8x1xf32>
    %179 = vector.shape_cast %176 : vector<8x256xf32> to vector<1x8x256xf32>
    %180 = vector.broadcast %179 : vector<1x8x256xf32> to vector<3x8x256xf32>
    %181 = vector.broadcast %178 : vector<3x8x1xf32> to vector<3x8x256xf32>
    %182 = arith.mulf %180, %181 : vector<3x8x256xf32>
    %183 = arith.addf %175, %182 : vector<3x8x256xf32>
    %184 = vector.extract_strided_slice %56 {offsets = [0, 48], sizes = [8, 256], strides = [1, 1]} : vector<8x324xf32> to vector<8x256xf32>
    %c15 = arith.constant 15 : index
    %c0_71 = arith.constant 0 : index
    %c0_72 = arith.constant 0 : index
    %c0_73 = arith.constant 0 : index
    %185 = vector.load %arg5[%c15, %c0_71, %c0_72, %c0_73] : memref<25x3x8x1xf32, #tpu.memory_space<vmem>>, vector<1x3x8x1xf32>
    %186 = vector.shape_cast %185 : vector<1x3x8x1xf32> to vector<3x8x1xf32>
    %187 = vector.shape_cast %184 : vector<8x256xf32> to vector<1x8x256xf32>
    %188 = vector.broadcast %187 : vector<1x8x256xf32> to vector<3x8x256xf32>
    %189 = vector.broadcast %186 : vector<3x8x1xf32> to vector<3x8x256xf32>
    %190 = arith.mulf %188, %189 : vector<3x8x256xf32>
    %191 = arith.addf %183, %190 : vector<3x8x256xf32>
    %192 = vector.extract_strided_slice %58 {offsets = [0, 49], sizes = [8, 256], strides = [1, 1]} : vector<8x324xf32> to vector<8x256xf32>
    %c16 = arith.constant 16 : index
    %c0_74 = arith.constant 0 : index
    %c0_75 = arith.constant 0 : index
    %c0_76 = arith.constant 0 : index
    %193 = vector.load %arg5[%c16, %c0_74, %c0_75, %c0_76] : memref<25x3x8x1xf32, #tpu.memory_space<vmem>>, vector<1x3x8x1xf32>
    %194 = vector.shape_cast %193 : vector<1x3x8x1xf32> to vector<3x8x1xf32>
    %195 = vector.shape_cast %192 : vector<8x256xf32> to vector<1x8x256xf32>
    %196 = vector.broadcast %195 : vector<1x8x256xf32> to vector<3x8x256xf32>
    %197 = vector.broadcast %194 : vector<3x8x1xf32> to vector<3x8x256xf32>
    %198 = arith.mulf %196, %197 : vector<3x8x256xf32>
    %199 = arith.addf %191, %198 : vector<3x8x256xf32>
    %200 = vector.extract_strided_slice %54 {offsets = [0, 50], sizes = [8, 256], strides = [1, 1]} : vector<8x324xf32> to vector<8x256xf32>
    %c17 = arith.constant 17 : index
    %c0_77 = arith.constant 0 : index
    %c0_78 = arith.constant 0 : index
    %c0_79 = arith.constant 0 : index
    %201 = vector.load %arg5[%c17, %c0_77, %c0_78, %c0_79] : memref<25x3x8x1xf32, #tpu.memory_space<vmem>>, vector<1x3x8x1xf32>
    %202 = vector.shape_cast %201 : vector<1x3x8x1xf32> to vector<3x8x1xf32>
    %203 = vector.shape_cast %200 : vector<8x256xf32> to vector<1x8x256xf32>
    %204 = vector.broadcast %203 : vector<1x8x256xf32> to vector<3x8x256xf32>
    %205 = vector.broadcast %202 : vector<3x8x1xf32> to vector<3x8x256xf32>
    %206 = arith.mulf %204, %205 : vector<3x8x256xf32>
    %207 = arith.addf %199, %206 : vector<3x8x256xf32>
    %208 = vector.extract_strided_slice %60 {offsets = [0, 51], sizes = [8, 256], strides = [1, 1]} : vector<8x324xf32> to vector<8x256xf32>
    %c18 = arith.constant 18 : index
    %c0_80 = arith.constant 0 : index
    %c0_81 = arith.constant 0 : index
    %c0_82 = arith.constant 0 : index
    %209 = vector.load %arg5[%c18, %c0_80, %c0_81, %c0_82] : memref<25x3x8x1xf32, #tpu.memory_space<vmem>>, vector<1x3x8x1xf32>
    %210 = vector.shape_cast %209 : vector<1x3x8x1xf32> to vector<3x8x1xf32>
    %211 = vector.shape_cast %208 : vector<8x256xf32> to vector<1x8x256xf32>
    %212 = vector.broadcast %211 : vector<1x8x256xf32> to vector<3x8x256xf32>
    %213 = vector.broadcast %210 : vector<3x8x1xf32> to vector<3x8x256xf32>
    %214 = arith.mulf %212, %213 : vector<3x8x256xf32>
    %215 = arith.addf %207, %214 : vector<3x8x256xf32>
    %216 = vector.extract_strided_slice %62 {offsets = [0, 52], sizes = [8, 256], strides = [1, 1]} : vector<8x324xf32> to vector<8x256xf32>
    %c19 = arith.constant 19 : index
    %c0_83 = arith.constant 0 : index
    %c0_84 = arith.constant 0 : index
    %c0_85 = arith.constant 0 : index
    %217 = vector.load %arg5[%c19, %c0_83, %c0_84, %c0_85] : memref<25x3x8x1xf32, #tpu.memory_space<vmem>>, vector<1x3x8x1xf32>
    %218 = vector.shape_cast %217 : vector<1x3x8x1xf32> to vector<3x8x1xf32>
    %219 = vector.shape_cast %216 : vector<8x256xf32> to vector<1x8x256xf32>
    %220 = vector.broadcast %219 : vector<1x8x256xf32> to vector<3x8x256xf32>
    %221 = vector.broadcast %218 : vector<3x8x1xf32> to vector<3x8x256xf32>
    %222 = arith.mulf %220, %221 : vector<3x8x256xf32>
    %223 = arith.addf %215, %222 : vector<3x8x256xf32>
    %224 = vector.extract_strided_slice %56 {offsets = [0, 64], sizes = [8, 256], strides = [1, 1]} : vector<8x324xf32> to vector<8x256xf32>
    %c20 = arith.constant 20 : index
    %c0_86 = arith.constant 0 : index
    %c0_87 = arith.constant 0 : index
    %c0_88 = arith.constant 0 : index
    %225 = vector.load %arg5[%c20, %c0_86, %c0_87, %c0_88] : memref<25x3x8x1xf32, #tpu.memory_space<vmem>>, vector<1x3x8x1xf32>
    %226 = vector.shape_cast %225 : vector<1x3x8x1xf32> to vector<3x8x1xf32>
    %227 = vector.shape_cast %224 : vector<8x256xf32> to vector<1x8x256xf32>
    %228 = vector.broadcast %227 : vector<1x8x256xf32> to vector<3x8x256xf32>
    %229 = vector.broadcast %226 : vector<3x8x1xf32> to vector<3x8x256xf32>
    %230 = arith.mulf %228, %229 : vector<3x8x256xf32>
    %231 = arith.addf %223, %230 : vector<3x8x256xf32>
    %232 = vector.extract_strided_slice %58 {offsets = [0, 65], sizes = [8, 256], strides = [1, 1]} : vector<8x324xf32> to vector<8x256xf32>
    %c21 = arith.constant 21 : index
    %c0_89 = arith.constant 0 : index
    %c0_90 = arith.constant 0 : index
    %c0_91 = arith.constant 0 : index
    %233 = vector.load %arg5[%c21, %c0_89, %c0_90, %c0_91] : memref<25x3x8x1xf32, #tpu.memory_space<vmem>>, vector<1x3x8x1xf32>
    %234 = vector.shape_cast %233 : vector<1x3x8x1xf32> to vector<3x8x1xf32>
    %235 = vector.shape_cast %232 : vector<8x256xf32> to vector<1x8x256xf32>
    %236 = vector.broadcast %235 : vector<1x8x256xf32> to vector<3x8x256xf32>
    %237 = vector.broadcast %234 : vector<3x8x1xf32> to vector<3x8x256xf32>
    %238 = arith.mulf %236, %237 : vector<3x8x256xf32>
    %239 = arith.addf %231, %238 : vector<3x8x256xf32>
    %240 = vector.extract_strided_slice %54 {offsets = [0, 66], sizes = [8, 256], strides = [1, 1]} : vector<8x324xf32> to vector<8x256xf32>
    %c22 = arith.constant 22 : index
    %c0_92 = arith.constant 0 : index
    %c0_93 = arith.constant 0 : index
    %c0_94 = arith.constant 0 : index
    %241 = vector.load %arg5[%c22, %c0_92, %c0_93, %c0_94] : memref<25x3x8x1xf32, #tpu.memory_space<vmem>>, vector<1x3x8x1xf32>
    %242 = vector.shape_cast %241 : vector<1x3x8x1xf32> to vector<3x8x1xf32>
    %243 = vector.shape_cast %240 : vector<8x256xf32> to vector<1x8x256xf32>
    %244 = vector.broadcast %243 : vector<1x8x256xf32> to vector<3x8x256xf32>
    %245 = vector.broadcast %242 : vector<3x8x1xf32> to vector<3x8x256xf32>
    %246 = arith.mulf %244, %245 : vector<3x8x256xf32>
    %247 = arith.addf %239, %246 : vector<3x8x256xf32>
    %248 = vector.extract_strided_slice %60 {offsets = [0, 67], sizes = [8, 256], strides = [1, 1]} : vector<8x324xf32> to vector<8x256xf32>
    %c23 = arith.constant 23 : index
    %c0_95 = arith.constant 0 : index
    %c0_96 = arith.constant 0 : index
    %c0_97 = arith.constant 0 : index
    %249 = vector.load %arg5[%c23, %c0_95, %c0_96, %c0_97] : memref<25x3x8x1xf32, #tpu.memory_space<vmem>>, vector<1x3x8x1xf32>
    %250 = vector.shape_cast %249 : vector<1x3x8x1xf32> to vector<3x8x1xf32>
    %251 = vector.shape_cast %248 : vector<8x256xf32> to vector<1x8x256xf32>
    %252 = vector.broadcast %251 : vector<1x8x256xf32> to vector<3x8x256xf32>
    %253 = vector.broadcast %250 : vector<3x8x1xf32> to vector<3x8x256xf32>
    %254 = arith.mulf %252, %253 : vector<3x8x256xf32>
    %255 = arith.addf %247, %254 : vector<3x8x256xf32>
    %256 = vector.extract_strided_slice %62 {offsets = [0, 68], sizes = [8, 256], strides = [1, 1]} : vector<8x324xf32> to vector<8x256xf32>
    %c24 = arith.constant 24 : index
    %c0_98 = arith.constant 0 : index
    %c0_99 = arith.constant 0 : index
    %c0_100 = arith.constant 0 : index
    %257 = vector.load %arg5[%c24, %c0_98, %c0_99, %c0_100] : memref<25x3x8x1xf32, #tpu.memory_space<vmem>>, vector<1x3x8x1xf32>
    %258 = vector.shape_cast %257 : vector<1x3x8x1xf32> to vector<3x8x1xf32>
    %259 = vector.shape_cast %256 : vector<8x256xf32> to vector<1x8x256xf32>
    %260 = vector.broadcast %259 : vector<1x8x256xf32> to vector<3x8x256xf32>
    %261 = vector.broadcast %258 : vector<3x8x1xf32> to vector<3x8x256xf32>
    %262 = arith.mulf %260, %261 : vector<3x8x256xf32>
    %263 = arith.addf %255, %262 : vector<3x8x256xf32>
    %264 = vector.shape_cast %263 : vector<3x8x256xf32> to vector<24x256xf32>
    %265 = vector.broadcast %39 : vector<24x1xf32> to vector<24x256xf32>
    %266 = arith.mulf %264, %265 : vector<24x256xf32>
    %267 = vector.broadcast %40 : vector<24x1xf32> to vector<24x256xf32>
    %268 = arith.addf %266, %267 : vector<24x256xf32>
    %cst_101 = arith.constant 0.000000e+00 : f32
    %269 = vector.broadcast %cst_101 : f32 to vector<24x256xf32>
    %270 = arith.maximumf %268, %269 : vector<24x256xf32>
    %271 = arith.truncf %270 : vector<24x256xf32> to vector<24x256xbf16>
    %cst_102 = arith.constant dense<0.000000e+00> : vector<8x256xf32>
    %272 = tpu.matmul %36, %271, %cst_102 {dimension_numbers = #tpu.dot_dimension_numbers<[1], [0], [0], [1], [0, 0, 1, 1], [], []>} : vector<8x24xbf16>, vector<24x256xbf16>, vector<8x256xf32> -> vector<8x256xf32>
    %273 = vector.broadcast %41 : vector<8x1xf32> to vector<8x256xf32>
    %274 = arith.mulf %272, %273 : vector<8x256xf32>
    %275 = vector.broadcast %42 : vector<8x1xf32> to vector<8x256xf32>
    %276 = arith.addf %274, %275 : vector<8x256xf32>
    %c0_103 = arith.constant 0 : index
    %c0_104 = arith.constant 0 : index
    %c0_105 = arith.constant 0 : index
    %277 = vector.load %arg11[%c0_103, %c0_104, %c0_105] : memref<2x8x256xf32, #tpu.memory_space<vmem>>, vector<1x8x256xf32>
    %278 = vector.shape_cast %277 : vector<1x8x256xf32> to vector<8x256xf32>
    %279 = vector.shape_cast %276 : vector<8x256xf32> to vector<1x8x256xf32>
    tpu.vector_store %arg11[%c0_103, %c0_104, %c0_105], %279 {strides = array<i32>} : memref<2x8x256xf32, #tpu.memory_space<vmem>>, vector<1x8x256xf32>,
    %280 = vector.extract_strided_slice %276 {offsets = [0, 0], sizes = [1, 256], strides = [1, 1]} : vector<8x256xf32> to vector<1x256xf32>
    %cst_106 = arith.constant 0.000000e+00 : f32
    %281 = vector.broadcast %cst_106 : f32 to vector<1x256xf32>
    %282 = arith.subf %281, %280 : vector<1x256xf32>
    %283 = math.exp %282 : vector<1x256xf32>
    %cst_107 = arith.constant 1.000000e+00 : f32
    %284 = vector.broadcast %cst_107 : f32 to vector<1x256xf32>
    %285 = arith.addf %284, %283 : vector<1x256xf32>
    %286 = tpu.reciprocal %285 {approx = true} : vector<1x256xf32> -> vector<1x256xf32>
    %c0_108 = arith.constant 0 : index
    %c0_109 = arith.constant 0 : index
    %c0_110 = arith.constant 0 : index
    %287 = vector.load %arg11[%c0_108, %c0_109, %c0_110] : memref<2x8x256xf32, #tpu.memory_space<vmem>>, vector<1x1x256xf32>
    %288 = vector.shape_cast %287 : vector<1x1x256xf32> to vector<1x256xf32>
    %289 = vector.shape_cast %286 : vector<1x256xf32> to vector<1x1x256xf32>
    tpu.vector_store %arg11[%c0_108, %c0_109, %c0_110], %289 {strides = array<i32>} : memref<2x8x256xf32, #tpu.memory_space<vmem>>, vector<1x1x256xf32>,
    %c1_111 = arith.constant 1 : index
    %c0_112 = arith.constant 0 : index
    %c0_113 = arith.constant 0 : index
    %290 = vector.load %arg1[%c1_111, %c0_112, %c0_113] : memref<2x8x256xf32, #tpu.memory_space<vmem>>, vector<1x8x256xf32>
    %291 = vector.shape_cast %290 : vector<1x8x256xf32> to vector<8x256xf32>
    %292 = arith.truncf %291 : vector<8x256xf32> to vector<8x256xbf16>
    %cst_114 = arith.constant dense<0.000000e+00> : vector<8x256xf32>
    %293 = tpu.matmul %35, %292, %cst_114 {dimension_numbers = #tpu.dot_dimension_numbers<[1], [0], [0], [1], [0, 0, 1, 1], [], []>} : vector<8x8xbf16>, vector<8x256xbf16>, vector<8x256xf32> -> vector<8x256xf32>
    %294 = vector.broadcast %37 : vector<8x1xf32> to vector<8x256xf32>
    %295 = arith.mulf %293, %294 : vector<8x256xf32>
    %296 = vector.broadcast %38 : vector<8x1xf32> to vector<8x256xf32>
    %297 = arith.addf %295, %296 : vector<8x256xf32>
    %cst_115 = arith.constant 0.000000e+00 : f32
    %298 = vector.broadcast %cst_115 : f32 to vector<8x256xf32>
    %299 = arith.maximumf %297, %298 : vector<8x256xf32>
    %cst_116 = arith.constant 0.000000e+00 : f32
    %300 = vector.broadcast %cst_116 : f32 to vector<8x34xf32>
    %301 = tpu.concatenate %300, %299, %300 in 1 : vector<8x34xf32>, vector<8x256xf32>, vector<8x34xf32> -> vector<8x324xf32>
    %302 = vector.broadcast %22 : vector<1x324xf32> to vector<8x324xf32>
    %303 = arith.mulf %301, %302 : vector<8x324xf32>
    %304 = vector.broadcast %26 : vector<1x324xf32> to vector<8x324xf32>
    %305 = arith.mulf %301, %304 : vector<8x324xf32>
    %306 = vector.broadcast %30 : vector<1x324xf32> to vector<8x324xf32>
    %307 = arith.mulf %301, %306 : vector<8x324xf32>
    %308 = vector.broadcast %34 : vector<1x324xf32> to vector<8x324xf32>
    %309 = arith.mulf %301, %308 : vector<8x324xf32>
    %cst_117 = arith.constant 0.000000e+00 : f32
    %310 = vector.broadcast %cst_117 : f32 to vector<3x8x256xf32>
    %311 = vector.extract_strided_slice %303 {offsets = [0, 0], sizes = [8, 256], strides = [1, 1]} : vector<8x324xf32> to vector<8x256xf32>
    %c0_118 = arith.constant 0 : index
    %c0_119 = arith.constant 0 : index
    %c0_120 = arith.constant 0 : index
    %c0_121 = arith.constant 0 : index
    %312 = vector.load %arg5[%c0_118, %c0_119, %c0_120, %c0_121] : memref<25x3x8x1xf32, #tpu.memory_space<vmem>>, vector<1x3x8x1xf32>
    %313 = vector.shape_cast %312 : vector<1x3x8x1xf32> to vector<3x8x1xf32>
    %314 = vector.shape_cast %311 : vector<8x256xf32> to vector<1x8x256xf32>
    %315 = vector.broadcast %314 : vector<1x8x256xf32> to vector<3x8x256xf32>
    %316 = vector.broadcast %313 : vector<3x8x1xf32> to vector<3x8x256xf32>
    %317 = arith.mulf %315, %316 : vector<3x8x256xf32>
    %318 = arith.addf %310, %317 : vector<3x8x256xf32>
    %319 = vector.extract_strided_slice %305 {offsets = [0, 1], sizes = [8, 256], strides = [1, 1]} : vector<8x324xf32> to vector<8x256xf32>
    %c1_122 = arith.constant 1 : index
    %c0_123 = arith.constant 0 : index
    %c0_124 = arith.constant 0 : index
    %c0_125 = arith.constant 0 : index
    %320 = vector.load %arg5[%c1_122, %c0_123, %c0_124, %c0_125] : memref<25x3x8x1xf32, #tpu.memory_space<vmem>>, vector<1x3x8x1xf32>
    %321 = vector.shape_cast %320 : vector<1x3x8x1xf32> to vector<3x8x1xf32>
    %322 = vector.shape_cast %319 : vector<8x256xf32> to vector<1x8x256xf32>
    %323 = vector.broadcast %322 : vector<1x8x256xf32> to vector<3x8x256xf32>
    %324 = vector.broadcast %321 : vector<3x8x1xf32> to vector<3x8x256xf32>
    %325 = arith.mulf %323, %324 : vector<3x8x256xf32>
    %326 = arith.addf %318, %325 : vector<3x8x256xf32>
    %327 = vector.extract_strided_slice %301 {offsets = [0, 2], sizes = [8, 256], strides = [1, 1]} : vector<8x324xf32> to vector<8x256xf32>
    %c2_126 = arith.constant 2 : index
    %c0_127 = arith.constant 0 : index
    %c0_128 = arith.constant 0 : index
    %c0_129 = arith.constant 0 : index
    %328 = vector.load %arg5[%c2_126, %c0_127, %c0_128, %c0_129] : memref<25x3x8x1xf32, #tpu.memory_space<vmem>>, vector<1x3x8x1xf32>
    %329 = vector.shape_cast %328 : vector<1x3x8x1xf32> to vector<3x8x1xf32>
    %330 = vector.shape_cast %327 : vector<8x256xf32> to vector<1x8x256xf32>
    %331 = vector.broadcast %330 : vector<1x8x256xf32> to vector<3x8x256xf32>
    %332 = vector.broadcast %329 : vector<3x8x1xf32> to vector<3x8x256xf32>
    %333 = arith.mulf %331, %332 : vector<3x8x256xf32>
    %334 = arith.addf %326, %333 : vector<3x8x256xf32>
    %335 = vector.extract_strided_slice %307 {offsets = [0, 3], sizes = [8, 256], strides = [1, 1]} : vector<8x324xf32> to vector<8x256xf32>
    %c3_130 = arith.constant 3 : index
    %c0_131 = arith.constant 0 : index
    %c0_132 = arith.constant 0 : index
    %c0_133 = arith.constant 0 : index
    %336 = vector.load %arg5[%c3_130, %c0_131, %c0_132, %c0_133] : memref<25x3x8x1xf32, #tpu.memory_space<vmem>>, vector<1x3x8x1xf32>
    %337 = vector.shape_cast %336 : vector<1x3x8x1xf32> to vector<3x8x1xf32>
    %338 = vector.shape_cast %335 : vector<8x256xf32> to vector<1x8x256xf32>
    %339 = vector.broadcast %338 : vector<1x8x256xf32> to vector<3x8x256xf32>
    %340 = vector.broadcast %337 : vector<3x8x1xf32> to vector<3x8x256xf32>
    %341 = arith.mulf %339, %340 : vector<3x8x256xf32>
    %342 = arith.addf %334, %341 : vector<3x8x256xf32>
    %343 = vector.extract_strided_slice %309 {offsets = [0, 4], sizes = [8, 256], strides = [1, 1]} : vector<8x324xf32> to vector<8x256xf32>
    %c4_134 = arith.constant 4 : index
    %c0_135 = arith.constant 0 : index
    %c0_136 = arith.constant 0 : index
    %c0_137 = arith.constant 0 : index
    %344 = vector.load %arg5[%c4_134, %c0_135, %c0_136, %c0_137] : memref<25x3x8x1xf32, #tpu.memory_space<vmem>>, vector<1x3x8x1xf32>
    %345 = vector.shape_cast %344 : vector<1x3x8x1xf32> to vector<3x8x1xf32>
    %346 = vector.shape_cast %343 : vector<8x256xf32> to vector<1x8x256xf32>
    %347 = vector.broadcast %346 : vector<1x8x256xf32> to vector<3x8x256xf32>
    %348 = vector.broadcast %345 : vector<3x8x1xf32> to vector<3x8x256xf32>
    %349 = arith.mulf %347, %348 : vector<3x8x256xf32>
    %350 = arith.addf %342, %349 : vector<3x8x256xf32>
    %351 = vector.extract_strided_slice %303 {offsets = [0, 16], sizes = [8, 256], strides = [1, 1]} : vector<8x324xf32> to vector<8x256xf32>
    %c5_138 = arith.constant 5 : index
    %c0_139 = arith.constant 0 : index
    %c0_140 = arith.constant 0 : index
    %c0_141 = arith.constant 0 : index
    %352 = vector.load %arg5[%c5_138, %c0_139, %c0_140, %c0_141] : memref<25x3x8x1xf32, #tpu.memory_space<vmem>>, vector<1x3x8x1xf32>
    %353 = vector.shape_cast %352 : vector<1x3x8x1xf32> to vector<3x8x1xf32>
    %354 = vector.shape_cast %351 : vector<8x256xf32> to vector<1x8x256xf32>
    %355 = vector.broadcast %354 : vector<1x8x256xf32> to vector<3x8x256xf32>
    %356 = vector.broadcast %353 : vector<3x8x1xf32> to vector<3x8x256xf32>
    %357 = arith.mulf %355, %356 : vector<3x8x256xf32>
    %358 = arith.addf %350, %357 : vector<3x8x256xf32>
    %359 = vector.extract_strided_slice %305 {offsets = [0, 17], sizes = [8, 256], strides = [1, 1]} : vector<8x324xf32> to vector<8x256xf32>
    %c6_142 = arith.constant 6 : index
    %c0_143 = arith.constant 0 : index
    %c0_144 = arith.constant 0 : index
    %c0_145 = arith.constant 0 : index
    %360 = vector.load %arg5[%c6_142, %c0_143, %c0_144, %c0_145] : memref<25x3x8x1xf32, #tpu.memory_space<vmem>>, vector<1x3x8x1xf32>
    %361 = vector.shape_cast %360 : vector<1x3x8x1xf32> to vector<3x8x1xf32>
    %362 = vector.shape_cast %359 : vector<8x256xf32> to vector<1x8x256xf32>
    %363 = vector.broadcast %362 : vector<1x8x256xf32> to vector<3x8x256xf32>
    %364 = vector.broadcast %361 : vector<3x8x1xf32> to vector<3x8x256xf32>
    %365 = arith.mulf %363, %364 : vector<3x8x256xf32>
    %366 = arith.addf %358, %365 : vector<3x8x256xf32>
    %367 = vector.extract_strided_slice %301 {offsets = [0, 18], sizes = [8, 256], strides = [1, 1]} : vector<8x324xf32> to vector<8x256xf32>
    %c7_146 = arith.constant 7 : index
    %c0_147 = arith.constant 0 : index
    %c0_148 = arith.constant 0 : index
    %c0_149 = arith.constant 0 : index
    %368 = vector.load %arg5[%c7_146, %c0_147, %c0_148, %c0_149] : memref<25x3x8x1xf32, #tpu.memory_space<vmem>>, vector<1x3x8x1xf32>
    %369 = vector.shape_cast %368 : vector<1x3x8x1xf32> to vector<3x8x1xf32>
    %370 = vector.shape_cast %367 : vector<8x256xf32> to vector<1x8x256xf32>
    %371 = vector.broadcast %370 : vector<1x8x256xf32> to vector<3x8x256xf32>
    %372 = vector.broadcast %369 : vector<3x8x1xf32> to vector<3x8x256xf32>
    %373 = arith.mulf %371, %372 : vector<3x8x256xf32>
    %374 = arith.addf %366, %373 : vector<3x8x256xf32>
    %375 = vector.extract_strided_slice %307 {offsets = [0, 19], sizes = [8, 256], strides = [1, 1]} : vector<8x324xf32> to vector<8x256xf32>
    %c8_150 = arith.constant 8 : index
    %c0_151 = arith.constant 0 : index
    %c0_152 = arith.constant 0 : index
    %c0_153 = arith.constant 0 : index
    %376 = vector.load %arg5[%c8_150, %c0_151, %c0_152, %c0_153] : memref<25x3x8x1xf32, #tpu.memory_space<vmem>>, vector<1x3x8x1xf32>
    %377 = vector.shape_cast %376 : vector<1x3x8x1xf32> to vector<3x8x1xf32>
    %378 = vector.shape_cast %375 : vector<8x256xf32> to vector<1x8x256xf32>
    %379 = vector.broadcast %378 : vector<1x8x256xf32> to vector<3x8x256xf32>
    %380 = vector.broadcast %377 : vector<3x8x1xf32> to vector<3x8x256xf32>
    %381 = arith.mulf %379, %380 : vector<3x8x256xf32>
    %382 = arith.addf %374, %381 : vector<3x8x256xf32>
    %383 = vector.extract_strided_slice %309 {offsets = [0, 20], sizes = [8, 256], strides = [1, 1]} : vector<8x324xf32> to vector<8x256xf32>
    %c9_154 = arith.constant 9 : index
    %c0_155 = arith.constant 0 : index
    %c0_156 = arith.constant 0 : index
    %c0_157 = arith.constant 0 : index
    %384 = vector.load %arg5[%c9_154, %c0_155, %c0_156, %c0_157] : memref<25x3x8x1xf32, #tpu.memory_space<vmem>>, vector<1x3x8x1xf32>
    %385 = vector.shape_cast %384 : vector<1x3x8x1xf32> to vector<3x8x1xf32>
    %386 = vector.shape_cast %383 : vector<8x256xf32> to vector<1x8x256xf32>
    %387 = vector.broadcast %386 : vector<1x8x256xf32> to vector<3x8x256xf32>
    %388 = vector.broadcast %385 : vector<3x8x1xf32> to vector<3x8x256xf32>
    %389 = arith.mulf %387, %388 : vector<3x8x256xf32>
    %390 = arith.addf %382, %389 : vector<3x8x256xf32>
    %391 = vector.extract_strided_slice %303 {offsets = [0, 32], sizes = [8, 256], strides = [1, 1]} : vector<8x324xf32> to vector<8x256xf32>
    %c10_158 = arith.constant 10 : index
    %c0_159 = arith.constant 0 : index
    %c0_160 = arith.constant 0 : index
    %c0_161 = arith.constant 0 : index
    %392 = vector.load %arg5[%c10_158, %c0_159, %c0_160, %c0_161] : memref<25x3x8x1xf32, #tpu.memory_space<vmem>>, vector<1x3x8x1xf32>
    %393 = vector.shape_cast %392 : vector<1x3x8x1xf32> to vector<3x8x1xf32>
    %394 = vector.shape_cast %391 : vector<8x256xf32> to vector<1x8x256xf32>
    %395 = vector.broadcast %394 : vector<1x8x256xf32> to vector<3x8x256xf32>
    %396 = vector.broadcast %393 : vector<3x8x1xf32> to vector<3x8x256xf32>
    %397 = arith.mulf %395, %396 : vector<3x8x256xf32>
    %398 = arith.addf %390, %397 : vector<3x8x256xf32>
    %399 = vector.extract_strided_slice %305 {offsets = [0, 33], sizes = [8, 256], strides = [1, 1]} : vector<8x324xf32> to vector<8x256xf32>
    %c11_162 = arith.constant 11 : index
    %c0_163 = arith.constant 0 : index
    %c0_164 = arith.constant 0 : index
    %c0_165 = arith.constant 0 : index
    %400 = vector.load %arg5[%c11_162, %c0_163, %c0_164, %c0_165] : memref<25x3x8x1xf32, #tpu.memory_space<vmem>>, vector<1x3x8x1xf32>
    %401 = vector.shape_cast %400 : vector<1x3x8x1xf32> to vector<3x8x1xf32>
    %402 = vector.shape_cast %399 : vector<8x256xf32> to vector<1x8x256xf32>
    %403 = vector.broadcast %402 : vector<1x8x256xf32> to vector<3x8x256xf32>
    %404 = vector.broadcast %401 : vector<3x8x1xf32> to vector<3x8x256xf32>
    %405 = arith.mulf %403, %404 : vector<3x8x256xf32>
    %406 = arith.addf %398, %405 : vector<3x8x256xf32>
    %407 = vector.extract_strided_slice %301 {offsets = [0, 34], sizes = [8, 256], strides = [1, 1]} : vector<8x324xf32> to vector<8x256xf32>
    %c12_166 = arith.constant 12 : index
    %c0_167 = arith.constant 0 : index
    %c0_168 = arith.constant 0 : index
    %c0_169 = arith.constant 0 : index
    %408 = vector.load %arg5[%c12_166, %c0_167, %c0_168, %c0_169] : memref<25x3x8x1xf32, #tpu.memory_space<vmem>>, vector<1x3x8x1xf32>
    %409 = vector.shape_cast %408 : vector<1x3x8x1xf32> to vector<3x8x1xf32>
    %410 = vector.shape_cast %407 : vector<8x256xf32> to vector<1x8x256xf32>
    %411 = vector.broadcast %410 : vector<1x8x256xf32> to vector<3x8x256xf32>
    %412 = vector.broadcast %409 : vector<3x8x1xf32> to vector<3x8x256xf32>
    %413 = arith.mulf %411, %412 : vector<3x8x256xf32>
    %414 = arith.addf %406, %413 : vector<3x8x256xf32>
    %415 = vector.extract_strided_slice %307 {offsets = [0, 35], sizes = [8, 256], strides = [1, 1]} : vector<8x324xf32> to vector<8x256xf32>
    %c13_170 = arith.constant 13 : index
    %c0_171 = arith.constant 0 : index
    %c0_172 = arith.constant 0 : index
    %c0_173 = arith.constant 0 : index
    %416 = vector.load %arg5[%c13_170, %c0_171, %c0_172, %c0_173] : memref<25x3x8x1xf32, #tpu.memory_space<vmem>>, vector<1x3x8x1xf32>
    %417 = vector.shape_cast %416 : vector<1x3x8x1xf32> to vector<3x8x1xf32>
    %418 = vector.shape_cast %415 : vector<8x256xf32> to vector<1x8x256xf32>
    %419 = vector.broadcast %418 : vector<1x8x256xf32> to vector<3x8x256xf32>
    %420 = vector.broadcast %417 : vector<3x8x1xf32> to vector<3x8x256xf32>
    %421 = arith.mulf %419, %420 : vector<3x8x256xf32>
    %422 = arith.addf %414, %421 : vector<3x8x256xf32>
    %423 = vector.extract_strided_slice %309 {offsets = [0, 36], sizes = [8, 256], strides = [1, 1]} : vector<8x324xf32> to vector<8x256xf32>
    %c14_174 = arith.constant 14 : index
    %c0_175 = arith.constant 0 : index
    %c0_176 = arith.constant 0 : index
    %c0_177 = arith.constant 0 : index
    %424 = vector.load %arg5[%c14_174, %c0_175, %c0_176, %c0_177] : memref<25x3x8x1xf32, #tpu.memory_space<vmem>>, vector<1x3x8x1xf32>
    %425 = vector.shape_cast %424 : vector<1x3x8x1xf32> to vector<3x8x1xf32>
    %426 = vector.shape_cast %423 : vector<8x256xf32> to vector<1x8x256xf32>
    %427 = vector.broadcast %426 : vector<1x8x256xf32> to vector<3x8x256xf32>
    %428 = vector.broadcast %425 : vector<3x8x1xf32> to vector<3x8x256xf32>
    %429 = arith.mulf %427, %428 : vector<3x8x256xf32>
    %430 = arith.addf %422, %429 : vector<3x8x256xf32>
    %431 = vector.extract_strided_slice %303 {offsets = [0, 48], sizes = [8, 256], strides = [1, 1]} : vector<8x324xf32> to vector<8x256xf32>
    %c15_178 = arith.constant 15 : index
    %c0_179 = arith.constant 0 : index
    %c0_180 = arith.constant 0 : index
    %c0_181 = arith.constant 0 : index
    %432 = vector.load %arg5[%c15_178, %c0_179, %c0_180, %c0_181] : memref<25x3x8x1xf32, #tpu.memory_space<vmem>>, vector<1x3x8x1xf32>
    %433 = vector.shape_cast %432 : vector<1x3x8x1xf32> to vector<3x8x1xf32>
    %434 = vector.shape_cast %431 : vector<8x256xf32> to vector<1x8x256xf32>
    %435 = vector.broadcast %434 : vector<1x8x256xf32> to vector<3x8x256xf32>
    %436 = vector.broadcast %433 : vector<3x8x1xf32> to vector<3x8x256xf32>
    %437 = arith.mulf %435, %436 : vector<3x8x256xf32>
    %438 = arith.addf %430, %437 : vector<3x8x256xf32>
    %439 = vector.extract_strided_slice %305 {offsets = [0, 49], sizes = [8, 256], strides = [1, 1]} : vector<8x324xf32> to vector<8x256xf32>
    %c16_182 = arith.constant 16 : index
    %c0_183 = arith.constant 0 : index
    %c0_184 = arith.constant 0 : index
    %c0_185 = arith.constant 0 : index
    %440 = vector.load %arg5[%c16_182, %c0_183, %c0_184, %c0_185] : memref<25x3x8x1xf32, #tpu.memory_space<vmem>>, vector<1x3x8x1xf32>
    %441 = vector.shape_cast %440 : vector<1x3x8x1xf32> to vector<3x8x1xf32>
    %442 = vector.shape_cast %439 : vector<8x256xf32> to vector<1x8x256xf32>
    %443 = vector.broadcast %442 : vector<1x8x256xf32> to vector<3x8x256xf32>
    %444 = vector.broadcast %441 : vector<3x8x1xf32> to vector<3x8x256xf32>
    %445 = arith.mulf %443, %444 : vector<3x8x256xf32>
    %446 = arith.addf %438, %445 : vector<3x8x256xf32>
    %447 = vector.extract_strided_slice %301 {offsets = [0, 50], sizes = [8, 256], strides = [1, 1]} : vector<8x324xf32> to vector<8x256xf32>
    %c17_186 = arith.constant 17 : index
    %c0_187 = arith.constant 0 : index
    %c0_188 = arith.constant 0 : index
    %c0_189 = arith.constant 0 : index
    %448 = vector.load %arg5[%c17_186, %c0_187, %c0_188, %c0_189] : memref<25x3x8x1xf32, #tpu.memory_space<vmem>>, vector<1x3x8x1xf32>
    %449 = vector.shape_cast %448 : vector<1x3x8x1xf32> to vector<3x8x1xf32>
    %450 = vector.shape_cast %447 : vector<8x256xf32> to vector<1x8x256xf32>
    %451 = vector.broadcast %450 : vector<1x8x256xf32> to vector<3x8x256xf32>
    %452 = vector.broadcast %449 : vector<3x8x1xf32> to vector<3x8x256xf32>
    %453 = arith.mulf %451, %452 : vector<3x8x256xf32>
    %454 = arith.addf %446, %453 : vector<3x8x256xf32>
    %455 = vector.extract_strided_slice %307 {offsets = [0, 51], sizes = [8, 256], strides = [1, 1]} : vector<8x324xf32> to vector<8x256xf32>
    %c18_190 = arith.constant 18 : index
    %c0_191 = arith.constant 0 : index
    %c0_192 = arith.constant 0 : index
    %c0_193 = arith.constant 0 : index
    %456 = vector.load %arg5[%c18_190, %c0_191, %c0_192, %c0_193] : memref<25x3x8x1xf32, #tpu.memory_space<vmem>>, vector<1x3x8x1xf32>
    %457 = vector.shape_cast %456 : vector<1x3x8x1xf32> to vector<3x8x1xf32>
    %458 = vector.shape_cast %455 : vector<8x256xf32> to vector<1x8x256xf32>
    %459 = vector.broadcast %458 : vector<1x8x256xf32> to vector<3x8x256xf32>
    %460 = vector.broadcast %457 : vector<3x8x1xf32> to vector<3x8x256xf32>
    %461 = arith.mulf %459, %460 : vector<3x8x256xf32>
    %462 = arith.addf %454, %461 : vector<3x8x256xf32>
    %463 = vector.extract_strided_slice %309 {offsets = [0, 52], sizes = [8, 256], strides = [1, 1]} : vector<8x324xf32> to vector<8x256xf32>
    %c19_194 = arith.constant 19 : index
    %c0_195 = arith.constant 0 : index
    %c0_196 = arith.constant 0 : index
    %c0_197 = arith.constant 0 : index
    %464 = vector.load %arg5[%c19_194, %c0_195, %c0_196, %c0_197] : memref<25x3x8x1xf32, #tpu.memory_space<vmem>>, vector<1x3x8x1xf32>
    %465 = vector.shape_cast %464 : vector<1x3x8x1xf32> to vector<3x8x1xf32>
    %466 = vector.shape_cast %463 : vector<8x256xf32> to vector<1x8x256xf32>
    %467 = vector.broadcast %466 : vector<1x8x256xf32> to vector<3x8x256xf32>
    %468 = vector.broadcast %465 : vector<3x8x1xf32> to vector<3x8x256xf32>
    %469 = arith.mulf %467, %468 : vector<3x8x256xf32>
    %470 = arith.addf %462, %469 : vector<3x8x256xf32>
    %471 = vector.extract_strided_slice %303 {offsets = [0, 64], sizes = [8, 256], strides = [1, 1]} : vector<8x324xf32> to vector<8x256xf32>
    %c20_198 = arith.constant 20 : index
    %c0_199 = arith.constant 0 : index
    %c0_200 = arith.constant 0 : index
    %c0_201 = arith.constant 0 : index
    %472 = vector.load %arg5[%c20_198, %c0_199, %c0_200, %c0_201] : memref<25x3x8x1xf32, #tpu.memory_space<vmem>>, vector<1x3x8x1xf32>
    %473 = vector.shape_cast %472 : vector<1x3x8x1xf32> to vector<3x8x1xf32>
    %474 = vector.shape_cast %471 : vector<8x256xf32> to vector<1x8x256xf32>
    %475 = vector.broadcast %474 : vector<1x8x256xf32> to vector<3x8x256xf32>
    %476 = vector.broadcast %473 : vector<3x8x1xf32> to vector<3x8x256xf32>
    %477 = arith.mulf %475, %476 : vector<3x8x256xf32>
    %478 = arith.addf %470, %477 : vector<3x8x256xf32>
    %479 = vector.extract_strided_slice %305 {offsets = [0, 65], sizes = [8, 256], strides = [1, 1]} : vector<8x324xf32> to vector<8x256xf32>
    %c21_202 = arith.constant 21 : index
    %c0_203 = arith.constant 0 : index
    %c0_204 = arith.constant 0 : index
    %c0_205 = arith.constant 0 : index
    %480 = vector.load %arg5[%c21_202, %c0_203, %c0_204, %c0_205] : memref<25x3x8x1xf32, #tpu.memory_space<vmem>>, vector<1x3x8x1xf32>
    %481 = vector.shape_cast %480 : vector<1x3x8x1xf32> to vector<3x8x1xf32>
    %482 = vector.shape_cast %479 : vector<8x256xf32> to vector<1x8x256xf32>
    %483 = vector.broadcast %482 : vector<1x8x256xf32> to vector<3x8x256xf32>
    %484 = vector.broadcast %481 : vector<3x8x1xf32> to vector<3x8x256xf32>
    %485 = arith.mulf %483, %484 : vector<3x8x256xf32>
    %486 = arith.addf %478, %485 : vector<3x8x256xf32>
    %487 = vector.extract_strided_slice %301 {offsets = [0, 66], sizes = [8, 256], strides = [1, 1]} : vector<8x324xf32> to vector<8x256xf32>
    %c22_206 = arith.constant 22 : index
    %c0_207 = arith.constant 0 : index
    %c0_208 = arith.constant 0 : index
    %c0_209 = arith.constant 0 : index
    %488 = vector.load %arg5[%c22_206, %c0_207, %c0_208, %c0_209] : memref<25x3x8x1xf32, #tpu.memory_space<vmem>>, vector<1x3x8x1xf32>
    %489 = vector.shape_cast %488 : vector<1x3x8x1xf32> to vector<3x8x1xf32>
    %490 = vector.shape_cast %487 : vector<8x256xf32> to vector<1x8x256xf32>
    %491 = vector.broadcast %490 : vector<1x8x256xf32> to vector<3x8x256xf32>
    %492 = vector.broadcast %489 : vector<3x8x1xf32> to vector<3x8x256xf32>
    %493 = arith.mulf %491, %492 : vector<3x8x256xf32>
    %494 = arith.addf %486, %493 : vector<3x8x256xf32>
    %495 = vector.extract_strided_slice %307 {offsets = [0, 67], sizes = [8, 256], strides = [1, 1]} : vector<8x324xf32> to vector<8x256xf32>
    %c23_210 = arith.constant 23 : index
    %c0_211 = arith.constant 0 : index
    %c0_212 = arith.constant 0 : index
    %c0_213 = arith.constant 0 : index
    %496 = vector.load %arg5[%c23_210, %c0_211, %c0_212, %c0_213] : memref<25x3x8x1xf32, #tpu.memory_space<vmem>>, vector<1x3x8x1xf32>
    %497 = vector.shape_cast %496 : vector<1x3x8x1xf32> to vector<3x8x1xf32>
    %498 = vector.shape_cast %495 : vector<8x256xf32> to vector<1x8x256xf32>
    %499 = vector.broadcast %498 : vector<1x8x256xf32> to vector<3x8x256xf32>
    %500 = vector.broadcast %497 : vector<3x8x1xf32> to vector<3x8x256xf32>
    %501 = arith.mulf %499, %500 : vector<3x8x256xf32>
    %502 = arith.addf %494, %501 : vector<3x8x256xf32>
    %503 = vector.extract_strided_slice %309 {offsets = [0, 68], sizes = [8, 256], strides = [1, 1]} : vector<8x324xf32> to vector<8x256xf32>
    %c24_214 = arith.constant 24 : index
    %c0_215 = arith.constant 0 : index
    %c0_216 = arith.constant 0 : index
    %c0_217 = arith.constant 0 : index
    %504 = vector.load %arg5[%c24_214, %c0_215, %c0_216, %c0_217] : memref<25x3x8x1xf32, #tpu.memory_space<vmem>>, vector<1x3x8x1xf32>
    %505 = vector.shape_cast %504 : vector<1x3x8x1xf32> to vector<3x8x1xf32>
    %506 = vector.shape_cast %503 : vector<8x256xf32> to vector<1x8x256xf32>
    %507 = vector.broadcast %506 : vector<1x8x256xf32> to vector<3x8x256xf32>
    %508 = vector.broadcast %505 : vector<3x8x1xf32> to vector<3x8x256xf32>
    %509 = arith.mulf %507, %508 : vector<3x8x256xf32>
    %510 = arith.addf %502, %509 : vector<3x8x256xf32>
    %511 = vector.shape_cast %510 : vector<3x8x256xf32> to vector<24x256xf32>
    %512 = vector.broadcast %39 : vector<24x1xf32> to vector<24x256xf32>
    %513 = arith.mulf %511, %512 : vector<24x256xf32>
    %514 = vector.broadcast %40 : vector<24x1xf32> to vector<24x256xf32>
    %515 = arith.addf %513, %514 : vector<24x256xf32>
    %cst_218 = arith.constant 0.000000e+00 : f32
    %516 = vector.broadcast %cst_218 : f32 to vector<24x256xf32>
    %517 = arith.maximumf %515, %516 : vector<24x256xf32>
    %518 = arith.truncf %517 : vector<24x256xf32> to vector<24x256xbf16>
    %cst_219 = arith.constant dense<0.000000e+00> : vector<8x256xf32>
    %519 = tpu.matmul %36, %518, %cst_219 {dimension_numbers = #tpu.dot_dimension_numbers<[1], [0], [0], [1], [0, 0, 1, 1], [], []>} : vector<8x24xbf16>, vector<24x256xbf16>, vector<8x256xf32> -> vector<8x256xf32>
    %520 = vector.broadcast %41 : vector<8x1xf32> to vector<8x256xf32>
    %521 = arith.mulf %519, %520 : vector<8x256xf32>
    %522 = vector.broadcast %42 : vector<8x1xf32> to vector<8x256xf32>
    %523 = arith.addf %521, %522 : vector<8x256xf32>
    %c1_220 = arith.constant 1 : index
    %c0_221 = arith.constant 0 : index
    %c0_222 = arith.constant 0 : index
    %524 = vector.load %arg11[%c1_220, %c0_221, %c0_222] : memref<2x8x256xf32, #tpu.memory_space<vmem>>, vector<1x8x256xf32>
    %525 = vector.shape_cast %524 : vector<1x8x256xf32> to vector<8x256xf32>
    %526 = vector.shape_cast %523 : vector<8x256xf32> to vector<1x8x256xf32>
    tpu.vector_store %arg11[%c1_220, %c0_221, %c0_222], %526 {strides = array<i32>} : memref<2x8x256xf32, #tpu.memory_space<vmem>>, vector<1x8x256xf32>,
    %527 = vector.extract_strided_slice %523 {offsets = [0, 0], sizes = [1, 256], strides = [1, 1]} : vector<8x256xf32> to vector<1x256xf32>
    %cst_223 = arith.constant 0.000000e+00 : f32
    %528 = vector.broadcast %cst_223 : f32 to vector<1x256xf32>
    %529 = arith.subf %528, %527 : vector<1x256xf32>
    %530 = math.exp %529 : vector<1x256xf32>
    %cst_224 = arith.constant 1.000000e+00 : f32
    %531 = vector.broadcast %cst_224 : f32 to vector<1x256xf32>
    %532 = arith.addf %531, %530 : vector<1x256xf32>
    %533 = tpu.reciprocal %532 {approx = true} : vector<1x256xf32> -> vector<1x256xf32>
    %c1_225 = arith.constant 1 : index
    %c0_226 = arith.constant 0 : index
    %c0_227 = arith.constant 0 : index
    %534 = vector.load %arg11[%c1_225, %c0_226, %c0_227] : memref<2x8x256xf32, #tpu.memory_space<vmem>>, vector<1x1x256xf32>
    %535 = vector.shape_cast %534 : vector<1x1x256xf32> to vector<1x256xf32>
    %536 = vector.shape_cast %533 : vector<1x256xf32> to vector<1x1x256xf32>
    tpu.vector_store %arg11[%c1_225, %c0_226, %c0_227], %536 {strides = array<i32>} : memref<2x8x256xf32, #tpu.memory_space<vmem>>, vector<1x1x256xf32>,
    return
  }
  func.func @transform_0(%arg0: i32) -> (i32, i32, i32) {
    %c0_i32 = arith.constant 0 : i32
    %c0_i32_0 = arith.constant 0 : i32
    %c0_i32_1 = arith.constant 0 : i32
    %c0_i32_2 = arith.constant 0 : i32
    return %c0_i32, %c0_i32_0, %c0_i32_1 : i32, i32, i32
  }
  func.func @transform_1(%arg0: i32) -> (i32, i32) {
    %c0_i32 = arith.constant 0 : i32
    %c0_i32_0 = arith.constant 0 : i32
    %c0_i32_1 = arith.constant 0 : i32
    return %c0_i32, %c0_i32_0 : i32, i32
  }
  func.func @transform_2(%arg0: i32) -> (i32, i32) {
    %c0_i32 = arith.constant 0 : i32
    %c0_i32_0 = arith.constant 0 : i32
    %c0_i32_1 = arith.constant 0 : i32
    return %c0_i32, %c0_i32_0 : i32, i32
  }
  func.func @transform_3(%arg0: i32) -> (i32, i32) {
    %c0_i32 = arith.constant 0 : i32
    %c0_i32_0 = arith.constant 0 : i32
    %c0_i32_1 = arith.constant 0 : i32
    return %c0_i32, %c0_i32_0 : i32, i32
  }
  func.func @transform_4(%arg0: i32) -> (i32, i32, i32, i32) {
    %c0_i32 = arith.constant 0 : i32
    %c0_i32_0 = arith.constant 0 : i32
    %c0_i32_1 = arith.constant 0 : i32
    %c0_i32_2 = arith.constant 0 : i32
    %c0_i32_3 = arith.constant 0 : i32
    return %c0_i32, %c0_i32_0, %c0_i32_1, %c0_i32_2 : i32, i32, i32, i32
  }
  func.func @transform_5(%arg0: i32) -> (i32, i32) {
    %c0_i32 = arith.constant 0 : i32
    %c0_i32_0 = arith.constant 0 : i32
    %c0_i32_1 = arith.constant 0 : i32
    return %c0_i32, %c0_i32_0 : i32, i32
  }
  func.func @transform_6(%arg0: i32) -> (i32, i32) {
    %c0_i32 = arith.constant 0 : i32
    %c0_i32_0 = arith.constant 0 : i32
    %c0_i32_1 = arith.constant 0 : i32
    return %c0_i32, %c0_i32_0 : i32, i32
  }
  func.func @transform_7(%arg0: i32) -> (i32, i32) {
    %c0_i32 = arith.constant 0 : i32
    %c0_i32_0 = arith.constant 0 : i32
    %c0_i32_1 = arith.constant 0 : i32
    return %c0_i32, %c0_i32_0 : i32, i32
  }
  func.func @transform_8(%arg0: i32) -> (i32, i32) {
    %c0_i32 = arith.constant 0 : i32
    %c0_i32_0 = arith.constant 0 : i32
    %c0_i32_1 = arith.constant 0 : i32
    return %c0_i32, %c0_i32_0 : i32, i32
  }
  func.func @transform_9(%arg0: i32) -> (i32, i32) {
    %c0_i32 = arith.constant 0 : i32
    %c0_i32_0 = arith.constant 0 : i32
    %c0_i32_1 = arith.constant 0 : i32
    return %c0_i32, %c0_i32_0 : i32, i32
  }
  func.func @transform_10(%arg0: i32) -> (i32, i32, i32) {
    %c0_i32 = arith.constant 0 : i32
    %c0_i32_0 = arith.constant 0 : i32
    %c0_i32_1 = arith.constant 0 : i32
    %c0_i32_2 = arith.constant 0 : i32
    return %c0_i32, %c0_i32_0, %c0_i32_1 : i32, i32, i32
  }
}

</mosaic_0001>

<bundles_post_ra>
// kernel: tpu_custom_call.1
= control target key start
LH: loop header
LB: loop body
LE: loop exit
PB: predicated region body
PF: predicated region fallthrough
CT: control target
= control target key end

     0   :  { %vm7690_vm0 = vcmask 1043456   ;;  %v4308_v3 = vmov 0   ;;  %vm132_vm1 = vcmask 64512   ;;  %s7580_s0 = inlined_call_operand.vmem [shape: f32[2,8,256], index: 0, kind: input, shape index: {}]   ;;  %s7581_s1 = inlined_call_operand.vmem [shape: bf16[8,8], index: 1, kind: input, shape index: {}]   ;;  %s7582_s2 = inlined_call_operand.vmem [shape: f32[8,1], index: 2, kind: input, shape index: {}]   ;;  %s7583_s3 = inlined_call_operand.vmem [shape: f32[8,1], index: 3, kind: input, shape index: {}]   ;;  %s7584_s4 = inlined_call_operand.vmem [shape: f32[25,3,8,1], index: 4, kind: input, shape index: {}]   ;;  %s7585_s5 = inlined_call_operand.vmem [shape: f32[24,1], index: 5, kind: input, shape index: {}]   ;;  %s7586_s6 = inlined_call_operand.vmem [shape: f32[24,1], index: 6, kind: input, shape index: {}]   ;;  %s7587_s7 = inlined_call_operand.vmem [shape: bf16[8,24], index: 7, kind: input, shape index: {}]   ;;  %s7588_s8 = inlined_call_operand.vmem [shape: f32[8,1], index: 8, kind: input, shape index: {}]   ;;  %s7589_s9 = inlined_call_operand.vmem [shape: f32[8,1], index: 9, kind: input, shape index: {}]   ;;  %s7590_s10 = inlined_call_operand.hbm [shape: f32[2,8,256], index: 10, kind: output, shape index: {}]  }
   0x1   :  { %v118_v0 = vld [vmem:[%s7582_s2] sm:$0xff]  ;;  %v129_v2 = vld [vmem:[%s7580_s0 + $0x8] sm:$0xff]  ;;  %4262 = vset.pattern.permute.xlu0 %v4308_v3  ;;  %4264 = vset.pattern.permute.xlu1 %v4308_v3  ;;  %v4080_v6 = vld [vmem:[%s7584_s4 + $0x18] sm:$0xff] }
   0x2   :  { %v128_v1 = vld [vmem:[%s7580_s0] sm:$0xff]  ;;  %v131_v5 = vpack.c.bf16 %v129_v2, %v129_v2  ;;  %171 = vperm.xlu0 %4262, %v118_v0   ;;  %v4154_v7 = vld [vmem:[%s7580_s0 + $0x10] sm:$0xff]  ;;  %v4155_v8 = vld [vmem:[%s7580_s0 + $0x18] sm:$0xff]  ;;  %4263 = vset.pattern.permute.xlu2 %v4308_v3 }
   0x3   :  { %v130_v4 = vpack.c.bf16 %v128_v1, %v128_v1  ;;  %246 = vperm.xlu1 %4264, %v4080_v6   ;;  %v2145_v11 = vpack.c.bf16 %v4154_v7, %v4154_v7  ;;  %v2146_v12 = vpack.c.bf16 %v4155_v8, %v4155_v8  ;;  %v116_v13 = vld [vmem:[%s7581_s1] sm:$0xf] }
   0x4   :  { %v141_v10 = vsel %vm7690_vm0, %v131_v5, 0 }
   0x5   :  { %v138_v9 = vsel %vm7690_vm0, %v130_v4, 0  ;;  %163 = vmatpush.bf16.msra.mxu1 %v141_v10 }
   0x6   :  { %150 = vmatpush.bf16.msra.mxu0 %v138_v9 }
   0x7   :  { %15 = vsyncpa [#allocation3], 0  ;;  %v2148_v14 = vsel %vm7690_vm0, %v2145_v11, 0  ;;  %v2151_v15 = vsel %vm7690_vm0, %v2146_v12, 0  ;;  %v119_v16 = vld [vmem:[%s7583_s3] sm:$0xff]  ;;  %v4083_v17 = vld [vmem:[%s7584_s4 + $0x30] sm:$0xff]  ;;  %v7591_v63 = vlaneseq }
   0x8   :  { %4079 = vmatmul.msk.bf16.vlgmr.msra.gmra.mxu1 %vm132_vm1, %v116_v13  ;;  %v212_v18 = vld [vmem:[%s7584_s4 + $0x10] sm:$0xff]  ;;  %v4086_v19 = vld [vmem:[%s7584_s4 + $0x48] sm:$0xff]  ;;  %v4089_v21 = vld [vmem:[%s7584_s4 + $0x60] sm:$0xff]  ;;  %s4309_s30 = smov 34   ;;  %v4310_v12 = vmov 0.0   ;;  %vm191_vm9 = vcmask 277504  }
   0x9   :  { %2173 = vmatpush.bf16.msrb.mxu1 %v2151_v15  ;;  %4078 = vmatmul.msk.bf16.vlgmr.msra.gmra.mxu0 %vm132_vm1, %v116_v13  ;;  %v4082_v20 = vld [vmem:[%s7584_s4 + $0x28] sm:$0xff]  ;;  %v210_v22 = vld [vmem:[%s7584_s4] sm:$0xff]  ;;  %v4092_v24 = vld [vmem:[%s7584_s4 + $0x78] sm:$0xff]  ;;  %v38_v1 = vand.u32 127, %v7591_v63  ;;  %s4311_s11 = smov 126   ;;  %s4312_s3 = smov 110  }
   0xa   :  { %2160 = vmatpush.bf16.msrb.mxu0 %v2148_v14  ;;  %178 = vperm.xlu0 %4262, %v119_v16   ;;  %v4085_v23 = vld [vmem:[%s7584_s4 + $0x40] sm:$0xff]  ;;  %v211_v25 = vld [vmem:[%s7584_s4 + $0x8] sm:$0xff]  ;;  %v4088_v26 = vld [vmem:[%s7584_s4 + $0x58] sm:$0xff]  ;;  %s4313_s12 = smov 127   ;;  %s4314_s13 = smov 125  }
   0xb   :  { %320 = vperm.xlu1 %4264, %v4083_v17   ;;  %215 = vperm.xlu2 %4263, %v210_v22   ;;  %v4095_v27 = vld [vmem:[%s7584_s4 + $0x90] sm:$0xff]  ;;  %v4081_v28 = vld [vmem:[%s7584_s4 + $0x20] sm:$0xff]  ;;  %v4098_v30 = vld [vmem:[%s7584_s4 + $0xa8] sm:$0xff]  ;;  %v4063_v2 = vadd.s32 4294967262, %v38_v1  ;;  %v39_v14 = vadd.s32 128, %v38_v1  ;;  %v40_v15 = vadd.s32 256, %v38_v1 }
   0xc   :  { %v4091_v29 = vld [vmem:[%s7584_s4 + $0x70] sm:$0xff]  ;;  %v4084_v31 = vld [vmem:[%s7584_s4 + $0x38] sm:$0xff]  ;;  %v4094_v32 = vld [vmem:[%s7584_s4 + $0x88] sm:$0xff]  ;;  %s4315_s14 = smov 124   ;;  %s4316_s15 = smov 112  }
   0xd   :  { %v4101_v33 = vld [vmem:[%s7584_s4 + $0xc0] sm:$0xff]  ;;  %v4087_v34 = vld [vmem:[%s7584_s4 + $0x50] sm:$0xff]  ;;  %v4090_v36 = vld [vmem:[%s7584_s4 + $0x68] sm:$0xff]  ;;  %v45_v3 = vsub.s32 0, %v4063_v2  ;;  %vm44_vm2 = vcmp.lt.s32.totalorder %v4063_v2, 0  ;;  %s4317_s16 = smov 111  }
   0xe   :  { %v4097_v35 = vld [vmem:[%s7584_s4 + $0xa0] sm:$0xff]  ;;  %v4100_v37 = vld [vmem:[%s7584_s4 + $0xb8] sm:$0xff]  ;;  %v4103_v39 = vld [vmem:[%s7584_s4 + $0xd0] sm:$0xff]  ;;  %s4318_s17 = smov 109   ;;  %s4319_s23 = smov 108  }
   0xf   :  { %v4093_v38 = vld [vmem:[%s7584_s4 + $0x80] sm:$0xff]  ;;  %v4096_v40 = vld [vmem:[%s7584_s4 + $0x98] sm:$0xff]  ;;  %v4099_v41 = vld [vmem:[%s7584_s4 + $0xb0] sm:$0xff]  ;;  %v46_v4 = vsel %vm44_vm2, %v45_v3, %v4063_v2  ;;  %s4320_s1 = smov 96   ;;  %s4321_s22 = smov 95  }
  0x10   :  { %v4102_v42 = vld [vmem:[%s7584_s4 + $0xc8] sm:$0xff]  ;;  %v48_v5 = vand.u32 15, %v46_v4  ;;  %s4322_s29 = smov 94   ;;  %s4323_s25 = smov 93  }
  0x11   :  { %s7678_s20 = smov 92   ;;  %s7674_s28 = smov 80  }
  0x12   :  { %225 = vperm.xlu0 %4262, %v212_v18   ;;  %v49_v7 = vsub.s32 0, %v48_v5  ;;  %v4064_v18 = vadd.s32 4294967262, %v39_v14  ;;  %s7672_s26 = smov 79   ;;  %s7643_s0 = smov 78  }
  0x13   :  { %394 = vperm.xlu1 %4264, %v4086_v19   ;;  %220 = vperm.xlu2 %4263, %v211_v25   ;;  %s7648_s27 = smov 77  }
  0x14   :  { %v50_v9 = vsel %vm44_vm2, %v49_v7, %v48_v5 }
  0x15   :  { %vm65_vm3 = vcmp.ne.s32.totalorder %v50_v9, 0  ;;  %vm68_vm4 = vcmp.lt.s32.totalorder %v50_v9, 0  ;;  %v74_v10 = vadd.s32 16, %v50_v9 }
  0x16   :  { %vm71_vm5 = vmand %vm68_vm4, %vm65_vm3  ;;  %vm295_vm4 = vcmask 1039360  }
  0x17   :  { %v4530_v11 = vsel %vm71_vm5, %v74_v10, %v50_v9  ;;  %vm369_vm5 = vcmask 1031168  }
  0x18   :  { %4157 = vmatmul.msk.bf16.vlgmr.msrb.gmra.mxu1 %vm132_vm1, %v116_v13  ;;  %vm80_vm6 = vcmp.lt.s32.totalorder %v4530_v11, 14  ;;  %vm89_vm10 = vcmp.lt.s32.totalorder %v4530_v11, 15  ;;  %vm98_vm13 = vcmp.ge.s32.totalorder %v4530_v11, 1 }
  0x19   :  { %4156 = vmatmul.msk.bf16.vlgmr.msrb.gmra.mxu0 %vm132_vm1, %v116_v13  ;;  %v4534_v13 = vsel %vm80_vm6, 1.0, %v4310_v12  ;;  %v4613_v5 = vsel %vm89_vm10, 1.0, %v4310_v12  ;;  %vm107_vm1 = vcmp.ge.s32.totalorder %v4530_v11, 2  ;;  %vm443_vm6 = vcmask 1022976  }
  0x1a   :  { %256 = vperm.xlu0 %4262, %v4082_v20   ;;  %7755 = vst [vmem:[#allocation5_spill] sm:$0xff] %v4534_v13  ;;  %v4065_v20 = vadd.s32 4294967262, %v40_v15  ;;  %vm591_vm10 = vcmask 916480  }
  0x1b   :  { %468 = vperm.xlu1 %4264, %v4089_v21   ;;  %251 = vperm.xlu2 %4263, %v4081_v28   ;;  %v4542_v21 = vand.u32 15, %v4064_v18  ;;  %7758 = vst [vmem:[#allocation8_spill] sm:$0xff] %v4613_v5 }
  0x1d   :  { %vm81_vm7 = vcmp.lt.s32.totalorder %v4542_v21, 14  ;;  %vm90_vm12 = vcmp.lt.s32.totalorder %v4542_v21, 15  ;;  %vm99_vm15 = vcmp.ge.s32.totalorder %v4542_v21, 1  ;;  %vm108_vm3 = vcmp.ge.s32.totalorder %v4542_v21, 2 }
  0x1e   :  { %v4546_v22 = vsel %vm81_vm7, 1.0, %v4310_v12  ;;  %vm517_vm7 = vcmask 1014784  }
  0x1f   :  { %7756 = vst [vmem:[#allocation6_spill] sm:$0xff] %v4546_v22 }
  0x22   :  { %330 = vperm.xlu0 %4262, %v4085_v23   ;;  %v4548_v23 = vand.u32 15, %v4065_v20  ;;  %v4633_v20 = vsel %vm90_vm12, 1.0, %v4310_v12  ;;  %vm813_vm12 = vcmask 891904  }
  0x23   :  { %542 = vperm.xlu1 %4264, %v4092_v24   ;;  %325 = vperm.xlu2 %4263, %v4084_v31   ;;  %7760 = vst [vmem:[#allocation10_spill] sm:$0xff] %v4633_v20 }
  0x24   :  { %vm82_vm8 = vcmp.lt.s32.totalorder %v4548_v23, 14  ;;  %vm91_vm11 = vcmp.lt.s32.totalorder %v4548_v23, 15  ;;  %vm100_vm14 = vcmp.ge.s32.totalorder %v4548_v23, 1  ;;  %vm109_vm2 = vcmp.ge.s32.totalorder %v4548_v23, 2 }
  0x25   :  { %v4629_v15 = vsel %vm91_vm11, 1.0, %v4310_v12  ;;  %vm665_vm11 = vcmask 908288  }
  0x26   :  { %7759 = vst [vmem:[#allocation9_spill] sm:$0xff] %v4629_v15 }
  0x2a   :  { %404 = vperm.xlu0 %4262, %v4088_v26  }
  0x2b   :  { %616 = vperm.xlu1 %4264, %v4095_v27   ;;  %399 = vperm.xlu2 %4263, %v4087_v34   ;;  %v4554_v27 = vsel %vm82_vm8, 1.0, %v4310_v12  ;;  %vm739_vm8 = vcmask 900096  }
  0x2c   :  { %7757 = vst [vmem:[#allocation7_spill] sm:$0xff] %v4554_v27 }
  0x32   :  { %478 = vperm.xlu0 %4262, %v4091_v29  }
  0x33   :  { %690 = vperm.xlu1 %4264, %v4098_v30   ;;  %473 = vperm.xlu2 %4263, %v4090_v36  }
  0x3a   :  { %552 = vperm.xlu0 %4262, %v4094_v32  }
  0x3b   :  { %764 = vperm.xlu1 %4264, %v4101_v33   ;;  %547 = vperm.xlu2 %4263, %v4093_v38  }
  0x42   :  { %626 = vperm.xlu0 %4262, %v4097_v35  }
  0x43   :  { %621 = vperm.xlu2 %4263, %v4096_v40  }
  0x4a   :  { %700 = vperm.xlu0 %4262, %v4100_v37  }
  0x4b   :  { %695 = vperm.xlu2 %4263, %v4099_v41  }
  0x52   :  { %774 = vperm.xlu0 %4262, %v4103_v39  }
  0x53   :  { %769 = vperm.xlu2 %4263, %v4102_v42  }
  0x65   :  { %v4523_v0 = vpop.permute.xlu2 %215 }
  0x6d   :  { %v4528_v8 = vpop.permute.xlu2 %220 }
  0x74   :  { %v4503_v43 = vpop.permute.xlu0 %171 }
  0x75   :  { %v4517_v59 = vpop.permute.xlu1 %246  ;;  %v4540_v19 = vpop.permute.xlu2 %251 }
  0x7c   :  { %v4506_v47 = vpop.permute.xlu0 %178 }
  0x7d   :  { %v321_v60 = vpop.permute.xlu1 %320  ;;  %v326_v26 = vpop.permute.xlu2 %325 }
  0x84   :  { %v4536_v16 = vpop.permute.xlu0 %225 }
  0x85   :  { %v165_v46 = vpop.f32.mrf.mxu1  ;;  %v4519_v61 = vpop.permute.xlu1 %394 }
  0x86   :  { %v152_v44 = vpop.f32.mrf.mxu0  ;;  %v175_v50 = vmul.f32 %v4503_v43, %v165_v46  ;;  %v4558_v30 = vpop.permute.xlu2 %399 }
  0x87   :  { %v174_v45 = vmul.f32 %v4503_v43, %v152_v44 }
  0x88   :  { %v182_v52 = vadd.f32 %v4506_v47, %v175_v50 }
  0x89   :  { %v181_v48 = vadd.f32 %v4506_v47, %v174_v45 }
  0x8a   :  { %v184_v54 = vmax.f32 %v182_v52, 0.0 }
  0x8b   :  { %v183_v49 = vmax.f32 %v181_v48, 0.0 }
  0x8c   :  { %v4550_v24 = vpop.permute.xlu0 %256 }
  0x8d   :  { %187 = vrot.lane.b32.xlu1 %v183_v49, %s4309_s30  ;;  %v167_v53 = vpop.f32.mrf.mxu1  ;;  %v4521_v62 = vpop.permute.xlu1 %468 }
  0x8e   :  { %v154_v51 = vpop.f32.mrf.mxu0  ;;  %v4566_v35 = vpop.permute.xlu2 %473 }
  0x94   :  { %v331_v28 = vpop.permute.xlu0 %330 }
  0x95   :  { %189 = vrot.lane.b32.xlu1 %v184_v54, %s4309_s30  ;;  %v4515_v56 = vpop.f32.mrf.mxu1  ;;  %v4526_v6 = vpop.permute.xlu1 %542 }
  0x96   :  { %v4513_v55 = vpop.f32.mrf.mxu0  ;;  %v4582_v44 = vpop.permute.xlu2 %547 }
  0x9c   :  { %v4563_v33 = vpop.permute.xlu0 %404 }
  0x9d   :  { %v2177_v58 = vpop.f32.mrf.mxu1  ;;  %v4538_v17 = vpop.permute.xlu1 %616 }
  0x9e   :  { %v2164_v57 = vpop.f32.mrf.mxu0  ;;  %v4593_v50 = vpop.permute.xlu2 %621 }
  0xa4   :  { %v4577_v41 = vpop.permute.xlu0 %478 }
  0xa5   :  { %v691_v25 = vpop.permute.xlu1 %690 }
  0xa6   :  { %v696_v57 = vpop.permute.xlu2 %695 }
  0xac   :  { %v4590_v49 = vpop.permute.xlu0 %552 }
  0xad   :  { %v4556_v29 = vpop.permute.xlu1 %764 }
  0xb4   :  { %v4601_v54 = vpop.permute.xlu0 %626 }
  0xbc   :  { %v701_v2 = vpop.permute.xlu0 %700 }
  0xff   :  { %v188_v31 = vpop.permute.xlu1 %187 }
 0x100   :  { %v4561_v32 = vsel %vm191_vm9, 0.0, %v188_v31 }
 0x101   :  { %v333_v34 = vmul.f32 %v321_v60, %v4561_v32  ;;  %v336_v39 = vmul.f32 %v326_v26, %v4561_v32  ;;  %v339_v45 = vmul.f32 %v331_v28, %v4561_v32  ;;  %v703_v51 = vmul.f32 %v691_v25, %v4561_v32 }
 0x102   :  { %v706_v58 = vmul.f32 %v696_v57, %v4561_v32  ;;  %v709_v3 = vmul.f32 %v701_v2, %v4561_v32  ;;  %v4621_v9 = vmul.f32 %v4613_v5, %v4561_v32 }
 0x103   :  { %351 = vrot.lane.b32.xlu1 %v333_v34, %s4311_s11 }
 0x104   :  { %v259_v14 = vmul.f32 %v4517_v59, %v4621_v9 }
 0x107   :  { %v190_v36 = vpop.permute.xlu1 %189 }
 0x108   :  { %v4570_v37 = vsel %vm191_vm9, %v188_v31, %v190_v36  ;;  %v4573_v38 = vsel %vm191_vm9, %v190_v36, 0.0  ;;  %v265_v36 = vmul.f32 %v4550_v24, %v4621_v9 }
 0x109   :  { %v335_v40 = vmul.f32 %v321_v60, %v4573_v38  ;;  %v334_v42 = vmul.f32 %v321_v60, %v4570_v37  ;;  %v338_v46 = vmul.f32 %v326_v26, %v4573_v38  ;;  %v337_v48 = vmul.f32 %v326_v26, %v4570_v37 }
 0x10a   :  { %v341_v52 = vmul.f32 %v331_v28, %v4573_v38  ;;  %v340_v53 = vmul.f32 %v331_v28, %v4570_v37  ;;  %v705_v60 = vmul.f32 %v691_v25, %v4573_v38  ;;  %v704_v1 = vmul.f32 %v691_v25, %v4570_v37 }
 0x10b   :  { %357 = vrot.lane.b32.xlu1 %v336_v39, %s4311_s11  ;;  %355 = vrot.lane.b32.xlu0 %v335_v40, %s4311_s11  ;;  %v708_v4 = vmul.f32 %v696_v57, %v4573_v38  ;;  %v707_v7 = vmul.f32 %v696_v57, %v4570_v37  ;;  %v711_v10 = vmul.f32 %v701_v2, %v4573_v38  ;;  %v4661_v40 = vsel %vm98_vm13, 1.0, %v4310_v12 }
 0x10c   :  { %353 = vrot.lane.b32.xlu2 %v334_v42, %s4311_s11  ;;  %v710_v18 = vmul.f32 %v701_v2, %v4570_v37  ;;  %v4640_v25 = vmul.f32 %v4629_v15, %v4573_v38  ;;  %v4644_v26 = vmul.f32 %v4633_v20, %v4570_v37  ;;  %v262_v28 = vmul.f32 %v4540_v19, %v4621_v9  ;;  %v4105_v15 = vld [vmem:[%s7584_s4 + $0xe0] sm:$0xff] }
 0x10d   :  { %7761 = vst [vmem:[#allocation11_spill] sm:$0xff] %v4661_v40  ;;  %v4670_v42 = vmul.f32 %v4661_v40, %v4561_v32  ;;  %v4712_v2 = vsel %vm107_vm1, 1.0, %v4310_v12  ;;  %v4106_v40 = vld [vmem:[%s7584_s4 + $0xe8] sm:$0xff]  ;;  %vm887_vm13 = vcmask 883712   ;;  %vm1109_vm1 = vcmask 769024  }
 0x10e   :  { %v261_v31 = vmul.f32 %v4517_v59, %v4640_v25  ;;  %v260_v34 = vmul.f32 %v4517_v59, %v4644_v26  ;;  %v264_v39 = vmul.f32 %v4540_v19, %v4640_v25  ;;  %v263_v59 = vmul.f32 %v4540_v19, %v4644_v26  ;;  %7764 = vst [vmem:[#allocation14_spill] sm:$0xff] %v4712_v2 }
 0x10f   :  { %v267_v19 = vmul.f32 %v4550_v24, %v4640_v25  ;;  %v4721_v11 = vmul.f32 %v4712_v2, %v4561_v32  ;;  %v634_v63 = vmul.f32 %v4593_v50, %v4640_v25 }
 0x113   :  { %363 = vrot.lane.b32.xlu1 %v339_v45, %s4311_s11  ;;  %361 = vrot.lane.b32.xlu0 %v338_v46, %s4311_s11  ;;  %v407_v45 = vmul.f32 %v4519_v61, %v4670_v42  ;;  %v4679_v46 = vsel %vm100_vm14, 1.0, %v4310_v12  ;;  %vm7681_vm14 = vcmask 785408  }
 0x114   :  { %359 = vrot.lane.b32.xlu2 %v337_v48, %s4311_s11  ;;  %7762 = vst [vmem:[#allocation12_spill] sm:$0xff] %v4679_v46  ;;  %v266_v48 = vmul.f32 %v4550_v24, %v4644_v26  ;;  %v410_v24 = vmul.f32 %v4558_v30, %v4670_v42 }
 0x11b   :  { %721 = vrot.lane.b32.xlu1 %v703_v51, %s4312_s3  ;;  %367 = vrot.lane.b32.xlu0 %v341_v52, %s4311_s11  ;;  %v4684_v51 = vsel %vm99_vm15, 1.0, %v4310_v12  ;;  %v4691_v52 = vmul.f32 %v4679_v46, %v4573_v38  ;;  %v4104_v46 = vld [vmem:[%s7584_s4 + $0xd8] sm:$0xff]  ;;  %vm7680_vm15 = vcmask 777216  }
 0x11c   :  { %365 = vrot.lane.b32.xlu2 %v340_v53, %s4311_s11  ;;  %7763 = vst [vmem:[#allocation13_spill] sm:$0xff] %v4684_v51  ;;  %v4695_v53 = vmul.f32 %v4684_v51, %v4570_v37 }
 0x11d   :  { %v409_v57 = vmul.f32 %v4519_v61, %v4691_v52 }
 0x123   :  { %727 = vrot.lane.b32.xlu1 %v706_v58, %s4312_s3  ;;  %725 = vrot.lane.b32.xlu0 %v705_v60, %s4312_s3  ;;  %v408_v58 = vmul.f32 %v4519_v61, %v4695_v53  ;;  %v413_v60 = vmul.f32 %v4563_v33, %v4670_v42  ;;  %v411_v61 = vmul.f32 %v4558_v30, %v4695_v53 }
 0x124   :  { %723 = vrot.lane.b32.xlu2 %v704_v1, %s4312_s3  ;;  %v412_v1 = vmul.f32 %v4558_v30, %v4691_v52  ;;  %v415_v30 = vmul.f32 %v4563_v33, %v4691_v52 }
 0x12b   :  { %733 = vrot.lane.b32.xlu1 %v709_v3, %s4312_s3  ;;  %731 = vrot.lane.b32.xlu0 %v708_v4, %s4312_s3  ;;  %v4723_v3 = vpop.permute.xlu2 %769  ;;  %v481_v4 = vmul.f32 %v4521_v62, %v4721_v11 }
 0x12c   :  { %729 = vrot.lane.b32.xlu2 %v707_v7, %s4312_s3  ;;  %v4732_v7 = vsel %vm109_vm2, 1.0, %v4310_v12  ;;  %v782_v2 = vmul.f32 %v4723_v3, %v4691_v52  ;;  %vm1183_vm2 = vcmask 760832  }
 0x12d   :  { %7765 = vst [vmem:[#allocation15_spill] sm:$0xff] %v4732_v7  ;;  %v4744_v21 = vmul.f32 %v4732_v7, %v4573_v38  ;;  %v779_v7 = vmul.f32 %v4556_v29, %v4691_v52 }
 0x133   :  { %737 = vrot.lane.b32.xlu0 %v711_v10, %s4312_s3  ;;  %277 = vrot.lane.b32.xlu1 %v259_v14, %s4313_s12  ;;  %v414_v10 = vmul.f32 %v4563_v33, %v4695_v53  ;;  %v4737_v14 = vsel %vm108_vm3, 1.0, %v4310_v12  ;;  %v484_v12 = vmul.f32 %v4566_v35, %v4721_v11  ;;  %v483_v33 = vmul.f32 %v4521_v62, %v4744_v21 }
 0x134   :  { %735 = vrot.lane.b32.xlu2 %v710_v18, %s4312_s3  ;;  %7766 = vst [vmem:[#allocation16_spill] sm:$0xff] %v4737_v14  ;;  %v4748_v23 = vmul.f32 %v4737_v14, %v4570_v37  ;;  %vm7682_vm3 = vcmask 752640  }
 0x13b   :  { %283 = vrot.lane.b32.xlu1 %v262_v28, %s4313_s12  ;;  %281 = vrot.lane.b32.xlu0 %v261_v31, %s4313_s12  ;;  %v482_v28 = vmul.f32 %v4521_v62, %v4748_v23  ;;  %v4772_v62 = vpop.permute.xlu0 %774 }
 0x13c   :  { %279 = vrot.lane.b32.xlu2 %v260_v34, %s4313_s12  ;;  %v487_v34 = vmul.f32 %v4577_v41, %v4721_v11  ;;  %v783_v14 = vmul.f32 %v4772_v62, %v4670_v42  ;;  %v785_v51 = vmul.f32 %v4772_v62, %v4691_v52 }
 0x143   :  { %289 = vrot.lane.b32.xlu1 %v265_v36, %s4313_s12  ;;  %287 = vrot.lane.b32.xlu0 %v264_v39, %s4313_s12  ;;  %v486_v36 = vmul.f32 %v4566_v35, %v4744_v21  ;;  %v485_v39 = vmul.f32 %v4566_v35, %v4748_v23  ;;  %v489_v35 = vmul.f32 %v4577_v41, %v4744_v21 }
 0x144   :  { %285 = vrot.lane.b32.xlu2 %v263_v59, %s4313_s12  ;;  %v4776_v59 = vmul.f32 %v4534_v13, %v4561_v32  ;;  %v780_v13 = vmul.f32 %v4723_v3, %v4670_v42 }
 0x14b   :  { %425 = vrot.lane.b32.xlu1 %v407_v45, %s4314_s13  ;;  %293 = vrot.lane.b32.xlu0 %v267_v19, %s4313_s12 }
 0x14c   :  { %291 = vrot.lane.b32.xlu2 %v266_v48, %s4313_s12  ;;  %v555_v48 = vmul.f32 %v4526_v6, %v4776_v59 }
 0x153   :  { %431 = vrot.lane.b32.xlu1 %v410_v24, %s4314_s13  ;;  %429 = vrot.lane.b32.xlu0 %v409_v57, %s4314_s13  ;;  %v488_v24 = vmul.f32 %v4577_v41, %v4748_v23 }
 0x154   :  { %427 = vrot.lane.b32.xlu2 %v408_v58, %s4314_s13 }
 0x15b   :  { %437 = vrot.lane.b32.xlu1 %v413_v60, %s4314_s13  ;;  %435 = vrot.lane.b32.xlu0 %v412_v1, %s4314_s13  ;;  %v4797_v60 = vmul.f32 %v4554_v27, %v4573_v38  ;;  %v4801_v1 = vmul.f32 %v4546_v22, %v4570_v37  ;;  %v777_v27 = vmul.f32 %v4556_v29, %v4670_v42 }
 0x15c   :  { %433 = vrot.lane.b32.xlu2 %v411_v61, %s4314_s13  ;;  %v558_v61 = vmul.f32 %v4582_v44, %v4776_v59  ;;  %v637_v22 = vmul.f32 %v4601_v54, %v4640_v25 }
 0x163   :  { %499 = vrot.lane.b32.xlu1 %v481_v4, %s4315_s14  ;;  %441 = vrot.lane.b32.xlu0 %v415_v30, %s4314_s13  ;;  %v557_v4 = vmul.f32 %v4526_v6, %v4797_v60  ;;  %v556_v30 = vmul.f32 %v4526_v6, %v4801_v1  ;;  %v559_v6 = vmul.f32 %v4582_v44, %v4801_v1 }
 0x164   :  { %439 = vrot.lane.b32.xlu2 %v414_v10, %s4314_s13 }
 0x166   :  { %v4750_v18 = vpop.permute.xlu2 %353 }
 0x16b   :  { %505 = vrot.lane.b32.xlu1 %v484_v12, %s4315_s14  ;;  %503 = vrot.lane.b32.xlu0 %v483_v33, %s4315_s14 }
 0x16c   :  { %501 = vrot.lane.b32.xlu2 %v482_v28, %s4315_s14  ;;  %v561_v28 = vmul.f32 %v4590_v49, %v4776_v59 }
 0x16e   :  { %v4761_v31 = vpop.permute.xlu2 %359 }
 0x173   :  { %511 = vrot.lane.b32.xlu1 %v487_v34, %s4315_s14  ;;  %509 = vrot.lane.b32.xlu0 %v486_v36, %s4315_s14  ;;  %v560_v34 = vmul.f32 %v4582_v44, %v4797_v60  ;;  %v562_v44 = vmul.f32 %v4590_v49, %v4801_v1 }
 0x174   :  { %507 = vrot.lane.b32.xlu2 %v485_v39, %s4315_s14 }
 0x175   :  { %v4778_v45 = vpop.permute.xlu1 %351 }
 0x176   :  { %v4780_v19 = vpop.permute.xlu2 %365 }
 0x17b   :  { %573 = vrot.lane.b32.xlu1 %v555_v48, %s4316_s15  ;;  %515 = vrot.lane.b32.xlu0 %v489_v35, %s4315_s14  ;;  %v629_v35 = vmul.f32 %v4538_v17, %v4621_v9 }
 0x17c   :  { %513 = vrot.lane.b32.xlu2 %v488_v24, %s4315_s14  ;;  %v563_v24 = vmul.f32 %v4590_v49, %v4797_v60  ;;  %v630_v49 = vmul.f32 %v4538_v17, %v4644_v26 }
 0x17d   :  { %v4791_v57 = vpop.permute.xlu0 %355  ;;  %v4793_v58 = vpop.permute.xlu1 %357 }
 0x17e   :  { %v4803_v41 = vpop.permute.xlu2 %723 }
 0x17f   :  { %7767 = vst [vmem:[#allocation17_spill] sm:$0xff] %v4803_v41 }
 0x183   :  { %579 = vrot.lane.b32.xlu1 %v558_v61, %s4316_s15  ;;  %577 = vrot.lane.b32.xlu0 %v557_v4, %s4316_s15 }
 0x184   :  { %575 = vrot.lane.b32.xlu2 %v556_v30, %s4316_s15 }
 0x185   :  { %v4814_v10 = vpop.permute.xlu0 %361  ;;  %v4816_v12 = vpop.permute.xlu1 %363 }
 0x186   :  { %v4818_v33 = vpop.permute.xlu2 %729 }
 0x187   :  { %7768 = vst [vmem:[#allocation18_spill] sm:$0xff] %v4818_v33 }
 0x18b   :  { %585 = vrot.lane.b32.xlu1 %v561_v28, %s4316_s15  ;;  %583 = vrot.lane.b32.xlu0 %v560_v34, %s4316_s15  ;;  %v632_v28 = vmul.f32 %v4593_v50, %v4621_v9  ;;  %v631_v34 = vmul.f32 %v4538_v17, %v4640_v25  ;;  %v633_v17 = vmul.f32 %v4593_v50, %v4644_v26 }
 0x18c   :  { %581 = vrot.lane.b32.xlu2 %v559_v6, %s4316_s15  ;;  %v636_v50 = vmul.f32 %v4601_v54, %v4644_v26 }
 0x18d   :  { %v4829_v36 = vpop.permute.xlu0 %367  ;;  %v4831_v39 = vpop.permute.xlu1 %721 }
 0x18e   :  { %7769 = vst [vmem:[#allocation19_spill] sm:$0xff] %v4831_v39  ;;  %v4833_v48 = vpop.permute.xlu2 %735 }
 0x18f   :  { %7770 = vst [vmem:[#allocation20_spill] sm:$0xff] %v4833_v48 }
 0x193   :  { %647 = vrot.lane.b32.xlu1 %v629_v35, %s4317_s16  ;;  %589 = vrot.lane.b32.xlu0 %v563_v24, %s4316_s15 }
 0x194   :  { %587 = vrot.lane.b32.xlu2 %v562_v44, %s4316_s15  ;;  %v635_v44 = vmul.f32 %v4601_v54, %v4621_v9  ;;  %v778_v54 = vmul.f32 %v4556_v29, %v4695_v53  ;;  %v781_v29 = vmul.f32 %v4723_v3, %v4695_v53  ;;  %v784_v3 = vmul.f32 %v4772_v62, %v4695_v53 }
 0x195   :  { %v4844_v61 = vpop.permute.xlu0 %725  ;;  %v4846_v4 = vpop.permute.xlu1 %727 }
 0x196   :  { %7771 = vst [vmem:[#allocation21_spill] sm:$0xff] %v4844_v61  ;;  %v4848_v30 = vpop.permute.xlu2 %279 }
 0x197   :  { %7772 = vst [vmem:[#allocation22_spill] sm:$0xff] %v4846_v4 }
 0x19b   :  { %653 = vrot.lane.b32.xlu1 %v632_v28, %s4317_s16  ;;  %651 = vrot.lane.b32.xlu0 %v631_v34, %s4317_s16 }
 0x19c   :  { %649 = vrot.lane.b32.xlu2 %v630_v49, %s4317_s16 }
 0x19d   :  { %v4859_v6 = vpop.permute.xlu0 %731  ;;  %v4861_v35 = vpop.permute.xlu1 %733 }
 0x19e   :  { %7773 = vst [vmem:[#allocation23_spill] sm:$0xff] %v4859_v6  ;;  %v4863_v24 = vpop.permute.xlu2 %285 }
 0x19f   :  { %7774 = vst [vmem:[#allocation24_spill] sm:$0xff] %v4861_v35 }
 0x1a3   :  { %659 = vrot.lane.b32.xlu1 %v635_v44, %s4317_s16  ;;  %657 = vrot.lane.b32.xlu0 %v634_v63, %s4317_s16 }
 0x1a4   :  { %655 = vrot.lane.b32.xlu2 %v633_v17, %s4317_s16 }
 0x1a5   :  { %v4874_v28 = vpop.permute.xlu0 %737  ;;  %v4876_v34 = vpop.permute.xlu1 %277 }
 0x1a6   :  { %7775 = vst [vmem:[#allocation25_spill] sm:$0xff] %v4874_v28  ;;  %v4878_v49 = vpop.permute.xlu2 %291 }
 0x1ab   :  { %795 = vrot.lane.b32.xlu1 %v777_v27, %s4318_s17  ;;  %663 = vrot.lane.b32.xlu0 %v637_v22, %s4317_s16 }
 0x1ac   :  { %661 = vrot.lane.b32.xlu2 %v636_v50, %s4317_s16 }
 0x1ad   :  { %v4889_v63 = vpop.permute.xlu1 %283  ;;  %v4891_v44 = vpop.permute.xlu0 %281 }
 0x1ae   :  { %v4893_v17 = vpop.permute.xlu2 %427 }
 0x1b3   :  { %801 = vrot.lane.b32.xlu1 %v780_v13, %s4318_s17  ;;  %799 = vrot.lane.b32.xlu0 %v779_v7, %s4318_s17 }
 0x1b4   :  { %797 = vrot.lane.b32.xlu2 %v778_v54, %s4318_s17 }
 0x1b5   :  { %v4904_v22 = vpop.permute.xlu1 %289  ;;  %v4906_v27 = vpop.permute.xlu0 %287 }
 0x1b6   :  { %v4908_v50 = vpop.permute.xlu2 %433 }
 0x1bb   :  { %807 = vrot.lane.b32.xlu1 %v783_v14, %s4318_s17  ;;  %805 = vrot.lane.b32.xlu0 %v782_v2, %s4318_s17 }
 0x1bc   :  { %803 = vrot.lane.b32.xlu2 %v781_v29, %s4318_s17 }
 0x1bd   :  { %v4919_v13 = vpop.permute.xlu1 %425  ;;  %v4921_v7 = vpop.permute.xlu0 %293 }
 0x1be   :  { %v4923_v54 = vpop.permute.xlu2 %439 }
 0x1c3   :  { %838 = vperm.xlu1 %4264, %v4104_v46   ;;  %811 = vrot.lane.b32.xlu0 %v785_v51, %s4318_s17 }
 0x1c4   :  { %809 = vrot.lane.b32.xlu2 %v784_v3, %s4318_s17 }
 0x1c5   :  { %v4934_v2 = vpop.permute.xlu1 %431  ;;  %v4936_v14 = vpop.permute.xlu0 %429 }
 0x1c6   :  { %v4938_v29 = vpop.permute.xlu2 %501 }
 0x1cb   :  { %848 = vperm.xlu0 %4262, %v4106_v40  }
 0x1cc   :  { %843 = vperm.xlu2 %4263, %v4105_v15  }
 0x1cd   :  { %v4946_v46 = vpop.permute.xlu1 %437  ;;  %v4948_v51 = vpop.permute.xlu0 %435 }
 0x1ce   :  { %v4950_v62 = vpop.permute.xlu2 %507 }
 0x1d5   :  { %v4952_v3 = vpop.permute.xlu1 %499  ;;  %v4954_v20 = vpop.permute.xlu0 %441 }
 0x1d6   :  { %v4956_v5 = vpop.permute.xlu2 %513 }
 0x1d7   :  { %7776 = vst [vmem:[#allocation26_spill] sm:$0xff] %v4956_v5 }
 0x1dd   :  { %v4958_v28 = vpop.permute.xlu1 %505  ;;  %v4960_v35 = vpop.permute.xlu0 %503 }
 0x1de   :  { %7777 = vst [vmem:[#allocation27_spill] sm:$0xff] %v4958_v28  ;;  %v4962_v48 = vpop.permute.xlu2 %575 }
 0x1df   :  { %7778 = vst [vmem:[#allocation28_spill] sm:$0xff] %v4960_v35 }
 0x1e0   :  { %7779 = vst [vmem:[#allocation29_spill] sm:$0xff] %v4962_v48 }
 0x1e5   :  { %v4964_v40 = vpop.permute.xlu1 %511  ;;  %v4966_v15 = vpop.permute.xlu0 %509 }
 0x1e6   :  { %7780 = vst [vmem:[#allocation30_spill] sm:$0xff] %v4964_v40  ;;  %v4968_v6 = vpop.permute.xlu2 %581 }
 0x1e7   :  { %7781 = vst [vmem:[#allocation31_spill] sm:$0xff] %v4966_v15 }
 0x1e8   :  { %7782 = vst [vmem:[#allocation32_spill] sm:$0xff] %v4968_v6 }
 0x1ed   :  { %v4970_v4 = vpop.permute.xlu1 %573  ;;  %v4972_v33 = vpop.permute.xlu0 %515 }
 0x1ee   :  { %7783 = vst [vmem:[#allocation33_spill] sm:$0xff] %v4970_v4  ;;  %v4974_v61 = vpop.permute.xlu2 %587 }
 0x1ef   :  { %7784 = vst [vmem:[#allocation34_spill] sm:$0xff] %v4972_v33 }
 0x1f0   :  { %7785 = vst [vmem:[#allocation35_spill] sm:$0xff] %v4974_v61 }
 0x1f5   :  { %v4976_v39 = vpop.permute.xlu1 %579  ;;  %v4978_v41 = vpop.permute.xlu0 %577 }
 0x1f6   :  { %7786 = vst [vmem:[#allocation36_spill] sm:$0xff] %v4976_v39  ;;  %v4984_v48 = vpop.permute.xlu2 %649 }
 0x1f7   :  { %7787 = vst [vmem:[#allocation37_spill] sm:$0xff] %v4978_v41 }
 0x1f8   :  { %7790 = vst [vmem:[#allocation40_spill] sm:$0xff] %v4984_v48 }
 0x1fd   :  { %v4980_v5 = vpop.permute.xlu1 %585  ;;  %v4982_v35 = vpop.permute.xlu0 %583 }
 0x1fe   :  { %7788 = vst [vmem:[#allocation38_spill] sm:$0xff] %v4980_v5  ;;  %v4990_v6 = vpop.permute.xlu2 %655 }
 0x1ff   :  { %7789 = vst [vmem:[#allocation39_spill] sm:$0xff] %v4982_v35 }
 0x200   :  { %7793 = vst [vmem:[#allocation43_spill] sm:$0xff] %v4990_v6 }
 0x205   :  { %v4986_v40 = vpop.permute.xlu1 %647  ;;  %v4988_v15 = vpop.permute.xlu0 %589 }
 0x206   :  { %7791 = vst [vmem:[#allocation41_spill] sm:$0xff] %v4986_v40  ;;  %v4996_v61 = vpop.permute.xlu2 %661 }
 0x207   :  { %7792 = vst [vmem:[#allocation42_spill] sm:$0xff] %v4988_v15 }
 0x208   :  { %7796 = vst [vmem:[#allocation46_spill] sm:$0xff] %v4996_v61 }
 0x20d   :  { %v4992_v4 = vpop.permute.xlu1 %653  ;;  %v4994_v33 = vpop.permute.xlu0 %651 }
 0x20e   :  { %7794 = vst [vmem:[#allocation44_spill] sm:$0xff] %v4992_v4  ;;  %v5002_v5 = vpop.permute.xlu2 %797 }
 0x20f   :  { %7795 = vst [vmem:[#allocation45_spill] sm:$0xff] %v4994_v33 }
 0x210   :  { %7799 = vst [vmem:[#allocation49_spill] sm:$0xff] %v5002_v5 }
 0x215   :  { %v4998_v39 = vpop.permute.xlu1 %659  ;;  %v5000_v41 = vpop.permute.xlu0 %657 }
 0x216   :  { %7797 = vst [vmem:[#allocation47_spill] sm:$0xff] %v4998_v39  ;;  %v5012_v6 = vpop.permute.xlu2 %803 }
 0x217   :  { %7798 = vst [vmem:[#allocation48_spill] sm:$0xff] %v5000_v41 }
 0x218   :  { %7804 = vst [vmem:[#allocation54_spill] sm:$0xff] %v5012_v6 }
 0x21d   :  { %v5004_v35 = vpop.permute.xlu1 %795  ;;  %v5006_v48 = vpop.permute.xlu0 %663 }
 0x21e   :  { %7800 = vst [vmem:[#allocation50_spill] sm:$0xff] %v5004_v35  ;;  %v5018_v61 = vpop.permute.xlu2 %809 }
 0x21f   :  { %7801 = vst [vmem:[#allocation51_spill] sm:$0xff] %v5006_v48 }
 0x220   :  { %7807 = vst [vmem:[#allocation57_spill] sm:$0xff] %v5018_v61 }
 0x225   :  { %v5008_v40 = vpop.permute.xlu1 %801  ;;  %v5010_v15 = vpop.permute.xlu0 %799 }
 0x226   :  { %7802 = vst [vmem:[#allocation52_spill] sm:$0xff] %v5008_v40 }
 0x227   :  { %7803 = vst [vmem:[#allocation53_spill] sm:$0xff] %v5010_v15 }
 0x22d   :  { %v5014_v4 = vpop.permute.xlu1 %807  ;;  %v5016_v33 = vpop.permute.xlu0 %805 }
 0x22e   :  { %7805 = vst [vmem:[#allocation55_spill] sm:$0xff] %v5014_v4  ;;  %v844_v4 = vpop.permute.xlu2 %843 }
 0x22f   :  { %7806 = vst [vmem:[#allocation56_spill] sm:$0xff] %v5016_v33  ;;  %v856_v33 = vmul.f32 %v844_v4, %v4744_v21  ;;  %v854_v61 = vmul.f32 %v844_v4, %v4721_v11  ;;  %v855_v40 = vmul.f32 %v844_v4, %v4748_v23  ;;  %v4108_v4 = vld [vmem:[%s7584_s4 + $0xf8] sm:$0xff] }
 0x235   :  { %v839_v39 = vpop.permute.xlu1 %838  ;;  %v5025_v15 = vpop.permute.xlu0 %811 }
 0x236   :  { %v851_v41 = vmul.f32 %v839_v39, %v4721_v11  ;;  %v853_v5 = vmul.f32 %v839_v39, %v4744_v21  ;;  %v852_v35 = vmul.f32 %v839_v39, %v4748_v23  ;;  %7808 = vst [vmem:[#allocation58_spill] sm:$0xff] %v5025_v15 }
 0x238   :  { %869 = vrot.lane.b32.xlu1 %v851_v41, %s4319_s23  ;;  %873 = vrot.lane.b32.xlu0 %v853_v5, %s4319_s23 }
 0x239   :  { %871 = vrot.lane.b32.xlu2 %v852_v35, %s4319_s23 }
 0x23d   :  { %v849_v41 = vpop.permute.xlu0 %848 }
 0x23e   :  { %v859_v5 = vmul.f32 %v849_v41, %v4744_v21  ;;  %v857_v39 = vmul.f32 %v849_v41, %v4721_v11  ;;  %v858_v35 = vmul.f32 %v849_v41, %v4748_v23 }
 0x240   :  { %879 = vrot.lane.b32.xlu0 %v856_v33, %s4319_s23  ;;  %875 = vrot.lane.b32.xlu1 %v854_v61, %s4319_s23  ;;  %v4109_v33 = vld [vmem:[%s7584_s4 + $0x100] sm:$0xff]  ;;  %v4107_v61 = vld [vmem:[%s7584_s4 + $0xf0] sm:$0xff] }
 0x241   :  { %877 = vrot.lane.b32.xlu2 %v855_v40, %s4319_s23 }
 0x248   :  { %885 = vrot.lane.b32.xlu0 %v859_v5, %s4319_s23  ;;  %881 = vrot.lane.b32.xlu1 %v857_v39, %s4319_s23 }
 0x249   :  { %883 = vrot.lane.b32.xlu2 %v858_v35, %s4319_s23 }
 0x250   :  { %922 = vperm.xlu0 %4262, %v4109_v33   ;;  %912 = vperm.xlu1 %4264, %v4107_v61  }
 0x251   :  { %917 = vperm.xlu2 %4263, %v4108_v4  }
 0x293   :  { %v5049_v40 = vpop.permute.xlu2 %871 }
 0x294   :  { %7809 = vst [vmem:[#allocation59_spill] sm:$0xff] %v5049_v40 }
 0x29b   :  { %v5057_v35 = vpop.permute.xlu2 %877 }
 0x29c   :  { %7813 = vst [vmem:[#allocation63_spill] sm:$0xff] %v5057_v35 }
 0x2a3   :  { %v5063_v48 = vpop.permute.xlu2 %883 }
 0x2a4   :  { %7816 = vst [vmem:[#allocation66_spill] sm:$0xff] %v5063_v48 }
 0x2aa   :  { %v5051_v41 = vpop.permute.xlu1 %869  ;;  %v5053_v5 = vpop.permute.xlu0 %873 }
 0x2ab   :  { %7810 = vst [vmem:[#allocation60_spill] sm:$0xff] %v5051_v41 }
 0x2ac   :  { %7811 = vst [vmem:[#allocation61_spill] sm:$0xff] %v5053_v5 }
 0x2b2   :  { %v5055_v39 = vpop.permute.xlu1 %875  ;;  %v5061_v6 = vpop.permute.xlu0 %879 }
 0x2b3   :  { %7812 = vst [vmem:[#allocation62_spill] sm:$0xff] %v5055_v39 }
 0x2b4   :  { %7815 = vst [vmem:[#allocation65_spill] sm:$0xff] %v5061_v6 }
 0x2ba   :  { %v5059_v15 = vpop.permute.xlu1 %881  ;;  %v5070_v39 = vpop.permute.xlu0 %885 }
 0x2bb   :  { %7814 = vst [vmem:[#allocation64_spill] sm:$0xff] %v5059_v15  ;;  %v918_v15 = vpop.permute.xlu2 %917 }
 0x2bc   :  { %7817 = vst [vmem:[#allocation67_spill] sm:$0xff] %v5070_v39  ;;  %v930_v35 = vmul.f32 %v918_v15, %v4797_v60  ;;  %v929_v48 = vmul.f32 %v918_v15, %v4801_v1  ;;  %v928_v6 = vmul.f32 %v918_v15, %v4776_v59  ;;  %v4112_v15 = vld [vmem:[%s7584_s4 + $0x118] sm:$0xff] }
 0x2c2   :  { %v913_v28 = vpop.permute.xlu1 %912 }
 0x2c3   :  { %v927_v33 = vmul.f32 %v913_v28, %v4797_v60  ;;  %v926_v61 = vmul.f32 %v913_v28, %v4801_v1  ;;  %v925_v4 = vmul.f32 %v913_v28, %v4776_v59  ;;  %v923_v28 = vpop.permute.xlu0 %922 }
 0x2c5   :  { %947 = vrot.lane.b32.xlu0 %v927_v33, %s4320_s1  ;;  %945 = vrot.lane.b32.xlu2 %v926_v61, %s4320_s1  ;;  %v933_v33 = vmul.f32 %v923_v28, %v4797_v60  ;;  %v932_v61 = vmul.f32 %v923_v28, %v4801_v1 }
 0x2c6   :  { %943 = vrot.lane.b32.xlu1 %v925_v4, %s4320_s1  ;;  %v931_v4 = vmul.f32 %v923_v28, %v4776_v59 }
 0x2cd   :  { %953 = vrot.lane.b32.xlu0 %v930_v35, %s4320_s1  ;;  %951 = vrot.lane.b32.xlu2 %v929_v48, %s4320_s1  ;;  %v4111_v48 = vld [vmem:[%s7584_s4 + $0x110] sm:$0xff] }
 0x2ce   :  { %949 = vrot.lane.b32.xlu1 %v928_v6, %s4320_s1  ;;  %v4110_v6 = vld [vmem:[%s7584_s4 + $0x108] sm:$0xff] }
 0x2d5   :  { %959 = vrot.lane.b32.xlu0 %v933_v33, %s4320_s1  ;;  %957 = vrot.lane.b32.xlu2 %v932_v61, %s4320_s1 }
 0x2d6   :  { %955 = vrot.lane.b32.xlu1 %v931_v4, %s4320_s1 }
 0x2dd   :  { %996 = vperm.xlu0 %4262, %v4112_v15   ;;  %991 = vperm.xlu2 %4263, %v4111_v48  }
 0x2de   :  { %986 = vperm.xlu1 %4264, %v4110_v6  }
 0x31f   :  { %v5094_v35 = vpop.permute.xlu2 %945 }
 0x320   :  { %7818 = vst [vmem:[#allocation68_spill] sm:$0xff] %v5094_v35 }
 0x327   :  { %v5102_v4 = vpop.permute.xlu2 %951 }
 0x328   :  { %7822 = vst [vmem:[#allocation72_spill] sm:$0xff] %v5102_v4 }
 0x32f   :  { %v5108_v41 = vpop.permute.xlu2 %957 }
 0x330   :  { %7825 = vst [vmem:[#allocation75_spill] sm:$0xff] %v5108_v41 }
 0x337   :  { %v5098_v33 = vpop.permute.xlu0 %947 }
 0x338   :  { %v5096_v28 = vpop.permute.xlu1 %943  ;;  %7820 = vst [vmem:[#allocation70_spill] sm:$0xff] %v5098_v33 }
 0x339   :  { %7819 = vst [vmem:[#allocation69_spill] sm:$0xff] %v5096_v28 }
 0x33f   :  { %v5106_v5 = vpop.permute.xlu0 %953 }
 0x340   :  { %v5100_v61 = vpop.permute.xlu1 %949  ;;  %7824 = vst [vmem:[#allocation74_spill] sm:$0xff] %v5106_v5 }
 0x341   :  { %7821 = vst [vmem:[#allocation71_spill] sm:$0xff] %v5100_v61 }
 0x347   :  { %v5115_v61 = vpop.permute.xlu0 %959 }
 0x348   :  { %v5104_v39 = vpop.permute.xlu1 %955  ;;  %7826 = vst [vmem:[#allocation76_spill] sm:$0xff] %v5115_v61 }
 0x349   :  { %7823 = vst [vmem:[#allocation73_spill] sm:$0xff] %v5104_v39  ;;  %v992_v39 = vpop.permute.xlu2 %991 }
 0x34a   :  { %v1004_v4 = vmul.f32 %v992_v39, %v4640_v25  ;;  %v1003_v41 = vmul.f32 %v992_v39, %v4644_v26  ;;  %v1002_v5 = vmul.f32 %v992_v39, %v4621_v9  ;;  %v4115_v39 = vld [vmem:[%s7584_s4 + $0x130] sm:$0xff] }
 0x350   :  { %v987_v40 = vpop.permute.xlu1 %986 }
 0x351   :  { %v1001_v15 = vmul.f32 %v987_v40, %v4640_v25  ;;  %v1000_v48 = vmul.f32 %v987_v40, %v4644_v26  ;;  %v999_v6 = vmul.f32 %v987_v40, %v4621_v9  ;;  %v997_v40 = vpop.permute.xlu0 %996 }
 0x353   :  { %1021 = vrot.lane.b32.xlu0 %v1001_v15, %s4321_s22  ;;  %1019 = vrot.lane.b32.xlu2 %v1000_v48, %s4321_s22  ;;  %v1007_v15 = vmul.f32 %v997_v40, %v4640_v25  ;;  %v1006_v48 = vmul.f32 %v997_v40, %v4644_v26 }
 0x354   :  { %1017 = vrot.lane.b32.xlu1 %v999_v6, %s4321_s22  ;;  %v1005_v6 = vmul.f32 %v997_v40, %v4621_v9 }
 0x35b   :  { %1027 = vrot.lane.b32.xlu0 %v1004_v4, %s4321_s22  ;;  %1025 = vrot.lane.b32.xlu2 %v1003_v41, %s4321_s22  ;;  %v4114_v41 = vld [vmem:[%s7584_s4 + $0x128] sm:$0xff] }
 0x35c   :  { %1023 = vrot.lane.b32.xlu1 %v1002_v5, %s4321_s22  ;;  %v4113_v5 = vld [vmem:[%s7584_s4 + $0x120] sm:$0xff] }
 0x363   :  { %1033 = vrot.lane.b32.xlu0 %v1007_v15, %s4321_s22  ;;  %1031 = vrot.lane.b32.xlu2 %v1006_v48, %s4321_s22 }
 0x364   :  { %1029 = vrot.lane.b32.xlu1 %v1005_v6, %s4321_s22 }
 0x36b   :  { %1070 = vperm.xlu0 %4262, %v4115_v39   ;;  %1065 = vperm.xlu2 %4263, %v4114_v41  }
 0x36c   :  { %1060 = vperm.xlu1 %4264, %v4113_v5  }
 0x3ad   :  { %v5139_v4 = vpop.permute.xlu2 %1019 }
 0x3ae   :  { %7827 = vst [vmem:[#allocation77_spill] sm:$0xff] %v5139_v4 }
 0x3b5   :  { %v5147_v6 = vpop.permute.xlu2 %1025 }
 0x3b6   :  { %7831 = vst [vmem:[#allocation81_spill] sm:$0xff] %v5147_v6 }
 0x3bd   :  { %v5153_v35 = vpop.permute.xlu2 %1031 }
 0x3be   :  { %7834 = vst [vmem:[#allocation84_spill] sm:$0xff] %v5153_v35 }
 0x3c5   :  { %v5143_v15 = vpop.permute.xlu0 %1021 }
 0x3c6   :  { %v5141_v40 = vpop.permute.xlu1 %1017  ;;  %7829 = vst [vmem:[#allocation79_spill] sm:$0xff] %v5143_v15 }
 0x3c7   :  { %7828 = vst [vmem:[#allocation78_spill] sm:$0xff] %v5141_v40 }
 0x3cd   :  { %v5151_v28 = vpop.permute.xlu0 %1027 }
 0x3ce   :  { %v5145_v48 = vpop.permute.xlu1 %1023  ;;  %7833 = vst [vmem:[#allocation83_spill] sm:$0xff] %v5151_v28 }
 0x3cf   :  { %7830 = vst [vmem:[#allocation80_spill] sm:$0xff] %v5145_v48 }
 0x3d5   :  { %v5160_v48 = vpop.permute.xlu0 %1033 }
 0x3d6   :  { %v5149_v61 = vpop.permute.xlu1 %1029  ;;  %7835 = vst [vmem:[#allocation85_spill] sm:$0xff] %v5160_v48 }
 0x3d7   :  { %7832 = vst [vmem:[#allocation82_spill] sm:$0xff] %v5149_v61  ;;  %v1066_v61 = vpop.permute.xlu2 %1065 }
 0x3d8   :  { %v1078_v6 = vmul.f32 %v1066_v61, %v4573_v38  ;;  %v1077_v35 = vmul.f32 %v1066_v61, %v4570_v37  ;;  %v1076_v28 = vmul.f32 %v1066_v61, %v4561_v32  ;;  %v4118_v61 = vld [vmem:[%s7584_s4 + $0x148] sm:$0xff] }
 0x3de   :  { %v1061_v33 = vpop.permute.xlu1 %1060 }
 0x3df   :  { %v1075_v39 = vmul.f32 %v1061_v33, %v4573_v38  ;;  %v1074_v41 = vmul.f32 %v1061_v33, %v4570_v37  ;;  %v1073_v5 = vmul.f32 %v1061_v33, %v4561_v32  ;;  %v1071_v33 = vpop.permute.xlu0 %1070 }
 0x3e1   :  { %1095 = vrot.lane.b32.xlu0 %v1075_v39, %s4322_s29  ;;  %1093 = vrot.lane.b32.xlu2 %v1074_v41, %s4322_s29  ;;  %v1080_v39 = vmul.f32 %v1071_v33, %v4570_v37  ;;  %v1081_v41 = vmul.f32 %v1071_v33, %v4573_v38 }
 0x3e2   :  { %1091 = vrot.lane.b32.xlu1 %v1073_v5, %s4322_s29  ;;  %v1079_v5 = vmul.f32 %v1071_v33, %v4561_v32 }
 0x3e9   :  { %1101 = vrot.lane.b32.xlu0 %v1078_v6, %s4322_s29  ;;  %1099 = vrot.lane.b32.xlu2 %v1077_v35, %s4322_s29  ;;  %v4117_v35 = vld [vmem:[%s7584_s4 + $0x140] sm:$0xff] }
 0x3ea   :  { %1097 = vrot.lane.b32.xlu1 %v1076_v28, %s4322_s29  ;;  %v4116_v28 = vld [vmem:[%s7584_s4 + $0x138] sm:$0xff] }
 0x3f1   :  { %1107 = vrot.lane.b32.xlu0 %v1081_v41, %s4322_s29  ;;  %1105 = vrot.lane.b32.xlu2 %v1080_v39, %s4322_s29 }
 0x3f2   :  { %1103 = vrot.lane.b32.xlu1 %v1079_v5, %s4322_s29 }
 0x3f9   :  { %1144 = vperm.xlu0 %4262, %v4118_v61   ;;  %1139 = vperm.xlu2 %4263, %v4117_v35  }
 0x3fa   :  { %1134 = vperm.xlu1 %4264, %v4116_v28  }
 0x43b   :  { %v5184_v6 = vpop.permute.xlu2 %1093 }
 0x43c   :  { %7836 = vst [vmem:[#allocation86_spill] sm:$0xff] %v5184_v6 }
 0x443   :  { %v5192_v5 = vpop.permute.xlu2 %1099 }
 0x444   :  { %7840 = vst [vmem:[#allocation90_spill] sm:$0xff] %v5192_v5 }
 0x44b   :  { %v5198_v4 = vpop.permute.xlu2 %1105 }
 0x44c   :  { %7843 = vst [vmem:[#allocation93_spill] sm:$0xff] %v5198_v4 }
 0x453   :  { %v5188_v39 = vpop.permute.xlu0 %1095 }
 0x454   :  { %v5186_v33 = vpop.permute.xlu1 %1091  ;;  %7838 = vst [vmem:[#allocation88_spill] sm:$0xff] %v5188_v39 }
 0x455   :  { %7837 = vst [vmem:[#allocation87_spill] sm:$0xff] %v5186_v33 }
 0x45b   :  { %v5196_v40 = vpop.permute.xlu0 %1101 }
 0x45c   :  { %v5190_v41 = vpop.permute.xlu1 %1097  ;;  %7842 = vst [vmem:[#allocation92_spill] sm:$0xff] %v5196_v40 }
 0x45d   :  { %7839 = vst [vmem:[#allocation89_spill] sm:$0xff] %v5190_v41 }
 0x463   :  { %v5205_v41 = vpop.permute.xlu0 %1107 }
 0x464   :  { %v5194_v48 = vpop.permute.xlu1 %1103  ;;  %7844 = vst [vmem:[#allocation94_spill] sm:$0xff] %v5205_v41 }
 0x465   :  { %7841 = vst [vmem:[#allocation91_spill] sm:$0xff] %v5194_v48  ;;  %v1140_v48 = vpop.permute.xlu2 %1139 }
 0x466   :  { %v1151_v5 = vmul.f32 %v1140_v48, %v4695_v53  ;;  %v1152_v4 = vmul.f32 %v1140_v48, %v4691_v52  ;;  %v1150_v40 = vmul.f32 %v1140_v48, %v4670_v42  ;;  %v4119_v48 = vld [vmem:[%s7584_s4 + $0x150] sm:$0xff] }
 0x46c   :  { %v1135_v15 = vpop.permute.xlu1 %1134 }
 0x46d   :  { %v1147_v61 = vmul.f32 %v1135_v15, %v4670_v42  ;;  %v1148_v35 = vmul.f32 %v1135_v15, %v4695_v53  ;;  %v1149_v28 = vmul.f32 %v1135_v15, %v4691_v52  ;;  %v1145_v15 = vpop.permute.xlu0 %1144 }
 0x46f   :  { %1169 = vrot.lane.b32.xlu0 %v1149_v28, %s4323_s25  ;;  %1167 = vrot.lane.b32.xlu2 %v1148_v35, %s4323_s25  ;;  %v1154_v35 = vmul.f32 %v1145_v15, %v4695_v53  ;;  %v1155_v28 = vmul.f32 %v1145_v15, %v4691_v52 }
 0x470   :  { %1165 = vrot.lane.b32.xlu1 %v1147_v61, %s4323_s25  ;;  %v1153_v61 = vmul.f32 %v1145_v15, %v4670_v42 }
 0x477   :  { %1175 = vrot.lane.b32.xlu0 %v1152_v4, %s4323_s25  ;;  %1173 = vrot.lane.b32.xlu2 %v1151_v5, %s4323_s25  ;;  %v4121_v4 = vld [vmem:[%s7584_s4 + $0x160] sm:$0xff] }
 0x478   :  { %1171 = vrot.lane.b32.xlu1 %v1150_v40, %s4323_s25  ;;  %v4120_v40 = vld [vmem:[%s7584_s4 + $0x158] sm:$0xff] }
 0x47f   :  { %1181 = vrot.lane.b32.xlu0 %v1155_v28, %s4323_s25  ;;  %1179 = vrot.lane.b32.xlu2 %v1154_v35, %s4323_s25 }
 0x480   :  { %1177 = vrot.lane.b32.xlu1 %v1153_v61, %s4323_s25 }
 0x487   :  { %1218 = vperm.xlu0 %4262, %v4121_v4   ;;  %1213 = vperm.xlu2 %4263, %v4120_v40  }
 0x488   :  { %1208 = vperm.xlu1 %4264, %v4119_v48  }
 0x4c9   :  { %v5229_v5 = vpop.permute.xlu2 %1167 }
 0x4ca   :  { %7845 = vst [vmem:[#allocation95_spill] sm:$0xff] %v5229_v5 }
 0x4d1   :  { %v5237_v61 = vpop.permute.xlu2 %1173 }
 0x4d2   :  { %7849 = vst [vmem:[#allocation99_spill] sm:$0xff] %v5237_v61 }
 0x4d9   :  { %v5243_v6 = vpop.permute.xlu2 %1179 }
 0x4da   :  { %7852 = vst [vmem:[#allocation102_spill] sm:$0xff] %v5243_v6 }
 0x4e1   :  { %v5233_v35 = vpop.permute.xlu0 %1169 }
 0x4e2   :  { %v5231_v15 = vpop.permute.xlu1 %1165  ;;  %7847 = vst [vmem:[#allocation97_spill] sm:$0xff] %v5233_v35 }
 0x4e3   :  { %7846 = vst [vmem:[#allocation96_spill] sm:$0xff] %v5231_v15 }
 0x4e9   :  { %v5241_v33 = vpop.permute.xlu0 %1175 }
 0x4ea   :  { %v5235_v28 = vpop.permute.xlu1 %1171  ;;  %7851 = vst [vmem:[#allocation101_spill] sm:$0xff] %v5241_v33 }
 0x4eb   :  { %7848 = vst [vmem:[#allocation98_spill] sm:$0xff] %v5235_v28 }
 0x4f1   :  { %v5250_v28 = vpop.permute.xlu0 %1181 }
 0x4f2   :  { %v5239_v41 = vpop.permute.xlu1 %1177  ;;  %7853 = vst [vmem:[#allocation103_spill] sm:$0xff] %v5250_v28 }
 0x4f3   :  { %7850 = vst [vmem:[#allocation100_spill] sm:$0xff] %v5239_v41  ;;  %v1214_v41 = vpop.permute.xlu2 %1213 }
 0x4f4   :  { %v1225_v61 = vmul.f32 %v1214_v41, %v4748_v23  ;;  %v1226_v6 = vmul.f32 %v1214_v41, %v4744_v21  ;;  %v1224_v33 = vmul.f32 %v1214_v41, %v4721_v11  ;;  %v4122_v41 = vld [vmem:[%s7584_s4 + $0x168] sm:$0xff] }
 0x4fa   :  { %v1209_v39 = vpop.permute.xlu1 %1208 }
 0x4fb   :  { %v1221_v4 = vmul.f32 %v1209_v39, %v4721_v11  ;;  %v1222_v40 = vmul.f32 %v1209_v39, %v4748_v23  ;;  %v1223_v48 = vmul.f32 %v1209_v39, %v4744_v21  ;;  %v1219_v39 = vpop.permute.xlu0 %1218 }
 0x4fd   :  { %1243 = vrot.lane.b32.xlu0 %v1223_v48, %s7678_s20  ;;  %1241 = vrot.lane.b32.xlu2 %v1222_v40, %s7678_s20  ;;  %v1228_v40 = vmul.f32 %v1219_v39, %v4748_v23  ;;  %v1229_v48 = vmul.f32 %v1219_v39, %v4744_v21 }
 0x4fe   :  { %1239 = vrot.lane.b32.xlu1 %v1221_v4, %s7678_s20  ;;  %v1227_v4 = vmul.f32 %v1219_v39, %v4721_v11 }
 0x505   :  { %1249 = vrot.lane.b32.xlu0 %v1226_v6, %s7678_s20  ;;  %1247 = vrot.lane.b32.xlu2 %v1225_v61, %s7678_s20  ;;  %v4124_v6 = vld [vmem:[%s7584_s4 + $0x178] sm:$0xff] }
 0x506   :  { %1245 = vrot.lane.b32.xlu1 %v1224_v33, %s7678_s20  ;;  %v4123_v33 = vld [vmem:[%s7584_s4 + $0x170] sm:$0xff] }
 0x50d   :  { %1255 = vrot.lane.b32.xlu0 %v1229_v48, %s7678_s20  ;;  %1253 = vrot.lane.b32.xlu2 %v1228_v40, %s7678_s20 }
 0x50e   :  { %1251 = vrot.lane.b32.xlu1 %v1227_v4, %s7678_s20  ;;  %s8317_s20 = smov 60  }
 0x515   :  { %1292 = vperm.xlu0 %4262, %v4124_v6   ;;  %1287 = vperm.xlu2 %4263, %v4123_v33  }
 0x516   :  { %1282 = vperm.xlu1 %4264, %v4122_v41  }
 0x557   :  { %v5274_v61 = vpop.permute.xlu2 %1241 }
 0x558   :  { %7854 = vst [vmem:[#allocation104_spill] sm:$0xff] %v5274_v61 }
 0x55f   :  { %v5282_v4 = vpop.permute.xlu2 %1247 }
 0x560   :  { %7858 = vst [vmem:[#allocation108_spill] sm:$0xff] %v5282_v4 }
 0x567   :  { %v5288_v5 = vpop.permute.xlu2 %1253 }
 0x568   :  { %7861 = vst [vmem:[#allocation111_spill] sm:$0xff] %v5288_v5 }
 0x56f   :  { %v5278_v40 = vpop.permute.xlu0 %1243 }
 0x570   :  { %v5276_v39 = vpop.permute.xlu1 %1239  ;;  %7856 = vst [vmem:[#allocation106_spill] sm:$0xff] %v5278_v40 }
 0x571   :  { %7855 = vst [vmem:[#allocation105_spill] sm:$0xff] %v5276_v39 }
 0x577   :  { %v5286_v15 = vpop.permute.xlu0 %1249 }
 0x578   :  { %v5280_v48 = vpop.permute.xlu1 %1245  ;;  %7860 = vst [vmem:[#allocation110_spill] sm:$0xff] %v5286_v15 }
 0x579   :  { %7857 = vst [vmem:[#allocation107_spill] sm:$0xff] %v5280_v48 }
 0x57f   :  { %v5295_v48 = vpop.permute.xlu0 %1255 }
 0x580   :  { %v5284_v28 = vpop.permute.xlu1 %1251  ;;  %7862 = vst [vmem:[#allocation112_spill] sm:$0xff] %v5295_v48 }
 0x581   :  { %7859 = vst [vmem:[#allocation109_spill] sm:$0xff] %v5284_v28  ;;  %v1288_v28 = vpop.permute.xlu2 %1287 }
 0x582   :  { %v1299_v4 = vmul.f32 %v1288_v28, %v4801_v1  ;;  %v1300_v5 = vmul.f32 %v1288_v28, %v4797_v60  ;;  %v1298_v15 = vmul.f32 %v1288_v28, %v4776_v59  ;;  %v4125_v28 = vld [vmem:[%s7584_s4 + $0x180] sm:$0xff] }
 0x588   :  { %v1283_v35 = vpop.permute.xlu1 %1282 }
 0x589   :  { %v1295_v6 = vmul.f32 %v1283_v35, %v4776_v59  ;;  %v1296_v33 = vmul.f32 %v1283_v35, %v4801_v1  ;;  %v1297_v41 = vmul.f32 %v1283_v35, %v4797_v60  ;;  %v1293_v35 = vpop.permute.xlu0 %1292 }
 0x58b   :  { %1317 = vrot.lane.b32.xlu0 %v1297_v41, %s7674_s28  ;;  %1315 = vrot.lane.b32.xlu2 %v1296_v33, %s7674_s28  ;;  %v1302_v33 = vmul.f32 %v1293_v35, %v4801_v1  ;;  %v1303_v41 = vmul.f32 %v1293_v35, %v4797_v60 }
 0x58c   :  { %1313 = vrot.lane.b32.xlu1 %v1295_v6, %s7674_s28  ;;  %v1301_v6 = vmul.f32 %v1293_v35, %v4776_v59 }
 0x593   :  { %1323 = vrot.lane.b32.xlu0 %v1300_v5, %s7674_s28  ;;  %1321 = vrot.lane.b32.xlu2 %v1299_v4, %s7674_s28  ;;  %v4127_v5 = vld [vmem:[%s7584_s4 + $0x190] sm:$0xff] }
 0x594   :  { %1319 = vrot.lane.b32.xlu1 %v1298_v15, %s7674_s28  ;;  %v4126_v15 = vld [vmem:[%s7584_s4 + $0x188] sm:$0xff] }
 0x59b   :  { %1329 = vrot.lane.b32.xlu0 %v1303_v41, %s7674_s28  ;;  %1327 = vrot.lane.b32.xlu2 %v1302_v33, %s7674_s28 }
 0x59c   :  { %1325 = vrot.lane.b32.xlu1 %v1301_v6, %s7674_s28  ;;  %s8316_s28 = smov 61  }
 0x5a3   :  { %1366 = vperm.xlu0 %4262, %v4127_v5   ;;  %1361 = vperm.xlu2 %4263, %v4126_v15  }
 0x5a4   :  { %1356 = vperm.xlu1 %4264, %v4125_v28  }
 0x5e5   :  { %v5319_v4 = vpop.permute.xlu2 %1315 }
 0x5e6   :  { %7863 = vst [vmem:[#allocation113_spill] sm:$0xff] %v5319_v4 }
 0x5ed   :  { %v5327_v6 = vpop.permute.xlu2 %1321 }
 0x5ee   :  { %7867 = vst [vmem:[#allocation117_spill] sm:$0xff] %v5327_v6 }
 0x5f5   :  { %v5333_v61 = vpop.permute.xlu2 %1327 }
 0x5f6   :  { %7870 = vst [vmem:[#allocation120_spill] sm:$0xff] %v5333_v61 }
 0x5fd   :  { %v5323_v33 = vpop.permute.xlu0 %1317 }
 0x5fe   :  { %v5321_v35 = vpop.permute.xlu1 %1313  ;;  %7865 = vst [vmem:[#allocation115_spill] sm:$0xff] %v5323_v33 }
 0x5ff   :  { %7864 = vst [vmem:[#allocation114_spill] sm:$0xff] %v5321_v35 }
 0x605   :  { %v5331_v39 = vpop.permute.xlu0 %1323 }
 0x606   :  { %v5325_v41 = vpop.permute.xlu1 %1319  ;;  %7869 = vst [vmem:[#allocation119_spill] sm:$0xff] %v5331_v39 }
 0x607   :  { %7866 = vst [vmem:[#allocation116_spill] sm:$0xff] %v5325_v41 }
 0x60d   :  { %v5340_v41 = vpop.permute.xlu0 %1329 }
 0x60e   :  { %v5329_v48 = vpop.permute.xlu1 %1325  ;;  %7871 = vst [vmem:[#allocation121_spill] sm:$0xff] %v5340_v41 }
 0x60f   :  { %7868 = vst [vmem:[#allocation118_spill] sm:$0xff] %v5329_v48  ;;  %v1362_v48 = vpop.permute.xlu2 %1361 }
 0x610   :  { %v1373_v6 = vmul.f32 %v1362_v48, %v4644_v26  ;;  %v1374_v61 = vmul.f32 %v1362_v48, %v4640_v25  ;;  %v1372_v39 = vmul.f32 %v1362_v48, %v4621_v9  ;;  %v4128_v48 = vld [vmem:[%s7584_s4 + $0x198] sm:$0xff] }
 0x616   :  { %v1357_v40 = vpop.permute.xlu1 %1356 }
 0x617   :  { %v1369_v5 = vmul.f32 %v1357_v40, %v4621_v9  ;;  %v1370_v15 = vmul.f32 %v1357_v40, %v4644_v26  ;;  %v1371_v28 = vmul.f32 %v1357_v40, %v4640_v25  ;;  %v1367_v40 = vpop.permute.xlu0 %1366 }
 0x619   :  { %1391 = vrot.lane.b32.xlu0 %v1371_v28, %s7672_s26  ;;  %1389 = vrot.lane.b32.xlu2 %v1370_v15, %s7672_s26  ;;  %v1376_v15 = vmul.f32 %v1367_v40, %v4644_v26  ;;  %v1377_v28 = vmul.f32 %v1367_v40, %v4640_v25 }
 0x61a   :  { %1387 = vrot.lane.b32.xlu1 %v1369_v5, %s7672_s26  ;;  %v1375_v5 = vmul.f32 %v1367_v40, %v4621_v9 }
 0x621   :  { %1397 = vrot.lane.b32.xlu0 %v1374_v61, %s7672_s26  ;;  %1395 = vrot.lane.b32.xlu2 %v1373_v6, %s7672_s26  ;;  %v4130_v61 = vld [vmem:[%s7584_s4 + $0x1a8] sm:$0xff] }
 0x622   :  { %1393 = vrot.lane.b32.xlu1 %v1372_v39, %s7672_s26  ;;  %v4129_v39 = vld [vmem:[%s7584_s4 + $0x1a0] sm:$0xff] }
 0x629   :  { %1403 = vrot.lane.b32.xlu0 %v1377_v28, %s7672_s26  ;;  %1401 = vrot.lane.b32.xlu2 %v1376_v15, %s7672_s26 }
 0x62a   :  { %1399 = vrot.lane.b32.xlu1 %v1375_v5, %s7672_s26 }
 0x631   :  { %1440 = vperm.xlu0 %4262, %v4130_v61   ;;  %1435 = vperm.xlu2 %4263, %v4129_v39  }
 0x632   :  { %1430 = vperm.xlu1 %4264, %v4128_v48  }
 0x673   :  { %v5364_v6 = vpop.permute.xlu2 %1389 }
 0x674   :  { %7872 = vst [vmem:[#allocation122_spill] sm:$0xff] %v5364_v6 }
 0x67b   :  { %v5372_v5 = vpop.permute.xlu2 %1395 }
 0x67c   :  { %7876 = vst [vmem:[#allocation126_spill] sm:$0xff] %v5372_v5 }
 0x683   :  { %v5378_v4 = vpop.permute.xlu2 %1401 }
 0x684   :  { %7879 = vst [vmem:[#allocation129_spill] sm:$0xff] %v5378_v4 }
 0x68b   :  { %v5368_v15 = vpop.permute.xlu0 %1391 }
 0x68c   :  { %v5366_v40 = vpop.permute.xlu1 %1387  ;;  %7874 = vst [vmem:[#allocation124_spill] sm:$0xff] %v5368_v15 }
 0x68d   :  { %7873 = vst [vmem:[#allocation123_spill] sm:$0xff] %v5366_v40 }
 0x693   :  { %v5376_v35 = vpop.permute.xlu0 %1397 }
 0x694   :  { %v5370_v28 = vpop.permute.xlu1 %1393  ;;  %7878 = vst [vmem:[#allocation128_spill] sm:$0xff] %v5376_v35 }
 0x695   :  { %7875 = vst [vmem:[#allocation125_spill] sm:$0xff] %v5370_v28 }
 0x69b   :  { %v5385_v28 = vpop.permute.xlu0 %1403 }
 0x69c   :  { %v5374_v41 = vpop.permute.xlu1 %1399  ;;  %7880 = vst [vmem:[#allocation130_spill] sm:$0xff] %v5385_v28 }
 0x69d   :  { %7877 = vst [vmem:[#allocation127_spill] sm:$0xff] %v5374_v41  ;;  %v1436_v41 = vpop.permute.xlu2 %1435 }
 0x69e   :  { %v1447_v5 = vmul.f32 %v1436_v41, %v4570_v37  ;;  %v1448_v4 = vmul.f32 %v1436_v41, %v4573_v38  ;;  %v1446_v35 = vmul.f32 %v1436_v41, %v4561_v32  ;;  %v4131_v41 = vld [vmem:[%s7584_s4 + $0x1b0] sm:$0xff] }
 0x6a4   :  { %v1431_v33 = vpop.permute.xlu1 %1430 }
 0x6a5   :  { %v1443_v61 = vmul.f32 %v1431_v33, %v4561_v32  ;;  %v1444_v39 = vmul.f32 %v1431_v33, %v4570_v37  ;;  %v1445_v48 = vmul.f32 %v1431_v33, %v4573_v38  ;;  %v1441_v33 = vpop.permute.xlu0 %1440 }
 0x6a7   :  { %1465 = vrot.lane.b32.xlu0 %v1445_v48, %s7643_s0  ;;  %1463 = vrot.lane.b32.xlu2 %v1444_v39, %s7643_s0  ;;  %v1450_v39 = vmul.f32 %v1441_v33, %v4570_v37  ;;  %v1451_v48 = vmul.f32 %v1441_v33, %v4573_v38 }
 0x6a8   :  { %1461 = vrot.lane.b32.xlu1 %v1443_v61, %s7643_s0  ;;  %v1449_v61 = vmul.f32 %v1441_v33, %v4561_v32 }
 0x6af   :  { %1471 = vrot.lane.b32.xlu0 %v1448_v4, %s7643_s0  ;;  %1469 = vrot.lane.b32.xlu2 %v1447_v5, %s7643_s0  ;;  %v4133_v4 = vld [vmem:[%s7584_s4 + $0x1c0] sm:$0xff] }
 0x6b0   :  { %1467 = vrot.lane.b32.xlu1 %v1446_v35, %s7643_s0  ;;  %v4132_v35 = vld [vmem:[%s7584_s4 + $0x1b8] sm:$0xff] }
 0x6b7   :  { %1477 = vrot.lane.b32.xlu0 %v1451_v48, %s7643_s0  ;;  %1475 = vrot.lane.b32.xlu2 %v1450_v39, %s7643_s0 }
 0x6b8   :  { %1473 = vrot.lane.b32.xlu1 %v1449_v61, %s7643_s0  ;;  %s7653_s0 = smov 76  }
 0x6bf   :  { %1514 = vperm.xlu0 %4262, %v4133_v4   ;;  %1509 = vperm.xlu2 %4263, %v4132_v35  }
 0x6c0   :  { %1504 = vperm.xlu1 %4264, %v4131_v41  }
 0x701   :  { %v5409_v5 = vpop.permute.xlu2 %1463 }
 0x702   :  { %7881 = vst [vmem:[#allocation131_spill] sm:$0xff] %v5409_v5 }
 0x709   :  { %v5417_v61 = vpop.permute.xlu2 %1469 }
 0x70a   :  { %7885 = vst [vmem:[#allocation135_spill] sm:$0xff] %v5417_v61 }
 0x711   :  { %v5423_v6 = vpop.permute.xlu2 %1475 }
 0x712   :  { %7888 = vst [vmem:[#allocation138_spill] sm:$0xff] %v5423_v6 }
 0x719   :  { %v5413_v39 = vpop.permute.xlu0 %1465 }
 0x71a   :  { %v5411_v33 = vpop.permute.xlu1 %1461  ;;  %7883 = vst [vmem:[#allocation133_spill] sm:$0xff] %v5413_v39 }
 0x71b   :  { %7882 = vst [vmem:[#allocation132_spill] sm:$0xff] %v5411_v33 }
 0x721   :  { %v5421_v40 = vpop.permute.xlu0 %1471 }
 0x722   :  { %v5415_v48 = vpop.permute.xlu1 %1467  ;;  %7887 = vst [vmem:[#allocation137_spill] sm:$0xff] %v5421_v40 }
 0x723   :  { %7884 = vst [vmem:[#allocation134_spill] sm:$0xff] %v5415_v48 }
 0x729   :  { %v5430_v48 = vpop.permute.xlu0 %1477 }
 0x72a   :  { %v5419_v28 = vpop.permute.xlu1 %1473  ;;  %7889 = vst [vmem:[#allocation139_spill] sm:$0xff] %v5430_v48 }
 0x72b   :  { %7886 = vst [vmem:[#allocation136_spill] sm:$0xff] %v5419_v28  ;;  %v1510_v28 = vpop.permute.xlu2 %1509 }
 0x72c   :  { %v1521_v61 = vmul.f32 %v1510_v28, %v4695_v53  ;;  %v1522_v6 = vmul.f32 %v1510_v28, %v4691_v52  ;;  %v1520_v40 = vmul.f32 %v1510_v28, %v4670_v42  ;;  %v4134_v28 = vld [vmem:[%s7584_s4 + $0x1c8] sm:$0xff] }
 0x732   :  { %v1505_v15 = vpop.permute.xlu1 %1504 }
 0x733   :  { %v1517_v4 = vmul.f32 %v1505_v15, %v4670_v42  ;;  %v1518_v35 = vmul.f32 %v1505_v15, %v4695_v53  ;;  %v1519_v41 = vmul.f32 %v1505_v15, %v4691_v52  ;;  %v1515_v15 = vpop.permute.xlu0 %1514 }
 0x735   :  { %1539 = vrot.lane.b32.xlu0 %v1519_v41, %s7648_s27  ;;  %1537 = vrot.lane.b32.xlu2 %v1518_v35, %s7648_s27  ;;  %v1524_v35 = vmul.f32 %v1515_v15, %v4695_v53  ;;  %v1525_v41 = vmul.f32 %v1515_v15, %v4691_v52 }
 0x736   :  { %1535 = vrot.lane.b32.xlu1 %v1517_v4, %s7648_s27  ;;  %v1523_v4 = vmul.f32 %v1515_v15, %v4670_v42 }
 0x73d   :  { %1545 = vrot.lane.b32.xlu0 %v1522_v6, %s7648_s27  ;;  %1543 = vrot.lane.b32.xlu2 %v1521_v61, %s7648_s27  ;;  %v4136_v6 = vld [vmem:[%s7584_s4 + $0x1d8] sm:$0xff] }
 0x73e   :  { %1541 = vrot.lane.b32.xlu1 %v1520_v40, %s7648_s27  ;;  %v4135_v40 = vld [vmem:[%s7584_s4 + $0x1d0] sm:$0xff] }
 0x745   :  { %1551 = vrot.lane.b32.xlu0 %v1525_v41, %s7648_s27  ;;  %1549 = vrot.lane.b32.xlu2 %v1524_v35, %s7648_s27 }
 0x746   :  { %1547 = vrot.lane.b32.xlu1 %v1523_v4, %s7648_s27  ;;  %s7658_s27 = smov 64  }
 0x74d   :  { %1588 = vperm.xlu0 %4262, %v4136_v6   ;;  %1583 = vperm.xlu2 %4263, %v4135_v40  }
 0x74e   :  { %1578 = vperm.xlu1 %4264, %v4134_v28  }
 0x78f   :  { %v5454_v61 = vpop.permute.xlu2 %1537 }
 0x790   :  { %7890 = vst [vmem:[#allocation140_spill] sm:$0xff] %v5454_v61 }
 0x797   :  { %v5462_v4 = vpop.permute.xlu2 %1543 }
 0x798   :  { %7894 = vst [vmem:[#allocation144_spill] sm:$0xff] %v5462_v4 }
 0x79f   :  { %v5468_v5 = vpop.permute.xlu2 %1549 }
 0x7a0   :  { %7897 = vst [vmem:[#allocation147_spill] sm:$0xff] %v5468_v5 }
 0x7a7   :  { %v5458_v35 = vpop.permute.xlu0 %1539 }
 0x7a8   :  { %v5456_v15 = vpop.permute.xlu1 %1535  ;;  %7892 = vst [vmem:[#allocation142_spill] sm:$0xff] %v5458_v35 }
 0x7a9   :  { %7891 = vst [vmem:[#allocation141_spill] sm:$0xff] %v5456_v15 }
 0x7af   :  { %v5466_v33 = vpop.permute.xlu0 %1545 }
 0x7b0   :  { %v5460_v41 = vpop.permute.xlu1 %1541  ;;  %7896 = vst [vmem:[#allocation146_spill] sm:$0xff] %v5466_v33 }
 0x7b1   :  { %7893 = vst [vmem:[#allocation143_spill] sm:$0xff] %v5460_v41 }
 0x7b7   :  { %v5475_v41 = vpop.permute.xlu0 %1551 }
 0x7b8   :  { %v5464_v48 = vpop.permute.xlu1 %1547  ;;  %7898 = vst [vmem:[#allocation148_spill] sm:$0xff] %v5475_v41 }
 0x7b9   :  { %7895 = vst [vmem:[#allocation145_spill] sm:$0xff] %v5464_v48  ;;  %v1584_v48 = vpop.permute.xlu2 %1583 }
 0x7ba   :  { %v1595_v4 = vmul.f32 %v1584_v48, %v4748_v23  ;;  %v1596_v5 = vmul.f32 %v1584_v48, %v4744_v21  ;;  %v1594_v33 = vmul.f32 %v1584_v48, %v4721_v11  ;;  %v4137_v48 = vld [vmem:[%s7584_s4 + $0x1e0] sm:$0xff] }
 0x7c0   :  { %v1579_v39 = vpop.permute.xlu1 %1578 }
 0x7c1   :  { %v1591_v6 = vmul.f32 %v1579_v39, %v4721_v11  ;;  %v1592_v40 = vmul.f32 %v1579_v39, %v4748_v23  ;;  %v1593_v28 = vmul.f32 %v1579_v39, %v4744_v21  ;;  %v1589_v39 = vpop.permute.xlu0 %1588 }
 0x7c3   :  { %1613 = vrot.lane.b32.xlu0 %v1593_v28, %s7653_s0  ;;  %1611 = vrot.lane.b32.xlu2 %v1592_v40, %s7653_s0  ;;  %v1598_v40 = vmul.f32 %v1589_v39, %v4748_v23  ;;  %v1599_v28 = vmul.f32 %v1589_v39, %v4744_v21 }
 0x7c4   :  { %1609 = vrot.lane.b32.xlu1 %v1591_v6, %s7653_s0  ;;  %v1597_v6 = vmul.f32 %v1589_v39, %v4721_v11 }
 0x7cb   :  { %1619 = vrot.lane.b32.xlu0 %v1596_v5, %s7653_s0  ;;  %1617 = vrot.lane.b32.xlu2 %v1595_v4, %s7653_s0  ;;  %v4139_v5 = vld [vmem:[%s7584_s4 + $0x1f0] sm:$0xff] }
 0x7cc   :  { %1615 = vrot.lane.b32.xlu1 %v1594_v33, %s7653_s0  ;;  %v4138_v33 = vld [vmem:[%s7584_s4 + $0x1e8] sm:$0xff] }
 0x7d3   :  { %1625 = vrot.lane.b32.xlu0 %v1599_v28, %s7653_s0  ;;  %1623 = vrot.lane.b32.xlu2 %v1598_v40, %s7653_s0 }
 0x7d4   :  { %1621 = vrot.lane.b32.xlu1 %v1597_v6, %s7653_s0  ;;  %s7662_s0 = smov 63  }
 0x7db   :  { %1662 = vperm.xlu0 %4262, %v4139_v5   ;;  %1657 = vperm.xlu2 %4263, %v4138_v33  }
 0x7dc   :  { %1652 = vperm.xlu1 %4264, %v4137_v48  }
 0x81d   :  { %v5499_v4 = vpop.permute.xlu2 %1611 }
 0x81e   :  { %7899 = vst [vmem:[#allocation149_spill] sm:$0xff] %v5499_v4 }
 0x825   :  { %v5507_v6 = vpop.permute.xlu2 %1617 }
 0x826   :  { %7902 = vst [vmem:[#allocation152_spill] sm:$0xff] %v5507_v6 }
 0x82d   :  { %v5513_v61 = vpop.permute.xlu2 %1623 }
 0x82e   :  { %7905 = vst [vmem:[#allocation155_spill] sm:$0xff] %v5513_v61 }
 0x835   :  { %v5503_v40 = vpop.permute.xlu0 %1613 }
 0x836   :  { %v5501_v39 = vpop.permute.xlu1 %1609 }
 0x837   :  { %7900 = vst [vmem:[#allocation150_spill] sm:$0xff] %v5501_v39 }
 0x83d   :  { %v5511_v15 = vpop.permute.xlu0 %1619 }
 0x83e   :  { %v5505_v28 = vpop.permute.xlu1 %1615  ;;  %7904 = vst [vmem:[#allocation154_spill] sm:$0xff] %v5511_v15 }
 0x83f   :  { %7901 = vst [vmem:[#allocation151_spill] sm:$0xff] %v5505_v28 }
 0x845   :  { %v5520_v28 = vpop.permute.xlu0 %1625 }
 0x846   :  { %v5509_v41 = vpop.permute.xlu1 %1621  ;;  %7906 = vst [vmem:[#allocation156_spill] sm:$0xff] %v5520_v28 }
 0x847   :  { %7903 = vst [vmem:[#allocation153_spill] sm:$0xff] %v5509_v41  ;;  %v1658_v41 = vpop.permute.xlu2 %1657 }
 0x848   :  { %v1669_v6 = vmul.f32 %v1658_v41, %v4801_v1  ;;  %v1670_v61 = vmul.f32 %v1658_v41, %v4797_v60  ;;  %v1668_v15 = vmul.f32 %v1658_v41, %v4776_v59 }
 0x84e   :  { %v1653_v35 = vpop.permute.xlu1 %1652 }
 0x84f   :  { %v1665_v5 = vmul.f32 %v1653_v35, %v4776_v59  ;;  %v1666_v33 = vmul.f32 %v1653_v35, %v4801_v1  ;;  %v1667_v48 = vmul.f32 %v1653_v35, %v4797_v60  ;;  %v1663_v35 = vpop.permute.xlu0 %1662 }
 0x851   :  { %1687 = vrot.lane.b32.xlu0 %v1667_v48, %s7658_s27  ;;  %1685 = vrot.lane.b32.xlu2 %v1666_v33, %s7658_s27  ;;  %v1672_v33 = vmul.f32 %v1663_v35, %v4801_v1  ;;  %v1673_v48 = vmul.f32 %v1663_v35, %v4797_v60  ;;  %v4140_v60 = vld [vmem:[%s7584_s4 + $0x1f8] sm:$0xff] }
 0x852   :  { %1683 = vrot.lane.b32.xlu1 %v1665_v5, %s7658_s27  ;;  %v1671_v5 = vmul.f32 %v1663_v35, %v4776_v59 }
 0x859   :  { %1693 = vrot.lane.b32.xlu0 %v1670_v61, %s7658_s27  ;;  %1691 = vrot.lane.b32.xlu2 %v1669_v6, %s7658_s27  ;;  %v4142_v61 = vld [vmem:[%s7584_s4 + $0x208] sm:$0xff] }
 0x85a   :  { %1689 = vrot.lane.b32.xlu1 %v1668_v15, %s7658_s27  ;;  %v4141_v15 = vld [vmem:[%s7584_s4 + $0x200] sm:$0xff] }
 0x861   :  { %1699 = vrot.lane.b32.xlu0 %v1673_v48, %s7658_s27  ;;  %1697 = vrot.lane.b32.xlu2 %v1672_v33, %s7658_s27 }
 0x862   :  { %1695 = vrot.lane.b32.xlu1 %v1671_v5, %s7658_s27  ;;  %s7666_s27 = smov 62  }
 0x869   :  { %1736 = vperm.xlu0 %4262, %v4142_v61   ;;  %1731 = vperm.xlu2 %4263, %v4141_v15  }
 0x86a   :  { %1726 = vperm.xlu1 %4264, %v4140_v60  }
 0x8ab   :  { %v5544_v41 = vpop.permute.xlu2 %1685 }
 0x8b3   :  { %v5552_v48 = vpop.permute.xlu2 %1691 }
 0x8b4   :  { %7908 = vst [vmem:[#allocation158_spill] sm:$0xff] %v5552_v48 }
 0x8bb   :  { %v5558_v39 = vpop.permute.xlu2 %1697 }
 0x8bc   :  { %7911 = vst [vmem:[#allocation161_spill] sm:$0xff] %v5558_v39 }
 0x8c3   :  { %v5548_v35 = vpop.permute.xlu0 %1687 }
 0x8c4   :  { %v5546_v6 = vpop.permute.xlu1 %1683 }
 0x8cb   :  { %v5556_v28 = vpop.permute.xlu0 %1693 }
 0x8cc   :  { %v5550_v33 = vpop.permute.xlu1 %1689  ;;  %7910 = vst [vmem:[#allocation160_spill] sm:$0xff] %v5556_v28 }
 0x8cd   :  { %7907 = vst [vmem:[#allocation157_spill] sm:$0xff] %v5550_v33 }
 0x8d3   :  { %v5565_v33 = vpop.permute.xlu0 %1699 }
 0x8d4   :  { %v5554_v5 = vpop.permute.xlu1 %1695  ;;  %7912 = vst [vmem:[#allocation162_spill] sm:$0xff] %v5565_v33 }
 0x8d5   :  { %7909 = vst [vmem:[#allocation159_spill] sm:$0xff] %v5554_v5  ;;  %v1732_v5 = vpop.permute.xlu2 %1731 }
 0x8d6   :  { %v1743_v48 = vmul.f32 %v1732_v5, %v4644_v26  ;;  %v1744_v39 = vmul.f32 %v1732_v5, %v4640_v25  ;;  %v1742_v28 = vmul.f32 %v1732_v5, %v4621_v9 }
 0x8dc   :  { %v1727_v4 = vpop.permute.xlu1 %1726 }
 0x8dd   :  { %v1739_v61 = vmul.f32 %v1727_v4, %v4621_v9  ;;  %v1740_v15 = vmul.f32 %v1727_v4, %v4644_v26  ;;  %v1741_v60 = vmul.f32 %v1727_v4, %v4640_v25  ;;  %v1737_v4 = vpop.permute.xlu0 %1736 }
 0x8df   :  { %1761 = vrot.lane.b32.xlu0 %v1741_v60, %s7662_s0  ;;  %1759 = vrot.lane.b32.xlu2 %v1740_v15, %s7662_s0  ;;  %v1746_v15 = vmul.f32 %v1737_v4, %v4644_v26  ;;  %v1747_v60 = vmul.f32 %v1737_v4, %v4640_v25  ;;  %v4143_v25 = vld [vmem:[%s7584_s4 + $0x210] sm:$0xff] }
 0x8e0   :  { %1757 = vrot.lane.b32.xlu1 %v1739_v61, %s7662_s0  ;;  %v1745_v61 = vmul.f32 %v1737_v4, %v4621_v9 }
 0x8e7   :  { %1767 = vrot.lane.b32.xlu0 %v1744_v39, %s7662_s0  ;;  %1765 = vrot.lane.b32.xlu2 %v1743_v48, %s7662_s0  ;;  %v4145_v39 = vld [vmem:[%s7584_s4 + $0x220] sm:$0xff] }
 0x8e8   :  { %1763 = vrot.lane.b32.xlu1 %v1742_v28, %s7662_s0  ;;  %v4144_v28 = vld [vmem:[%s7584_s4 + $0x218] sm:$0xff] }
 0x8ef   :  { %1773 = vrot.lane.b32.xlu0 %v1747_v60, %s7662_s0  ;;  %1771 = vrot.lane.b32.xlu2 %v1746_v15, %s7662_s0 }
 0x8f0   :  { %1769 = vrot.lane.b32.xlu1 %v1745_v61, %s7662_s0  ;;  %s7670_s0 = smov 61  }
 0x8f7   :  { %1810 = vperm.xlu0 %4262, %v4145_v39   ;;  %1805 = vperm.xlu2 %4263, %v4144_v28  }
 0x8f8   :  { %1800 = vperm.xlu1 %4264, %v4143_v25  }
 0x939   :  { %v5589_v9 = vpop.permute.xlu2 %1759 }
 0x941   :  { %v5597_v4 = vpop.permute.xlu2 %1765 }
 0x942   :  { %7914 = vst [vmem:[#allocation164_spill] sm:$0xff] %v5597_v4 }
 0x949   :  { %v5603_v61 = vpop.permute.xlu2 %1771 }
 0x94a   :  { %7917 = vst [vmem:[#allocation167_spill] sm:$0xff] %v5603_v61 }
 0x951   :  { %v5593_v48 = vpop.permute.xlu0 %1761 }
 0x952   :  { %v5591_v26 = vpop.permute.xlu1 %1757 }
 0x959   :  { %v5601_v60 = vpop.permute.xlu0 %1767 }
 0x95a   :  { %v5595_v5 = vpop.permute.xlu1 %1763  ;;  %7916 = vst [vmem:[#allocation166_spill] sm:$0xff] %v5601_v60 }
 0x95b   :  { %7913 = vst [vmem:[#allocation163_spill] sm:$0xff] %v5595_v5 }
 0x961   :  { %v5610_v5 = vpop.permute.xlu0 %1773 }
 0x962   :  { %v5599_v15 = vpop.permute.xlu1 %1769  ;;  %7918 = vst [vmem:[#allocation168_spill] sm:$0xff] %v5610_v5 }
 0x963   :  { %7915 = vst [vmem:[#allocation165_spill] sm:$0xff] %v5599_v15  ;;  %v1806_v15 = vpop.permute.xlu2 %1805 }
 0x964   :  { %v1817_v4 = vmul.f32 %v1806_v15, %v4570_v37  ;;  %v1818_v61 = vmul.f32 %v1806_v15, %v4573_v38  ;;  %v1816_v60 = vmul.f32 %v1806_v15, %v4561_v32  ;;  %v4148_v15 = vld [vmem:[%s7584_s4 + $0x238] sm:$0xff] }
 0x96a   :  { %v1801_v33 = vpop.permute.xlu1 %1800 }
 0x96b   :  { %v1813_v39 = vmul.f32 %v1801_v33, %v4561_v32  ;;  %v1814_v28 = vmul.f32 %v1801_v33, %v4570_v37  ;;  %v1815_v25 = vmul.f32 %v1801_v33, %v4573_v38  ;;  %v1811_v33 = vpop.permute.xlu0 %1810 }
 0x96d   :  { %1835 = vrot.lane.b32.xlu0 %v1815_v25, %s7666_s27  ;;  %1833 = vrot.lane.b32.xlu2 %v1814_v28, %s7666_s27  ;;  %v1820_v28 = vmul.f32 %v1811_v33, %v4570_v37  ;;  %v1821_v25 = vmul.f32 %v1811_v33, %v4573_v38  ;;  %v4146_v37 = vld [vmem:[%s7584_s4 + $0x228] sm:$0xff] }
 0x96e   :  { %1831 = vrot.lane.b32.xlu1 %v1813_v39, %s7666_s27  ;;  %v1819_v39 = vmul.f32 %v1811_v33, %v4561_v32 }
 0x975   :  { %1841 = vrot.lane.b32.xlu0 %v1818_v61, %s7666_s27  ;;  %1839 = vrot.lane.b32.xlu2 %v1817_v4, %s7666_s27  ;;  %v4147_v4 = vld [vmem:[%s7584_s4 + $0x230] sm:$0xff] }
 0x976   :  { %1837 = vrot.lane.b32.xlu1 %v1816_v60, %s7666_s27 }
 0x97d   :  { %1847 = vrot.lane.b32.xlu0 %v1821_v25, %s7666_s27  ;;  %1845 = vrot.lane.b32.xlu2 %v1820_v28, %s7666_s27 }
 0x97e   :  { %1843 = vrot.lane.b32.xlu1 %v1819_v39, %s7666_s27  ;;  %s7676_s27 = smov 60  }
 0x985   :  { %1884 = vperm.xlu0 %4262, %v4148_v15   ;;  %1879 = vperm.xlu2 %4263, %v4147_v4  }
 0x986   :  { %1874 = vperm.xlu1 %4264, %v4146_v37  }
 0x9c7   :  { %v5634_v32 = vpop.permute.xlu2 %1833 }
 0x9cf   :  { %v5642_v33 = vpop.permute.xlu2 %1839 }
 0x9d0   :  { %7920 = vst [vmem:[#allocation170_spill] sm:$0xff] %v5642_v33 }
 0x9d7   :  { %v5648_v39 = vpop.permute.xlu2 %1845 }
 0x9d8   :  { %7923 = vst [vmem:[#allocation173_spill] sm:$0xff] %v5648_v39 }
 0x9df   :  { %v5638_v60 = vpop.permute.xlu0 %1835 }
 0x9e0   :  { %v5636_v38 = vpop.permute.xlu1 %1831 }
 0x9e7   :  { %v5646_v25 = vpop.permute.xlu0 %1841 }
 0x9e8   :  { %v5640_v61 = vpop.permute.xlu1 %1837  ;;  %7922 = vst [vmem:[#allocation172_spill] sm:$0xff] %v5646_v25 }
 0x9e9   :  { %7919 = vst [vmem:[#allocation169_spill] sm:$0xff] %v5640_v61 }
 0x9ef   :  { %v5655_v61 = vpop.permute.xlu0 %1847 }
 0x9f0   :  { %v5644_v28 = vpop.permute.xlu1 %1843  ;;  %7924 = vst [vmem:[#allocation174_spill] sm:$0xff] %v5655_v61 }
 0x9f1   :  { %7921 = vst [vmem:[#allocation171_spill] sm:$0xff] %v5644_v28  ;;  %v1880_v28 = vpop.permute.xlu2 %1879 }
 0x9f2   :  { %v1891_v33 = vmul.f32 %v1880_v28, %v4695_v53  ;;  %v1892_v39 = vmul.f32 %v1880_v28, %v4691_v52  ;;  %v1890_v25 = vmul.f32 %v1880_v28, %v4670_v42  ;;  %v4151_v28 = vld [vmem:[%s7584_s4 + $0x250] sm:$0xff] }
 0x9f8   :  { %v1875_v5 = vpop.permute.xlu1 %1874 }
 0x9f9   :  { %v1887_v15 = vmul.f32 %v1875_v5, %v4670_v42  ;;  %v1888_v4 = vmul.f32 %v1875_v5, %v4695_v53  ;;  %v1889_v37 = vmul.f32 %v1875_v5, %v4691_v52  ;;  %v1885_v5 = vpop.permute.xlu0 %1884 }
 0x9fb   :  { %1909 = vrot.lane.b32.xlu0 %v1889_v37, %s7670_s0  ;;  %1907 = vrot.lane.b32.xlu2 %v1888_v4, %s7670_s0  ;;  %v1894_v4 = vmul.f32 %v1885_v5, %v4695_v53  ;;  %v1895_v37 = vmul.f32 %v1885_v5, %v4691_v52  ;;  %v4149_v52 = vld [vmem:[%s7584_s4 + $0x240] sm:$0xff] }
 0x9fc   :  { %1905 = vrot.lane.b32.xlu1 %v1887_v15, %s7670_s0  ;;  %v1893_v15 = vmul.f32 %v1885_v5, %v4670_v42 }
 0xa03   :  { %1915 = vrot.lane.b32.xlu0 %v1892_v39, %s7670_s0  ;;  %1913 = vrot.lane.b32.xlu2 %v1891_v33, %s7670_s0  ;;  %v4150_v33 = vld [vmem:[%s7584_s4 + $0x248] sm:$0xff] }
 0xa04   :  { %1911 = vrot.lane.b32.xlu1 %v1890_v25, %s7670_s0 }
 0xa0b   :  { %1921 = vrot.lane.b32.xlu0 %v1895_v37, %s7670_s0  ;;  %1919 = vrot.lane.b32.xlu2 %v1894_v4, %s7670_s0 }
 0xa0c   :  { %1917 = vrot.lane.b32.xlu1 %v1893_v15, %s7670_s0 }
 0xa13   :  { %1958 = vperm.xlu0 %4262, %v4151_v28   ;;  %1953 = vperm.xlu2 %4263, %v4150_v33  }
 0xa14   :  { %1948 = vperm.xlu1 %4264, %v4149_v52  }
 0xa55   :  { %v5679_v42 = vpop.permute.xlu2 %1907 }
 0xa56   :  { %7925 = vst [vmem:[#allocation175_spill] sm:$0xff] %v5679_v42 }
 0xa5d   :  { %v5687_v5 = vpop.permute.xlu2 %1913 }
 0xa65   :  { %v5693_v15 = vpop.permute.xlu2 %1919 }
 0xa66   :  { %7929 = vst [vmem:[#allocation179_spill] sm:$0xff] %v5693_v15 }
 0xa6d   :  { %v5683_v25 = vpop.permute.xlu0 %1909  ;;  %v1954_v42 = vpop.permute.xlu2 %1953 }
 0xa6e   :  { %v5681_v53 = vpop.permute.xlu1 %1905  ;;  %7927 = vst [vmem:[#allocation177_spill] sm:$0xff] %v5683_v25  ;;  %v1965_v25 = vmul.f32 %v1954_v42, %v4748_v23  ;;  %v1964_v15 = vmul.f32 %v1954_v42, %v4721_v11 }
 0xa6f   :  { %7926 = vst [vmem:[#allocation176_spill] sm:$0xff] %v5681_v53 }
 0xa75   :  { %v5691_v37 = vpop.permute.xlu0 %1915 }
 0xa76   :  { %v5685_v39 = vpop.permute.xlu1 %1911 }
 0xa7d   :  { %v5700_v53 = vpop.permute.xlu0 %1921 }
 0xa7e   :  { %v5689_v4 = vpop.permute.xlu1 %1917 }
 0xa7f   :  { %7928 = vst [vmem:[#allocation178_spill] sm:$0xff] %v5689_v4  ;;  %v1966_v4 = vmul.f32 %v1954_v42, %v4744_v21  ;;  %v122_v42 = vld [vmem:[%s7585_s5 + $0x10] sm:$0xff] }
 0xa86   :  { %v1949_v61 = vpop.permute.xlu1 %1948 }
 0xa87   :  { %v1961_v28 = vmul.f32 %v1949_v61, %v4721_v11  ;;  %v1962_v33 = vmul.f32 %v1949_v61, %v4748_v23  ;;  %v1963_v52 = vmul.f32 %v1949_v61, %v4744_v21  ;;  %v1959_v61 = vpop.permute.xlu0 %1958 }
 0xa89   :  { %1983 = vrot.lane.b32.xlu0 %v1963_v52, %s7676_s27  ;;  %1981 = vrot.lane.b32.xlu2 %v1962_v33, %s7676_s27  ;;  %v1968_v33 = vmul.f32 %v1959_v61, %v4748_v23  ;;  %v1969_v52 = vmul.f32 %v1959_v61, %v4744_v21  ;;  %v120_v21 = vld [vmem:[%s7585_s5] sm:$0xff]  ;;  %v124_v23 = vld [vmem:[%s7586_s6 + $0x8] sm:$0xff] }
 0xa8a   :  { %1979 = vrot.lane.b32.xlu1 %v1961_v28, %s7676_s27  ;;  %v1967_v28 = vmul.f32 %v1959_v61, %v4721_v11  ;;  %v125_v11 = vld [vmem:[%s7586_s6 + $0x10] sm:$0xff] }
 0xa91   :  { %1989 = vrot.lane.b32.xlu0 %v1966_v4, %s7676_s27  ;;  %1987 = vrot.lane.b32.xlu2 %v1965_v25, %s7676_s27  ;;  %v121_v25 = vld [vmem:[%s7585_s5 + $0x8] sm:$0xff]  ;;  %v2179_v4 = vmul.f32 %v4513_v55, %v4503_v43  ;;  %v2180_v55 = vmul.f32 %v4515_v56, %v4503_v43  ;;  %v4159_v43 = vld [vmem:[%s7584_s4 + $0x20] sm:$0xff]  ;;  %s8268_s5 = smov 80  }
 0xa92   :  { %1985 = vrot.lane.b32.xlu1 %v1964_v15, %s7676_s27  ;;  %v123_v15 = vld [vmem:[%s7586_s6] sm:$0xff]  ;;  %v2211_v56 = vld [vmem:[%s7584_s4 + $0x10] sm:$0xff] }
 0xa93   :  { %v2181_v61 = vadd.f32 %v2179_v4, %v4506_v47  ;;  %v296_v4 = vsel %vm295_vm4, %v4876_v34, %v4848_v30  ;;  %v300_v34 = vsel %vm295_vm4, %v4904_v22, %v4878_v49  ;;  %v233_v22 = vmul.f32 %v4536_v16, %v4801_v1 }
 0xa99   :  { %1995 = vrot.lane.b32.xlu0 %v1969_v52, %s7676_s27  ;;  %1993 = vrot.lane.b32.xlu2 %v1968_v33, %s7676_s27  ;;  %v127_v33 = vld [vmem:[%s7589_s9] sm:$0xff]  ;;  %v2183_v52 = vmax.f32 %v2181_v61, 0.0  ;;  %v230_v61 = vmul.f32 %v4528_v8, %v4776_v59  ;;  %s4336_s9 = smov 256  }
 0xa9a   :  { %1991 = vrot.lane.b32.xlu1 %v1967_v28, %s7676_s27  ;;  %v126_v28 = vld [vmem:[%s7588_s8] sm:$0xff]  ;;  %s8291_s8 = smov 78   ;;  %s4051_s27 = sshll.u32 %s7590_s10, 4  ;;  %s4052_s27 = int_to_ptr.hbm [resolvable:$true] %s4051_s27 }
 0xaa1   :  { %2028 = vperm.xlu0 %4262, %v122_v42   ;;  %2023 = vperm.xlu2 %4263, %v121_v25   ;;  %v2182_v42 = vadd.f32 %v2180_v55, %v4506_v47  ;;  %v2210_v25 = vld [vmem:[%s7584_s4 + $0x8] sm:$0xff]  ;;  %v4158_v47 = vld [vmem:[%s7584_s4 + $0x18] sm:$0xff]  ;;  %v299_v55 = vsel %vm295_vm4, %v4863_v24, %v4906_v27 }
 0xaa2   :  { %2018 = vperm.xlu1 %4264, %v120_v21   ;;  %v2209_v21 = vld [vmem:[%s7584_s4] sm:$0xff] }
 0xaa9   :  { %2049 = vperm.xlu0 %4262, %v125_v11   ;;  %2044 = vperm.xlu2 %4263, %v124_v23   ;;  %v2184_v11 = vmax.f32 %v2182_v42, 0.0  ;;  %v4160_v23 = vld [vmem:[%s7584_s4 + $0x28] sm:$0xff] }
 0xaaa   :  { %2039 = vperm.xlu1 %4264, %v123_v15   ;;  %v228_v15 = vmul.f32 %v4523_v0, %v4776_v59 }
 0xaac   :  { %v308_v42 = vadd.f32 %v296_v4, %v228_v15  ;;  %v7931_v4 = vld [vmem:[#allocation28_spill] sm:$0xff]  ;;  %v7933_v15 = vld [vmem:[#allocation30_spill] sm:$0xff] }
 0xab1   :  { %2187 = vrot.lane.b32.xlu0 %v2183_v52, %s4309_s30  ;;  %2113 = vperm.xlu2 %4263, %v127_v33   ;;  %v298_v33 = vsel %vm295_vm4, %v4889_v63, %v4863_v24  ;;  %v297_v52 = vsel %vm295_vm4, %v4848_v30, %v4891_v44  ;;  %v232_v63 = vmul.f32 %v4536_v16, %v4776_v59 }
 0xab2   :  { %2106 = vperm.xlu1 %4264, %v126_v28   ;;  %v229_v28 = vmul.f32 %v4523_v0, %v4801_v1  ;;  %v231_v30 = vmul.f32 %v4528_v8, %v4801_v1  ;;  %v301_v44 = vsel %vm295_vm4, %v4878_v49, %v4921_v7  ;;  %v310_v0 = vadd.f32 %v298_v33, %v230_v61 }
 0xab3   :  { %v370_v24 = vsel %vm369_vm5, %v4778_v45, %v4750_v18  ;;  %v312_v27 = vadd.f32 %v300_v34, %v232_v63  ;;  %v371_v8 = vsel %vm369_vm5, %v4750_v18, %v4791_v57  ;;  %v372_v59 = vsel %vm369_vm5, %v4793_v58, %v4761_v31  ;;  %v7937_v63 = vld [vmem:[#allocation34_spill] sm:$0xff] }
 0xab4   :  { %v373_v49 = vsel %vm369_vm5, %v4761_v31, %v4814_v10  ;;  %v313_v7 = vadd.f32 %v301_v44, %v233_v22  ;;  %v374_v16 = vsel %vm369_vm5, %v4816_v12, %v4780_v19  ;;  %v375_v45 = vsel %vm369_vm5, %v4780_v19, %v4829_v36 }
 0xab5   :  { %v382_v1 = vadd.f32 %v370_v24, %v308_v42  ;;  %v444_v18 = vsel %vm443_vm6, %v4919_v13, %v4893_v17  ;;  %v384_v57 = vadd.f32 %v372_v59, %v310_v0  ;;  %v446_v58 = vsel %vm443_vm6, %v4934_v2, %v4908_v50  ;;  %v7938_v0 = vld [vmem:[#allocation32_spill] sm:$0xff]  ;;  %v7940_v24 = vld [vmem:[#allocation37_spill] sm:$0xff]  ;;  %v7942_v59 = vld [vmem:[#allocation38_spill] sm:$0xff] }
 0xab6   :  { %v445_v10 = vsel %vm443_vm6, %v4893_v17, %v4936_v14  ;;  %v386_v12 = vadd.f32 %v374_v16, %v312_v27  ;;  %v448_v19 = vsel %vm443_vm6, %v4946_v46, %v4923_v54  ;;  %v447_v13 = vsel %vm443_vm6, %v4908_v50, %v4948_v51  ;;  %v7930_v14 = vld [vmem:[#allocation27_spill] sm:$0xff]  ;;  %v7932_v51 = vld [vmem:[#allocation26_spill] sm:$0xff]  ;;  %v7944_v16 = vld [vmem:[#allocation41_spill] sm:$0xff] }
 0xab7   :  { %v458_v2 = vadd.f32 %v446_v58, %v384_v57  ;;  %v449_v17 = vsel %vm443_vm6, %v4923_v54, %v4954_v20  ;;  %v520_v46 = vsel %vm517_vm7, %v7930_v14, %v4950_v62  ;;  %v519_v50 = vsel %vm517_vm7, %v4938_v29, %v7931_v4  ;;  %v7935_v20 = vld [vmem:[#allocation29_spill] sm:$0xff]  ;;  %v7946_v58 = vld [vmem:[#allocation42_spill] sm:$0xff]  ;;  %v7953_v4 = vld [vmem:[#allocation51_spill] sm:$0xff] }
 0xab8   :  { %v522_v61 = vsel %vm517_vm7, %v7933_v15, %v7932_v51  ;;  %v7936_v54 = vld [vmem:[#allocation33_spill] sm:$0xff] }
 0xab9   :  { %2219 = vperm.xlu0 %4262, %v2210_v25   ;;  %2214 = vperm.xlu2 %4263, %v2209_v21   ;;  %v309_v25 = vadd.f32 %v297_v52, %v229_v28  ;;  %v311_v21 = vadd.f32 %v299_v55, %v231_v30  ;;  %v592_v28 = vsel %vm591_vm10, %v7936_v54, %v7935_v20 }
 0xaba   :  { %2189 = vrot.lane.b32.xlu1 %v2184_v11, %s4309_s30  ;;  %v456_v11 = vadd.f32 %v444_v18, %v382_v1  ;;  %v532_v42 = vadd.f32 %v520_v46, %v458_v2  ;;  %v7945_v18 = vld [vmem:[#allocation39_spill] sm:$0xff]  ;;  %v7950_v2 = vld [vmem:[#allocation46_spill] sm:$0xff]  ;;  %s8313_s30 = smov 64  }
 0xabb   :  { %v383_v31 = vadd.f32 %v371_v8, %v309_v25  ;;  %v385_v36 = vadd.f32 %v373_v49, %v311_v21  ;;  %v7939_v25 = vld [vmem:[#allocation36_spill] sm:$0xff]  ;;  %v7941_v8 = vld [vmem:[#allocation35_spill] sm:$0xff]  ;;  %v595_v57 = vsel %vm591_vm10, %v7938_v0, %v7945_v18  ;;  %v7967_v18 = vld [vmem:[#allocation53_spill] sm:$0xff] }
 0xabc   :  { %v594_v22 = vsel %vm591_vm10, %v7939_v25, %v7938_v0  ;;  %v596_v49 = vsel %vm591_vm10, %v7942_v59, %v7941_v8  ;;  %v7960_v25 = vld [vmem:[#allocation20_spill] sm:$0xff]  ;;  %v7964_v59 = vld [vmem:[#allocation50_spill] sm:$0xff] }
 0xabd   :  { %v459_v33 = vadd.f32 %v447_v13, %v385_v36  ;;  %v606_v36 = vadd.f32 %v594_v22, %v532_v42  ;;  %v7949_v13 = vld [vmem:[#allocation45_spill] sm:$0xff]  ;;  %v7958_v42 = vld [vmem:[#allocation22_spill] sm:$0xff]  ;;  %v7961_v22 = vld [vmem:[#allocation24_spill] sm:$0xff] }
 0xac1   :  { %2249 = vperm.xlu0 %4262, %v4159_v43   ;;  %2244 = vperm.xlu2 %4263, %v4158_v47   ;;  %v387_v43 = vadd.f32 %v375_v45, %v313_v7  ;;  %v518_v47 = vsel %vm517_vm7, %v4952_v3, %v4938_v29  ;;  %v7934_v3 = vld [vmem:[#allocation31_spill] sm:$0xff]  ;;  %v523_v29 = vsel %vm517_vm7, %v7932_v51, %v7937_v63  ;;  %v7943_v7 = vld [vmem:[#allocation40_spill] sm:$0xff] }
 0xac2   :  { %2224 = vperm.xlu1 %4264, %v2211_v56   ;;  %v457_v56 = vadd.f32 %v445_v10, %v383_v31  ;;  %v521_v52 = vsel %vm517_vm7, %v4950_v62, %v7934_v3  ;;  %v530_v34 = vadd.f32 %v518_v47, %v456_v11  ;;  %v593_v62 = vsel %vm591_vm10, %v7935_v20, %v7940_v24  ;;  %v7947_v10 = vld [vmem:[#allocation43_spill] sm:$0xff]  ;;  %v7956_v20 = vld [vmem:[#allocation21_spill] sm:$0xff] }
 0xac3   :  { %v461_v55 = vadd.f32 %v449_v17, %v387_v43  ;;  %v533_v27 = vadd.f32 %v521_v52, %v459_v33  ;;  %v666_v45 = vsel %vm665_vm11, %v7944_v16, %v7943_v7  ;;  %v597_v31 = vsel %vm591_vm10, %v7941_v8, %v7946_v58  ;;  %v7951_v47 = vld [vmem:[#allocation47_spill] sm:$0xff]  ;;  %v7954_v33 = vld [vmem:[#allocation17_spill] sm:$0xff]  ;;  %v7965_v16 = vld [vmem:[#allocation54_spill] sm:$0xff] }
 0xac4   :  { %v531_v30 = vadd.f32 %v519_v50, %v457_v56  ;;  %v604_v21 = vadd.f32 %v592_v28, %v530_v34  ;;  %v667_v43 = vsel %vm665_vm11, %v7943_v7, %v7949_v13  ;;  %v670_v17 = vsel %vm665_vm11, %v7951_v47, %v7950_v2  ;;  %v7952_v56 = vld [vmem:[#allocation48_spill] sm:$0xff]  ;;  %v7955_v3 = vld [vmem:[#allocation19_spill] sm:$0xff]  ;;  %v7963_v8 = vld [vmem:[#allocation49_spill] sm:$0xff] }
 0xac5   :  { %v535_v1 = vadd.f32 %v523_v29, %v461_v55  ;;  %v671_v50 = vsel %vm665_vm11, %v7950_v2, %v7953_v4  ;;  %v607_v51 = vadd.f32 %v595_v57, %v533_v27  ;;  %v740_v52 = vsel %vm739_vm8, %v7955_v3, %v7954_v33  ;;  %v7957_v55 = vld [vmem:[#allocation18_spill] sm:$0xff]  ;;  %v7959_v29 = vld [vmem:[#allocation23_spill] sm:$0xff]  ;;  %v7973_v4 = vld [vmem:[#allocation60_spill] sm:$0xff] }
 0xac6   :  { %v605_v11 = vadd.f32 %v593_v62, %v531_v30  ;;  %v678_v46 = vadd.f32 %v666_v45, %v604_v21  ;;  %v741_v54 = vsel %vm739_vm8, %v7954_v33, %v7956_v20  ;;  %v742_v63 = vsel %vm739_vm8, %v7958_v42, %v7957_v55  ;;  %v7962_v62 = vld [vmem:[#allocation25_spill] sm:$0xff]  ;;  %v7966_v45 = vld [vmem:[#allocation52_spill] sm:$0xff]  ;;  %v7971_v47 = vld [vmem:[#allocation58_spill] sm:$0xff] }
 0xac7   :  { %v609_v15 = vadd.f32 %v597_v31, %v535_v1  ;;  %v743_v30 = vsel %vm739_vm8, %v7957_v55, %v7959_v29  ;;  %v744_v24 = vsel %vm739_vm8, %v7961_v22, %v7960_v25  ;;  %v745_v27 = vsel %vm739_vm8, %v7960_v25, %v7962_v62  ;;  %v7975_v3 = vld [vmem:[#allocation65_spill] sm:$0xff]  ;;  %v7978_v55 = vld [vmem:[#allocation67_spill] sm:$0xff]  ;;  %v7979_v42 = vld [vmem:[#allocation66_spill] sm:$0xff] }
 0xac8   :  { %v679_v28 = vadd.f32 %v667_v43, %v605_v11  ;;  %v752_v21 = vadd.f32 %v740_v52, %v678_v46  ;;  %v816_v1 = vsel %vm813_vm12, %v7966_v45, %v7965_v16  ;;  %v815_v57 = vsel %vm813_vm12, %v7963_v8, %v7967_v18  ;;  %v7976_v52 = vld [vmem:[#allocation63_spill] sm:$0xff]  ;;  %v7980_v29 = vld [vmem:[#allocation64_spill] sm:$0xff] }
 0xac9   :  { %v683_v0 = vadd.f32 %v671_v50, %v609_v15  ;;  %v891_v20 = vsel %vm887_vm13, %v7976_v52, %v7975_v3  ;;  %v7982_v25 = vld [vmem:[#allocation68_spill] sm:$0xff] }
 0xaca   :  { %2254 = vperm.xlu1 %4264, %v4160_v23   ;;  %v460_v23 = vadd.f32 %v448_v19, %v386_v12  ;;  %v7948_v12 = vld [vmem:[#allocation44_spill] sm:$0xff]  ;;  %v753_v58 = vadd.f32 %v741_v54, %v679_v28  ;;  %v7977_v28 = vld [vmem:[#allocation62_spill] sm:$0xff] }
 0xacb   :  { %v668_v19 = vsel %vm665_vm11, %v7948_v12, %v7947_v10  ;;  %v7969_v12 = vld [vmem:[#allocation55_spill] sm:$0xff]  ;;  %v757_v2 = vadd.f32 %v745_v27, %v683_v0  ;;  %v7981_v0 = vld [vmem:[#allocation70_spill] sm:$0xff]  ;;  %v7997_v3 = vld [vmem:[#allocation84_spill] sm:$0xff] }
 0xacc   :  { %v534_v44 = vadd.f32 %v522_v61, %v460_v23  ;;  %v669_v23 = vsel %vm665_vm11, %v7947_v10, %v7952_v56  ;;  %v680_v61 = vadd.f32 %v668_v19, %v606_v36  ;;  %v7968_v10 = vld [vmem:[#allocation57_spill] sm:$0xff]  ;;  %v7970_v36 = vld [vmem:[#allocation56_spill] sm:$0xff]  ;;  %v827_v56 = vadd.f32 %v815_v57, %v753_v58  ;;  %v7988_v58 = vld [vmem:[#allocation75_spill] sm:$0xff] }
 0xacd   :  { %v818_v19 = vsel %vm813_vm12, %v7969_v12, %v7968_v10  ;;  %v817_v11 = vsel %vm813_vm12, %v7965_v16, %v7970_v36  ;;  %v963_v22 = vsel %vm7681_vm14, %v7982_v25, %v7981_v0  ;;  %v7987_v57 = vld [vmem:[#allocation76_spill] sm:$0xff] }
 0xace   :  { %v608_v14 = vadd.f32 %v596_v49, %v534_v44  ;;  %v681_v44 = vadd.f32 %v669_v23, %v607_v51  ;;  %v814_v49 = vsel %vm813_vm12, %v7964_v59, %v7963_v8  ;;  %v754_v7 = vadd.f32 %v742_v63, %v680_v61  ;;  %v7972_v23 = vld [vmem:[#allocation59_spill] sm:$0xff]  ;;  %v7974_v61 = vld [vmem:[#allocation61_spill] sm:$0xff]  ;;  %v7984_v8 = vld [vmem:[#allocation74_spill] sm:$0xff] }
 0xacf   :  { %v826_v13 = vadd.f32 %v814_v49, %v752_v21  ;;  %v888_v50 = vsel %vm887_vm13, %v7973_v4, %v7972_v23  ;;  %v889_v33 = vsel %vm887_vm13, %v7972_v23, %v7974_v61  ;;  %v893_v63 = vsel %vm887_vm13, %v7979_v42, %v7978_v55  ;;  %v7985_v59 = vld [vmem:[#allocation72_spill] sm:$0xff]  ;;  %v7993_v4 = vld [vmem:[#allocation83_spill] sm:$0xff] }
 0xad0   :  { %v682_v34 = vadd.f32 %v670_v17, %v608_v14  ;;  %v755_v43 = vadd.f32 %v743_v30, %v681_v44  ;;  %v819_v17 = vsel %vm813_vm12, %v7968_v10, %v7971_v47  ;;  %v828_v46 = vadd.f32 %v816_v1, %v754_v7  ;;  %v7986_v7 = vld [vmem:[#allocation71_spill] sm:$0xff]  ;;  %v8002_v0 = vld [vmem:[#allocation92_spill] sm:$0xff] }
 0xad1   :  { %v831_v54 = vadd.f32 %v819_v17, %v757_v2  ;;  %v892_v30 = vsel %vm887_vm13, %v7980_v29, %v7979_v42  ;;  %v900_v44 = vadd.f32 %v888_v50, %v826_v13  ;;  %v901_v27 = vadd.f32 %v889_v33, %v827_v56  ;;  %v7991_v13 = vld [vmem:[#allocation77_spill] sm:$0xff]  ;;  %v7992_v17 = vld [vmem:[#allocation78_spill] sm:$0xff]  ;;  %v7999_v42 = vld [vmem:[#allocation88_spill] sm:$0xff] }
 0xad2   :  { %v756_v31 = vadd.f32 %v744_v24, %v682_v34  ;;  %v829_v15 = vadd.f32 %v817_v11, %v755_v43  ;;  %v890_v34 = vsel %vm887_vm13, %v7977_v28, %v7976_v52  ;;  %v7983_v24 = vld [vmem:[#allocation69_spill] sm:$0xff]  ;;  %v965_v49 = vsel %vm7681_vm14, %v7985_v59, %v7984_v8  ;;  %v7990_v11 = vld [vmem:[#allocation79_spill] sm:$0xff]  ;;  %v7998_v28 = vld [vmem:[#allocation82_spill] sm:$0xff] }
 0xad3   :  { %v962_v62 = vsel %vm7681_vm14, %v7983_v24, %v7982_v25  ;;  %v964_v16 = vsel %vm7681_vm14, %v7986_v7, %v7985_v59  ;;  %v902_v45 = vadd.f32 %v890_v34, %v828_v46  ;;  %v905_v1 = vadd.f32 %v893_v63, %v831_v54  ;;  %v7994_v50 = vld [vmem:[#allocation81_spill] sm:$0xff]  ;;  %v8000_v63 = vld [vmem:[#allocation86_spill] sm:$0xff] }
 0xad4   :  { %v830_v51 = vadd.f32 %v818_v19, %v756_v31  ;;  %v903_v21 = vadd.f32 %v891_v20, %v829_v15  ;;  %v967_v31 = vsel %vm7681_vm14, %v7988_v58, %v7987_v57  ;;  %v975_v10 = vadd.f32 %v963_v22, %v901_v27  ;;  %v7989_v19 = vld [vmem:[#allocation73_spill] sm:$0xff]  ;;  %v7995_v15 = vld [vmem:[#allocation80_spill] sm:$0xff]  ;;  %v8003_v25 = vld [vmem:[#allocation90_spill] sm:$0xff] }
 0xad5   :  { %v974_v12 = vadd.f32 %v962_v62, %v900_v44  ;;  %v966_v36 = vsel %vm7681_vm14, %v7989_v19, %v7988_v58  ;;  %v1037_v43 = vsel %vm7680_vm15, %v7991_v13, %v7990_v11  ;;  %v976_v47 = vadd.f32 %v964_v16, %v902_v45  ;;  %v7996_v33 = vld [vmem:[#allocation85_spill] sm:$0xff]  ;;  %v8007_v45 = vld [vmem:[#allocation91_spill] sm:$0xff] }
 0xad6   :  { %v904_v18 = vadd.f32 %v892_v30, %v830_v51  ;;  %v977_v2 = vadd.f32 %v965_v49, %v903_v21  ;;  %v1036_v46 = vsel %vm7680_vm15, %v7992_v17, %v7991_v13  ;;  %v979_v23 = vadd.f32 %v967_v31, %v905_v1  ;;  %v8001_v30 = vld [vmem:[#allocation87_spill] sm:$0xff]  ;;  %v8004_v21 = vld [vmem:[#allocation89_spill] sm:$0xff]  ;;  %v8005_v49 = vld [vmem:[#allocation94_spill] sm:$0xff] }
 0xad7   :  { %v1039_v51 = vsel %vm7680_vm15, %v7994_v50, %v7993_v4  ;;  %v1038_v61 = vsel %vm7680_vm15, %v7995_v15, %v7994_v50  ;;  %v1041_v52 = vsel %vm7680_vm15, %v7997_v3, %v7996_v33  ;;  %v1049_v54 = vadd.f32 %v1037_v43, %v975_v10  ;;  %v8006_v7 = vld [vmem:[#allocation93_spill] sm:$0xff]  ;;  %v8009_v57 = vld [vmem:[#allocation95_spill] sm:$0xff] }
 0xad8   :  { %v978_v20 = vadd.f32 %v966_v36, %v904_v18  ;;  %v1040_v34 = vsel %vm7680_vm15, %v7998_v28, %v7997_v3  ;;  %v1048_v55 = vadd.f32 %v1036_v46, %v974_v12  ;;  %v1111_v29 = vsel %vm1109_vm1, %v8000_v63, %v7999_v42  ;;  %v8008_v18 = vld [vmem:[#allocation97_spill] sm:$0xff]  ;;  %v8010_v36 = vld [vmem:[#allocation96_spill] sm:$0xff]  ;;  %v8012_v43 = vld [vmem:[#allocation99_spill] sm:$0xff] }
 0xad9   :  { %v1110_v44 = vsel %vm1109_vm1, %v8001_v30, %v8000_v63  ;;  %v1113_v22 = vsel %vm1109_vm1, %v8003_v25, %v8002_v0  ;;  %v1051_v24 = vadd.f32 %v1039_v51, %v977_v2  ;;  %v1050_v62 = vadd.f32 %v1038_v61, %v976_v47  ;;  %v8011_v13 = vld [vmem:[#allocation101_spill] sm:$0xff]  ;;  %v8013_v47 = vld [vmem:[#allocation98_spill] sm:$0xff]  ;;  %v8014_v50 = vld [vmem:[#allocation103_spill] sm:$0xff] }
 0xada   :  { %v1053_v27 = vadd.f32 %v1041_v52, %v979_v23  ;;  %v1112_v8 = vsel %vm1109_vm1, %v8004_v21, %v8003_v25  ;;  %v1052_v59 = vadd.f32 %v1040_v34, %v978_v20  ;;  %v1115_v16 = vsel %vm1109_vm1, %v8006_v7, %v8005_v49  ;;  %v8015_v51 = vld [vmem:[#allocation102_spill] sm:$0xff]  ;;  %v8016_v61 = vld [vmem:[#allocation100_spill] sm:$0xff]  ;;  %v8022_v25 = vld [vmem:[#allocation107_spill] sm:$0xff] }
 0xadb   :  { %v1114_v1 = vsel %vm1109_vm1, %v8007_v45, %v8006_v7  ;;  %v1185_v58 = vsel %vm1183_vm2, %v8009_v57, %v8008_v18  ;;  %v1123_v31 = vadd.f32 %v1111_v29, %v1049_v54  ;;  %v1122_v10 = vadd.f32 %v1110_v44, %v1048_v55  ;;  %v8017_v3 = vld [vmem:[#allocation106_spill] sm:$0xff]  ;;  %v8018_v52 = vld [vmem:[#allocation104_spill] sm:$0xff]  ;;  %v8019_v54 = vld [vmem:[#allocation105_spill] sm:$0xff] }
 0xadc   :  { %v1125_v12 = vadd.f32 %v1113_v22, %v1051_v24  ;;  %v1124_v19 = vadd.f32 %v1112_v8, %v1050_v62  ;;  %v1184_v11 = vsel %vm1183_vm2, %v8010_v36, %v8009_v57  ;;  %v1187_v2 = vsel %vm1183_vm2, %v8012_v43, %v8011_v13  ;;  %v8020_v29 = vld [vmem:[#allocation110_spill] sm:$0xff]  ;;  %v8021_v30 = vld [vmem:[#allocation108_spill] sm:$0xff]  ;;  %v8024_v62 = vld [vmem:[#allocation111_spill] sm:$0xff] }
 0xadd   :  { %v1186_v17 = vsel %vm1183_vm2, %v8013_v47, %v8012_v43  ;;  %v1127_v46 = vadd.f32 %v1115_v16, %v1053_v27  ;;  %v1126_v23 = vadd.f32 %v1114_v1, %v1052_v59  ;;  %v1197_v4 = vadd.f32 %v1185_v58, %v1123_v31  ;;  %v8023_v24 = vld [vmem:[#allocation112_spill] sm:$0xff]  ;;  %v8025_v21 = vld [vmem:[#allocation109_spill] sm:$0xff]  ;;  %v8026_v16 = vld [vmem:[#allocation115_spill] sm:$0xff] }
 0xade   :  { %v1189_v15 = vsel %vm1183_vm2, %v8015_v51, %v8014_v50  ;;  %v1188_v33 = vsel %vm1183_vm2, %v8016_v61, %v8015_v51  ;;  %v1259_v20 = vsel %vm7682_vm3, %v8018_v52, %v8017_v3  ;;  %v1258_v28 = vsel %vm7682_vm3, %v8019_v54, %v8018_v52  ;;  %v8027_v45 = vld [vmem:[#allocation113_spill] sm:$0xff]  ;;  %v8028_v57 = vld [vmem:[#allocation114_spill] sm:$0xff]  ;;  %v8029_v31 = vld [vmem:[#allocation119_spill] sm:$0xff] }
 0xadf   :  { %vm7683_vm15 = vcmask 654336   ;;  %v1196_v55 = vadd.f32 %v1184_v11, %v1122_v10  ;;  %v1199_v42 = vadd.f32 %v1187_v2, %v1125_v12  ;;  %v1198_v63 = vadd.f32 %v1186_v17, %v1124_v19  ;;  %v8030_v10 = vld [vmem:[#allocation117_spill] sm:$0xff]  ;;  %v8031_v13 = vld [vmem:[#allocation116_spill] sm:$0xff]  ;;  %v8036_v61 = vld [vmem:[#allocation122_spill] sm:$0xff] }
 0xae0   :  { %v1261_v44 = vsel %vm7682_vm3, %v8021_v30, %v8020_v29  ;;  %v1201_v0 = vadd.f32 %v1189_v15, %v1127_v46  ;;  %v1260_v22 = vsel %vm7682_vm3, %v8022_v25, %v8021_v30  ;;  %v1263_v27 = vsel %vm7682_vm3, %v8024_v62, %v8023_v24  ;;  %v8032_v47 = vld [vmem:[#allocation121_spill] sm:$0xff]  ;;  %v8033_v17 = vld [vmem:[#allocation120_spill] sm:$0xff]  ;;  %v8037_v3 = vld [vmem:[#allocation123_spill] sm:$0xff] }
 0xae1   :  { %v1262_v8 = vsel %vm7682_vm3, %v8025_v21, %v8024_v62  ;;  %v1200_v59 = vadd.f32 %v1188_v33, %v1126_v23  ;;  %v1271_v49 = vadd.f32 %v1259_v20, %v1197_v4  ;;  %v1270_v7 = vadd.f32 %v1258_v28, %v1196_v55  ;;  %v8034_v23 = vld [vmem:[#allocation118_spill] sm:$0xff]  ;;  %v8035_v15 = vld [vmem:[#allocation124_spill] sm:$0xff]  ;;  %v8043_v62 = vld [vmem:[#allocation127_spill] sm:$0xff] }
 0xae2   :  { %v1333_v1 = vsel %vm7683_vm15, %v8027_v45, %v8026_v16  ;;  %v1273_v18 = vadd.f32 %v1261_v44, %v1199_v42  ;;  %v1332_v58 = vsel %vm7683_vm15, %v8028_v57, %v8027_v45  ;;  %v1335_v12 = vsel %vm7683_vm15, %v8030_v10, %v8029_v31  ;;  %v8038_v28 = vld [vmem:[#allocation128_spill] sm:$0xff]  ;;  %v8039_v55 = vld [vmem:[#allocation126_spill] sm:$0xff]  ;;  %v8042_v44 = vld [vmem:[#allocation129_spill] sm:$0xff] }
 0xae3   :  { %v5921_v14 = vpop.permute.xlu2 %1981  ;;  %vm7684_vm14 = vcmask 646144   ;;  %v1272_v19 = vadd.f32 %v1260_v22, %v1198_v63  ;;  %v1275_v36 = vadd.f32 %v1263_v27, %v1201_v0  ;;  %v1274_v11 = vadd.f32 %v1262_v8, %v1200_v59  ;;  %v8040_v63 = vld [vmem:[#allocation125_spill] sm:$0xff]  ;;  %v8041_v30 = vld [vmem:[#allocation130_spill] sm:$0xff]  ;;  %v8045_v8 = vld [vmem:[#allocation131_spill] sm:$0xff] }
 0xae4   :  { %v1334_v43 = vsel %vm7683_vm15, %v8031_v13, %v8030_v10  ;;  %v1345_v2 = vadd.f32 %v1333_v1, %v1271_v49  ;;  %v1337_v46 = vsel %vm7683_vm15, %v8033_v17, %v8032_v47  ;;  %v1336_v4 = vsel %vm7683_vm15, %v8034_v23, %v8033_v17  ;;  %v8044_v21 = vld [vmem:[#allocation133_spill] sm:$0xff]  ;;  %v8046_v16 = vld [vmem:[#allocation132_spill] sm:$0xff]  ;;  %v8049_v10 = vld [vmem:[#allocation135_spill] sm:$0xff] }
 0xae5   :  { %vm7685_vm3 = vcmask 637952   ;;  %v1344_v50 = vadd.f32 %v1332_v58, %v1270_v7  ;;  %v1347_v51 = vadd.f32 %v1335_v12, %v1273_v18  ;;  %v1407_v33 = vsel %vm7684_vm14, %v8036_v61, %v8035_v15  ;;  %v8048_v31 = vld [vmem:[#allocation137_spill] sm:$0xff] }
 0xae6   :  { %v1406_v52 = vsel %vm7684_vm14, %v8037_v3, %v8036_v61  ;;  %v1346_v54 = vadd.f32 %v1334_v43, %v1272_v19  ;;  %v1409_v42 = vsel %vm7684_vm14, %v8039_v55, %v8038_v28  ;;  %v1408_v29 = vsel %vm7684_vm14, %v8040_v63, %v8039_v55  ;;  %v8051_v43 = vld [vmem:[#allocation139_spill] sm:$0xff]  ;;  %v8056_v61 = vld [vmem:[#allocation141_spill] sm:$0xff]  ;;  %v8057_v3 = vld [vmem:[#allocation146_spill] sm:$0xff] }
 0xae7   :  { %v1411_v0 = vsel %vm7684_vm14, %v8042_v44, %v8041_v30  ;;  %v1349_v22 = vadd.f32 %v1337_v46, %v1275_v36  ;;  %v1348_v24 = vadd.f32 %v1336_v4, %v1274_v11  ;;  %v1410_v27 = vsel %vm7684_vm14, %v8043_v62, %v8042_v44  ;;  %v8050_v11 = vld [vmem:[#allocation134_spill] sm:$0xff]  ;;  %v8053_v46 = vld [vmem:[#allocation136_spill] sm:$0xff]  ;;  %v8059_v28 = vld [vmem:[#allocation143_spill] sm:$0xff] }
 0xae8   :  { %v1481_v59 = vsel %vm7685_vm3, %v8045_v8, %v8044_v21  ;;  %v1419_v49 = vadd.f32 %v1407_v33, %v1345_v2  ;;  %v1418_v7 = vadd.f32 %v1406_v52, %v1344_v50  ;;  %v1480_v45 = vsel %vm7685_vm3, %v8046_v16, %v8045_v8  ;;  %v8052_v2 = vld [vmem:[#allocation138_spill] sm:$0xff]  ;;  %v8055_v50 = vld [vmem:[#allocation140_spill] sm:$0xff]  ;;  %v8061_v30 = vld [vmem:[#allocation147_spill] sm:$0xff] }
 0xae9   :  { %vm7686_vm15 = vcmask 629760   ;;  %v1421_v18 = vadd.f32 %v1409_v42, %v1347_v51  ;;  %v1420_v57 = vadd.f32 %v1408_v29, %v1346_v54  ;;  %v1423_v58 = vadd.f32 %v1411_v0, %v1349_v22  ;;  %v8054_v4 = vld [vmem:[#allocation142_spill] sm:$0xff]  ;;  %v8058_v52 = vld [vmem:[#allocation144_spill] sm:$0xff]  ;;  %v8062_v0 = vld [vmem:[#allocation145_spill] sm:$0xff] }
 0xaea   :  { %v1483_v12 = vsel %vm7685_vm3, %v8049_v10, %v8048_v31  ;;  %v1422_v19 = vadd.f32 %v1410_v27, %v1348_v24  ;;  %v1493_v36 = vadd.f32 %v1481_v59, %v1419_v49  ;;  %v1482_v13 = vsel %vm7685_vm3, %v8050_v11, %v8049_v10  ;;  %v8060_v29 = vld [vmem:[#allocation148_spill] sm:$0xff]  ;;  %v8063_v21 = vld [vmem:[#allocation149_spill] sm:$0xff]  ;;  %v8065_v31 = vld [vmem:[#allocation154_spill] sm:$0xff] }
 0xaeb   :  { %v5965_v56 = vpop.permute.xlu2 %1987  ;;  %v1485_v47 = vsel %vm7685_vm3, %v8052_v2, %v8051_v43  ;;  %v1492_v17 = vadd.f32 %v1480_v45, %v1418_v7  ;;  %v1484_v23 = vsel %vm7685_vm3, %v8053_v46, %v8052_v2  ;;  %v1555_v51 = vsel %vm7686_vm15, %v8055_v50, %v8054_v4  ;;  %v8064_v45 = vld [vmem:[#allocation150_spill] sm:$0xff]  ;;  %v8066_v10 = vld [vmem:[#allocation152_spill] sm:$0xff]  ;;  %v8070_v2 = vld [vmem:[#allocation153_spill] sm:$0xff] }
 0xaec   :  { %vm7687_vm14 = vcmask 621568   ;;  %v1495_v15 = vadd.f32 %v1483_v12, %v1421_v18  ;;  %v1554_v33 = vsel %vm7686_vm15, %v8056_v61, %v8055_v50  ;;  %v1557_v54 = vsel %vm7686_vm15, %v8058_v52, %v8057_v3  ;;  %v8068_v11 = vld [vmem:[#allocation156_spill] sm:$0xff]  ;;  %v8072_v50 = vld [vmem:[#allocation158_spill] sm:$0xff]  ;;  %v8074_v3 = vld [vmem:[#allocation157_spill] sm:$0xff] }
 0xaed   :  { %v1556_v55 = vsel %vm7686_vm15, %v8059_v28, %v8058_v52  ;;  %v1494_v42 = vadd.f32 %v1482_v13, %v1420_v57  ;;  %v1497_v63 = vadd.f32 %v1485_v47, %v1423_v58  ;;  %v1559_v44 = vsel %vm7686_vm15, %v8061_v30, %v8060_v29  ;;  %v8069_v13 = vld [vmem:[#allocation155_spill] sm:$0xff]  ;;  %v8071_v4 = vld [vmem:[#allocation160_spill] sm:$0xff] }
 0xaee   :  { %v1558_v22 = vsel %vm7686_vm15, %v8062_v0, %v8061_v30  ;;  %v1496_v62 = vadd.f32 %v1484_v23, %v1422_v19  ;;  %v1567_v27 = vadd.f32 %v1555_v51, %v1493_v36  ;;  %v1629_v8 = vsel %vm7687_vm14, %v8063_v21, %v5503_v40  ;;  %v8067_v19 = vld [vmem:[#allocation151_spill] sm:$0xff] }
 0xaef   :  { %vm7754_vm3 = vcmask 523264   ;;  %v1566_v49 = vadd.f32 %v1554_v33, %v1492_v17  ;;  %v1569_v7 = vadd.f32 %v1557_v54, %v1495_v15  ;;  %v1568_v16 = vadd.f32 %v1556_v55, %v1494_v42  ;;  %v8075_v54 = vld [vmem:[#allocation162_spill] sm:$0xff] }
 0xaf0   :  { %v1628_v18 = vsel %vm7687_vm14, %v8064_v45, %v8063_v21  ;;  %v1571_v57 = vadd.f32 %v1559_v44, %v1497_v63  ;;  %v1570_v58 = vadd.f32 %v1558_v22, %v1496_v62  ;;  %v1631_v12 = vsel %vm7687_vm14, %v8066_v10, %v8065_v31  ;;  %v8078_v21 = vld [vmem:[#allocation166_spill] sm:$0xff]  ;;  %v8080_v45 = vld [vmem:[#allocation163_spill] sm:$0xff]  ;;  %v8083_v31 = vld [vmem:[#allocation165_spill] sm:$0xff] }
 0xaf1   :  { %v1630_v40 = vsel %vm7687_vm14, %v8067_v19, %v8066_v10  ;;  %v1641_v36 = vadd.f32 %v1629_v8, %v1567_v27  ;;  %v1633_v43 = vsel %vm7687_vm14, %v8069_v13, %v8068_v11  ;;  %v1632_v47 = vsel %vm7687_vm14, %v8070_v2, %v8069_v13  ;;  %v8079_v8 = vld [vmem:[#allocation164_spill] sm:$0xff] }
 0xaf2   :  { %v1703_v17 = vsel %vm7754_vm3, %v5544_v41, %v5548_v35  ;;  %v1640_v46 = vadd.f32 %v1628_v18, %v1566_v49  ;;  %v1702_v23 = vsel %vm7754_vm3, %v5546_v6, %v5544_v41  ;;  %v1705_v51 = vsel %vm7754_vm3, %v8072_v50, %v8071_v4  ;;  %v8076_v35 = vld [vmem:[#allocation161_spill] sm:$0xff]  ;;  %v8077_v6 = vld [vmem:[#allocation159_spill] sm:$0xff]  ;;  %v8084_v19 = vld [vmem:[#allocation172_spill] sm:$0xff] }
 0xaf3   :  { %v6021_v34 = vpop.permute.xlu2 %1993  ;;  %vm7688_vm15 = vcmask 515072   ;;  %v1643_v61 = vadd.f32 %v1631_v12, %v1569_v7  ;;  %v1642_v33 = vadd.f32 %v1630_v40, %v1568_v16  ;;  %v1704_v52 = vsel %vm7754_vm3, %v8074_v3, %v8072_v50  ;;  %v8085_v40 = vld [vmem:[#allocation170_spill] sm:$0xff]  ;;  %v8089_v50 = vld [vmem:[#allocation171_spill] sm:$0xff] }
 0xaf4   :  { %v1707_v28 = vsel %vm7754_vm3, %v8076_v35, %v8075_v54  ;;  %v1645_v55 = vadd.f32 %v1633_v43, %v1571_v57  ;;  %v1644_v42 = vadd.f32 %v1632_v47, %v1570_v58  ;;  %v1715_v41 = vadd.f32 %v1703_v17, %v1641_v36  ;;  %v8081_v57 = vld [vmem:[#allocation168_spill] sm:$0xff]  ;;  %v8086_v43 = vld [vmem:[#allocation169_spill] sm:$0xff]  ;;  %v8087_v47 = vld [vmem:[#allocation174_spill] sm:$0xff] }
 0xaf5   :  { %v1706_v63 = vsel %vm7754_vm3, %v8077_v6, %v8076_v35  ;;  %v1714_v29 = vadd.f32 %v1702_v23, %v1640_v46  ;;  %v1717_v30 = vadd.f32 %v1705_v51, %v1643_v61  ;;  %v1777_v44 = vsel %vm7688_vm15, %v5589_v9, %v5593_v48  ;;  %v8082_v48 = vld [vmem:[#allocation167_spill] sm:$0xff]  ;;  %v8088_v17 = vld [vmem:[#allocation173_spill] sm:$0xff] }
 0xaf6   :  { %vm7689_vm14 = vcmask 506880   ;;  %v1716_v22 = vadd.f32 %v1704_v52, %v1642_v33  ;;  %v1719_v62 = vadd.f32 %v1707_v28, %v1645_v55  ;;  %v1776_v27 = vsel %vm7688_vm15, %v5591_v26, %v5589_v9  ;;  %v8091_v55 = vld [vmem:[#allocation179_spill] sm:$0xff] }
 0xaf7   :  { %v1779_v49 = vsel %vm7688_vm15, %v8079_v8, %v8078_v21  ;;  %v1718_v16 = vadd.f32 %v1706_v63, %v1644_v42  ;;  %v1778_v18 = vsel %vm7688_vm15, %v8080_v45, %v8079_v8  ;;  %v1781_v58 = vsel %vm7688_vm15, %v8082_v48, %v8081_v57 }
 0xaf8   :  { %v1780_v10 = vsel %vm7688_vm15, %v8083_v31, %v8082_v48  ;;  %v1789_v12 = vadd.f32 %v1777_v44, %v1715_v41  ;;  %v1851_v9 = vsel %vm7689_vm14, %v5634_v32, %v5638_v60  ;;  %v1850_v26 = vsel %vm7689_vm14, %v5636_v38, %v5634_v32  ;;  %v8092_v41 = vld [vmem:[#allocation178_spill] sm:$0xff] }
 0xaf9   :  { %v1853_v36 = vsel %vm7689_vm14, %v8085_v40, %v8084_v19  ;;  %v1788_v11 = vadd.f32 %v1776_v27, %v1714_v29  ;;  %v1791_v13 = vadd.f32 %v1779_v49, %v1717_v30  ;;  %v1852_v2 = vsel %vm7689_vm14, %v8086_v43, %v8085_v40  ;;  %v8094_v29 = vld [vmem:[#allocation177_spill] sm:$0xff] }
 0xafa   :  { %v1855_v46 = vsel %vm7689_vm14, %v8088_v17, %v8087_v47  ;;  %v1790_v23 = vadd.f32 %v1778_v18, %v1716_v22  ;;  %v1793_v60 = vadd.f32 %v1781_v58, %v1719_v62  ;;  %v1792_v4 = vadd.f32 %v1780_v10, %v1718_v16 }
 0xafb   :  { %v6059_v20 = vpop.permute.xlu0 %1983  ;;  %v6081_v1 = vpop.permute.xlu2 %2023  ;;  %v1854_v32 = vsel %vm7689_vm14, %v8089_v50, %v8088_v17  ;;  %v1863_v38 = vadd.f32 %v1851_v9, %v1789_v12  ;;  %v1862_v51 = vadd.f32 %v1850_v26, %v1788_v11  ;;  %v1865_v61 = vadd.f32 %v1853_v36, %v1791_v13 }
 0xafc   :  { %v6070_v25 = vpop.permute.xlu1 %1979  ;;  %8047 = vst [vmem:[#allocation27_spill] sm:$0xff] %v6081_v1  ;;  %vm7753_vm15 = vcmask 498688   ;;  %v1864_v33 = vadd.f32 %v1852_v2, %v1790_v23  ;;  %v1867_v3 = vadd.f32 %v1855_v46, %v1793_v60  ;;  %v1866_v28 = vadd.f32 %v1854_v32, %v1792_v4 }
 0xafd   :  { %v1927_v52 = vsel %vm7753_vm15, %v5687_v5, %v5691_v37  ;;  %v1926_v54 = vsel %vm7753_vm15, %v5685_v39, %v5687_v5  ;;  %v1929_v42 = vsel %vm7753_vm15, %v8091_v55, %v5700_v53  ;;  %v1928_v6 = vsel %vm7753_vm15, %v8092_v41, %v8091_v55  ;;  %v8095_v37 = vld [vmem:[#allocation175_spill] sm:$0xff]  ;;  %v8096_v39 = vld [vmem:[#allocation176_spill] sm:$0xff]  ;;  %v117_v41 = vld [vmem:[%s7587_s7] sm:$0xf] }
 0xafe   :  { %vm7752_vm14 = vcmask 490496   ;;  %v1925_v30 = vsel %vm7753_vm15, %v8095_v37, %v8094_v29  ;;  %v1924_v5 = vsel %vm7753_vm15, %v8096_v39, %v8095_v37  ;;  %v1939_v62 = vadd.f32 %v1927_v52, %v1865_v61  ;;  %v8107_v39 = vld [vmem:[#allocation10_spill] sm:$0xff] }
 0xaff   :  { %v1938_v27 = vadd.f32 %v1926_v54, %v1864_v33  ;;  %v1941_v49 = vadd.f32 %v1929_v42, %v1867_v3  ;;  %v1940_v16 = vadd.f32 %v1928_v6, %v1866_v28  ;;  %v1936_v45 = vadd.f32 %v1924_v5, %v1862_v51  ;;  %v8102_v3 = vld [vmem:[#allocation8_spill] sm:$0xff] }
 0xb00   :  { %vm8194_vm15 = vcmask 777216  }
 0xb01   :  { %vm8195_vm3 = vmmov %vm8194_vm15 }
 0xb03   :  { %v6113_v24 = vpop.permute.xlu0 %1989  ;;  %v6144_v15 = vpop.permute.xlu2 %2044 }
 0xb04   :  { %v6118_v59 = vpop.permute.xlu1 %1985  ;;  %8073 = vst [vmem:[#allocation28_spill] sm:$0xff] %v6144_v15  ;;  %v2001_v44 = vsel %vm7752_vm14, %v5965_v56, %v6113_v24  ;;  %v1999_v24 = vsel %vm7752_vm14, %v5921_v14, %v6059_v20 }
 0xb05   :  { %v2000_v53 = vsel %vm7752_vm14, %v6118_v59, %v5965_v56  ;;  %v1998_v56 = vsel %vm7752_vm14, %v6070_v25, %v5921_v14  ;;  %v1937_v59 = vadd.f32 %v1925_v30, %v1863_v38  ;;  %v2013_v18 = vadd.f32 %v2001_v44, %v1939_v62  ;;  %v8109_v44 = vld [vmem:[#allocation9_spill] sm:$0xff] }
 0xb06   :  { %v2012_v57 = vadd.f32 %v2000_v53, %v1938_v27  ;;  %v2010_v31 = vadd.f32 %v1998_v56, %v1936_v45 }
 0xb07   :  { %v2034_v10 = vmul.f32 %v6081_v1, %v2013_v18 }
 0xb08   :  { %v2033_v20 = vmul.f32 %v6081_v1, %v2012_v57  ;;  %v4161_v57 = vld [vmem:[%s7584_s4 + $0x30] sm:$0xff] }
 0xb09   :  { %v2055_v47 = vadd.f32 %v6144_v15, %v2034_v10 }
 0xb0a   :  { %v2054_v2 = vadd.f32 %v6144_v15, %v2033_v20 }
 0xb0b   :  { %v1996_v0 = vpop.permute.xlu0 %1995  ;;  %v6197_v35 = vpop.permute.xlu2 %2113  ;;  %v2061_v51 = vmax.f32 %v2055_v47, 0.0 }
 0xb0c   :  { %v1992_v7 = vpop.permute.xlu1 %1991  ;;  %8090 = vst [vmem:[#allocation26_spill] sm:$0xff] %v6197_v35  ;;  %v2003_v21 = vsel %vm7752_vm14, %v6021_v34, %v1996_v0  ;;  %v2011_v0 = vadd.f32 %v1999_v24, %v1937_v59  ;;  %v2060_v38 = vmax.f32 %v2054_v2, 0.0 }
 0xb0d   :  { %v2002_v8 = vsel %vm7752_vm14, %v1992_v7, %v6021_v34  ;;  %v2015_v48 = vadd.f32 %v2003_v21, %v1941_v49 }
 0xb0e   :  { %v2014_v58 = vadd.f32 %v2002_v8, %v1940_v16 }
 0xb13   :  { %v6205_v63 = vpop.permute.xlu0 %2028  ;;  %v6239_v9 = vpop.permute.xlu2 %2214 }
 0xb14   :  { %8093 = vst [vmem:[#allocation30_spill] sm:$0xff] %v6205_v63  ;;  %v6219_v22 = vpop.permute.xlu1 %2018  ;;  %v2035_v34 = vmul.f32 %v6205_v63, %v2014_v58  ;;  %v2036_v7 = vmul.f32 %v6205_v63, %v2015_v48  ;;  %v4163_v48 = vld [vmem:[%s7584_s4 + $0x40] sm:$0xff]  ;;  %v4162_v58 = vld [vmem:[%s7584_s4 + $0x38] sm:$0xff] }
 0xb15   :  { %8097 = vst [vmem:[#allocation31_spill] sm:$0xff] %v6219_v22  ;;  %v2031_v14 = vmul.f32 %v6219_v22, %v2010_v31  ;;  %v2032_v25 = vmul.f32 %v6219_v22, %v2011_v0 }
 0xb1b   :  { %v6235_v12 = vpop.permute.xlu0 %2049  ;;  %v2245_v55 = vpop.permute.xlu2 %2244 }
 0xb1c   :  { %8098 = vst [vmem:[#allocation29_spill] sm:$0xff] %v6235_v12  ;;  %v6241_v26 = vpop.permute.xlu1 %2039  ;;  %v2056_v19 = vadd.f32 %v6235_v12, %v2035_v34  ;;  %v2057_v40 = vadd.f32 %v6235_v12, %v2036_v7 }
 0xb1d   :  { %8099 = vst [vmem:[#allocation33_spill] sm:$0xff] %v6241_v26  ;;  %v2052_v36 = vadd.f32 %v6241_v26, %v2031_v14  ;;  %v2053_v11 = vadd.f32 %v6241_v26, %v2032_v25 }
 0xb1e   :  { %v2062_v13 = vmax.f32 %v2056_v19, 0.0  ;;  %v2063_v43 = vmax.f32 %v2057_v40, 0.0 }
 0xb1f   :  { %v2058_v23 = vmax.f32 %v2052_v36, 0.0  ;;  %v2059_v60 = vmax.f32 %v2053_v11, 0.0 }
 0xb20   :  { %v2066_v17 = vpack.c.bf16 %v2062_v13, %v2062_v13  ;;  %v2067_v46 = vpack.c.bf16 %v2063_v43, %v2063_v43 }
 0xb21   :  { %v2064_v54 = vpack.c.bf16 %v2060_v38, %v2058_v23  ;;  %v2065_v28 = vpack.c.bf16 %v2061_v51, %v2059_v60 }
 0xb22   :  { %v2073_v4 = vsel %vm7690_vm0, %v2066_v17, 0  ;;  %v2076_v50 = vsel %vm7690_vm0, %v2067_v46, 0  ;;  %vm7691_vm0 = vcmask 195584  }
 0xb23   :  { %v2188_v32 = vpop.permute.xlu0 %2187  ;;  %2084 = vmatpush.bf16.msra.mxu2 %v2073_v4  ;;  %2097 = vmatpush.bf16.msra.mxu3 %v2076_v50 }
 0xb24   :  { %v6252_v61 = vsel %vm191_vm9, 0.0, %v2188_v32  ;;  %v6254_v33 = vpop.permute.xlu1 %2106 }
 0xb25   :  { %8100 = vst [vmem:[#allocation34_spill] sm:$0xff] %v6252_v61  ;;  %v6258_v52 = vmul.f32 %v8102_v3, %v6252_v61 }
 0xb26   :  { %8101 = vst [vmem:[#allocation32_spill] sm:$0xff] %v6254_v33 }
 0xb27   :  { %8103 = vst [vmem:[#allocation36_spill] sm:$0xff] %v6258_v52  ;;  %2085 = vmatpush.bf16.msra.mxu2 %v2064_v54  ;;  %2098 = vmatpush.bf16.msra.mxu3 %v2065_v28  ;;  %v2257_v42 = vmul.f32 %v2245_v55, %v6258_v52 }
 0xb29   :  { %2275 = vrot.lane.b32.xlu2 %v2257_v42, %s4313_s12 }
 0xb2a   :  { %4152 = vmatmul.msk.bf16.vlgmr.msra.gmra.mxu2 %vm7691_vm0, %v117_v41  ;;  %4153 = vmatmul.msk.bf16.vlgmr.msra.gmra.mxu3 %vm7691_vm0, %v117_v41 }
 0xb2b   :  { %v6267_v6 = vpop.permute.xlu0 %2219 }
 0xb2c   :  { %8104 = vst [vmem:[#allocation37_spill] sm:$0xff] %v6267_v6  ;;  %v2190_v29 = vpop.permute.xlu1 %2189 }
 0xb2d   :  { %v6270_v37 = vsel %vm191_vm9, %v2188_v32, %v2190_v29  ;;  %v6273_v30 = vsel %vm191_vm9, %v2190_v29, 0.0  ;;  %vm7751_vm9 = vcmask 1040384  }
 0xb2e   :  { %8105 = vst [vmem:[#allocation35_spill] sm:$0xff] %v6270_v37  ;;  %v6277_v5 = vmul.f32 %v8107_v39, %v6270_v37  ;;  %v6281_v53 = vmul.f32 %v8109_v44, %v6273_v30 }
 0xb2f   :  { %8106 = vst [vmem:[#allocation38_spill] sm:$0xff] %v6273_v30 }
 0xb30   :  { %8108 = vst [vmem:[#allocation40_spill] sm:$0xff] %v6277_v5  ;;  %v2259_v62 = vmul.f32 %v2245_v55, %v6281_v53  ;;  %v2258_v27 = vmul.f32 %v2245_v55, %v6277_v5 }
 0xb31   :  { %8110 = vst [vmem:[#allocation41_spill] sm:$0xff] %v6281_v53 }
 0xb32   :  { %2279 = vrot.lane.b32.xlu1 %v2259_v62, %s4313_s12  ;;  %2277 = vrot.lane.b32.xlu0 %v2258_v27, %s4313_s12 }
 0xb33   :  { %v2250_v21 = vpop.permute.xlu0 %2249 }
 0xb34   :  { %v2260_v8 = vmul.f32 %v2250_v21, %v6258_v52  ;;  %v6288_v49 = vpop.permute.xlu1 %2224  ;;  %v2261_v16 = vmul.f32 %v2250_v21, %v6277_v5  ;;  %v2262_v24 = vmul.f32 %v2250_v21, %v6281_v53 }
 0xb36   :  { %2281 = vrot.lane.b32.xlu2 %v2260_v8, %s4313_s12 }
 0xb3a   :  { %2285 = vrot.lane.b32.xlu1 %v2262_v24, %s4313_s12  ;;  %2283 = vrot.lane.b32.xlu0 %v2261_v16, %s4313_s12  ;;  %v8114_v16 = vlaneseq  ;;  %v8115_v24 = vmov 0 }
 0xb3c   :  { %v2255_v56 = vpop.permute.xlu1 %2254  ;;  %vm6347_vm0 = vcmp.lt.s32.totalorder %v8114_v16, 256 }
 0xb3d   :  { %v2263_v59 = vmul.f32 %v2255_v56, %v6258_v52  ;;  %v2264_v45 = vmul.f32 %v2255_v56, %v6277_v5  ;;  %v2265_v18 = vmul.f32 %v2255_v56, %v6281_v53  ;;  %v8116_v24 = vsel %vm6347_vm0, 4294967295, %v8115_v24 }
 0xb3e   :  { %8117 = vst [vmem:[#allocation44_spill] sm:$0xff] %v8116_v24 }
 0xb3f   :  { %2287 = vrot.lane.b32.xlu2 %v2263_v59, %s4313_s12 }
 0xb42   :  { %2291 = vrot.lane.b32.xlu1 %v2265_v18, %s4313_s12  ;;  %2289 = vrot.lane.b32.xlu0 %v2264_v45, %s4313_s12  ;;  %v4166_v18 = vld [vmem:[%s7584_s4 + $0x58] sm:$0xff] }
 0xb47   :  { %2316 = vperm.xlu2 %4263, %v4161_v57   ;;  %v4165_v57 = vld [vmem:[%s7584_s4 + $0x50] sm:$0xff] }
 0xb4a   :  { %2326 = vperm.xlu1 %4264, %v4163_v48   ;;  %2321 = vperm.xlu0 %4262, %v4162_v58   ;;  %v4164_v48 = vld [vmem:[%s7584_s4 + $0x48] sm:$0xff] }
 0xb83   :  { %v6310_v0 = vpop.permute.xlu2 %2275 }
 0xb90   :  { %v6312_v31 = vpop.permute.xlu2 %2281 }
 0xb91   :  { %8111 = vst [vmem:[#allocation39_spill] sm:$0xff] %v6312_v31 }
 0xb99   :  { %v6314_v34 = vpop.permute.xlu2 %2287 }
 0xba1   :  { %v2317_v7 = vpop.permute.xlu2 %2316 }
 0xba2   :  { %v2329_v10 = vmul.f32 %v2317_v7, %v6252_v61  ;;  %v2330_v20 = vmul.f32 %v2317_v7, %v6270_v37  ;;  %v2331_v14 = vmul.f32 %v2317_v7, %v6273_v30 }
 0xba4   :  { %v6319_v25 = vpop.permute.xlu0 %2277  ;;  %2351 = vrot.lane.b32.xlu1 %v2331_v14, %s4311_s11  ;;  %2349 = vrot.lane.b32.xlu0 %v2330_v20, %s4311_s11  ;;  %v6323_v19 = vpop.permute.xlu1 %2279  ;;  %v8119_v20 = vld [vmem:[#allocation11_spill] sm:$0xff] }
 0xba5   :  { %2347 = vrot.lane.b32.xlu2 %v2329_v10, %s4311_s11  ;;  %v6375_v14 = vmul.f32 %v8119_v20, %v6252_v61  ;;  %v8130_v20 = vld [vmem:[#allocation15_spill] sm:$0xff] }
 0xba7   :  { %8120 = vst [vmem:[#allocation46_spill] sm:$0xff] %v6375_v14 }
 0xbac   :  { %v6326_v40 = vpop.permute.xlu0 %2283  ;;  %v6330_v2 = vpop.permute.xlu1 %2285 }
 0xbad   :  { %8112 = vst [vmem:[#allocation42_spill] sm:$0xff] %v6326_v40  ;;  %v2087_v36 = vpop.f32.mrf.mxu2  ;;  %v2100_v11 = vpop.f32.mrf.mxu3 }
 0xbae   :  { %v2109_v13 = vmul.f32 %v6254_v33, %v2087_v36  ;;  %v2110_v43 = vmul.f32 %v6254_v33, %v2100_v11  ;;  %8113 = vst [vmem:[#allocation43_spill] sm:$0xff] %v6330_v2  ;;  %v8121_v36 = vld [vmem:[#allocation13_spill] sm:$0xff] }
 0xbaf   :  { %v6379_v11 = vmul.f32 %v8121_v36, %v6270_v37  ;;  %v6440_v36 = vmul.f32 %v8130_v20, %v6273_v30  ;;  %v4170_v20 = vld [vmem:[%s7584_s4 + $0x78] sm:$0xff] }
 0xbb0   :  { %v2116_v47 = vadd.f32 %v6197_v35, %v2109_v13  ;;  %v2117_v17 = vadd.f32 %v6197_v35, %v2110_v43  ;;  %v8123_v13 = vld [vmem:[#allocation12_spill] sm:$0xff] }
 0xbb1   :  { %8122 = vst [vmem:[#allocation47_spill] sm:$0xff] %v6379_v11  ;;  %v6383_v43 = vmul.f32 %v8123_v13, %v6273_v30 }
 0xbb2   :  { %2118 = vst [vmem:[#allocation2] sm:$0xff] %v2116_v47  ;;  %v2120_v46 = vsub.f32 0.0, %v2116_v47  ;;  %v2121_v23 = vsub.f32 0.0, %v2117_v17 }
 0xbb3   :  { %2119 = vst [vmem:[#allocation2 + $0x8] sm:$0xff] %v2117_v17 }
 0xbb4   :  { %v2122_v60 = vmul.f32 1.442695, %v2120_v46  ;;  %v2124_v4 = vmul.f32 1.442695, %v2121_v23  ;;  %v6334_v50 = vpop.permute.xlu0 %2289  ;;  %v6336_v51 = vpop.permute.xlu1 %2291  ;;  %8124 = vst [vmem:[#allocation48_spill] sm:$0xff] %v6383_v43 }
 0xbb5   :  { %v2102_v32 = vpop.f32.mrf.mxu3  ;;  %v2089_v38 = vpop.f32.mrf.mxu2 }
 0xbb6   :  { %4265 = vpow2.f32 %v2122_v60 }
 0xbb7   :  { %4267 = vpow2.f32 %v2124_v4 }
 0xbbc   :  { %v4266_v3 = vpop.eup %4265  ;;  %v2322_v54 = vpop.permute.xlu0 %2321 }
 0xbbd   :  { %v4268_v28 = vpop.eup %4267  ;;  %v2126_v55 = vadd.f32 1.0, %v4266_v3  ;;  %v2332_v41 = vmul.f32 %v2322_v54, %v6252_v61  ;;  %v2333_v29 = vmul.f32 %v2322_v54, %v6270_v37  ;;  %v2334_v39 = vmul.f32 %v2322_v54, %v6273_v30  ;;  %v2327_v44 = vpop.permute.xlu1 %2326 }
 0xbbe   :  { %v2127_v42 = vadd.f32 1.0, %v4268_v28  ;;  %v2336_v27 = vmul.f32 %v2327_v44, %v6270_v37  ;;  %v2337_v21 = vmul.f32 %v2327_v44, %v6273_v30  ;;  %v2335_v56 = vmul.f32 %v2327_v44, %v6252_v61 }
 0xbbf   :  { %2357 = vrot.lane.b32.xlu1 %v2334_v39, %s4311_s11  ;;  %2355 = vrot.lane.b32.xlu0 %v2333_v29, %s4311_s11 }
 0xbc0   :  { %4269 = vrcp.f32 %v2127_v42  ;;  %2353 = vrot.lane.b32.xlu2 %v2332_v41, %s4311_s11 }
 0xbc1   :  { %4271 = vrcp.f32 %v2126_v55 }
 0xbc6   :  { %v4270_v62 = vpop.eup %4269 }
 0xbc7   :  { %v2132_v8 = vrot.slane %v4270_v62, 7  ;;  %v4272_v59 = vpop.eup %4271  ;;  %2363 = vrot.lane.b32.xlu1 %v2337_v21, %s4311_s11  ;;  %2361 = vrot.lane.b32.xlu0 %v2336_v27, %s4311_s11  ;;  %v4167_v27 = vld [vmem:[%s7584_s4 + $0x60] sm:$0xff]  ;;  %v4169_v21 = vld [vmem:[%s7584_s4 + $0x70] sm:$0xff] }
 0xbc8   :  { %2359 = vrot.lane.b32.xlu2 %v2335_v56, %s4311_s11 }
 0xbc9   :  { %v2134_v45 = vsel %vm7751_vm9, %v4272_v59, %v2132_v8  ;;  %v4168_v8 = vld [vmem:[%s7584_s4 + $0x68] sm:$0xff]  ;;  %vm8192_vm9 = vcmask 785408  }
 0xbca   :  { %2140 = vst.msk [vmem:[#allocation2] ss:$8 sm:$0x3] %vm6347_vm0, %v2134_v45  ;;  %v8128_v45 = vld [vmem:[#allocation14_spill] sm:$0xff]  ;;  %vm8193_vm14 = vmmov %vm8192_vm9 }
 0xbcf   :  { %2398 = vperm.xlu1 %4264, %v4166_v18   ;;  %2393 = vperm.xlu0 %4262, %v4165_v57   ;;  %v6432_v18 = vmul.f32 %v8128_v45, %v6252_v61  ;;  %v8129_v57 = vld [vmem:[#allocation16_spill] sm:$0xff] }
 0xbd0   :  { %2388 = vperm.xlu2 %4263, %v4164_v48   ;;  %v6436_v48 = vmul.f32 %v8129_v57, %v6270_v37 }
 0xbff   :  { %v6367_v58 = vpop.permute.xlu2 %2347 }
 0xc16   :  { %v6385_v47 = vpop.permute.xlu0 %2349  ;;  %v6387_v46 = vpop.permute.xlu1 %2351 }
 0xc1a   :  { %v6369_v7 = vpop.permute.xlu2 %2353 }
 0xc1b   :  { %8118 = vst [vmem:[#allocation45_spill] sm:$0xff] %v6369_v7 }
 0xc22   :  { %v6371_v10 = vpop.permute.xlu2 %2359 }
 0xc2a   :  { %v2389_v17 = vpop.permute.xlu2 %2388 }
 0xc2b   :  { %v2401_v23 = vmul.f32 %v2389_v17, %v6375_v14  ;;  %v2402_v60 = vmul.f32 %v2389_v17, %v6379_v11  ;;  %v2403_v4 = vmul.f32 %v2389_v17, %v6383_v43 }
 0xc2d   :  { %2423 = vrot.lane.b32.xlu1 %v2403_v4, %s4314_s13  ;;  %2421 = vrot.lane.b32.xlu0 %v2402_v60, %s4314_s13 }
 0xc2e   :  { %2419 = vrot.lane.b32.xlu2 %v2401_v23, %s4314_s13 }
 0xc31   :  { %v6395_v32 = vpop.permute.xlu0 %2355  ;;  %v6397_v38 = vpop.permute.xlu1 %2357 }
 0xc32   :  { %8125 = vst [vmem:[#allocation51_spill] sm:$0xff] %v6395_v32 }
 0xc33   :  { %8126 = vst [vmem:[#allocation17_spill] sm:$0xff] %v6397_v38 }
 0xc39   :  { %v6399_v3 = vpop.permute.xlu0 %2361  ;;  %v6401_v54 = vpop.permute.xlu1 %2363 }
 0xc41   :  { %v2394_v28 = vpop.permute.xlu0 %2393  ;;  %v2399_v29 = vpop.permute.xlu1 %2398 }
 0xc42   :  { %v2404_v55 = vmul.f32 %v2394_v28, %v6375_v14  ;;  %v2405_v42 = vmul.f32 %v2394_v28, %v6379_v11  ;;  %v2406_v41 = vmul.f32 %v2394_v28, %v6383_v43  ;;  %v2407_v39 = vmul.f32 %v2399_v29, %v6375_v14 }
 0xc43   :  { %v2408_v44 = vmul.f32 %v2399_v29, %v6379_v11  ;;  %v2409_v62 = vmul.f32 %v2399_v29, %v6383_v43 }
 0xc44   :  { %2425 = vrot.lane.b32.xlu2 %v2404_v55, %s4314_s13  ;;  %2429 = vrot.lane.b32.xlu1 %v2406_v41, %s4314_s13 }
 0xc45   :  { %2427 = vrot.lane.b32.xlu0 %v2405_v42, %s4314_s13 }
 0xc4c   :  { %2431 = vrot.lane.b32.xlu2 %v2407_v39, %s4314_s13  ;;  %2435 = vrot.lane.b32.xlu1 %v2409_v62, %s4314_s13 }
 0xc4d   :  { %2433 = vrot.lane.b32.xlu0 %v2408_v44, %s4314_s13  ;;  %s8281_s13 = smov 79  }
 0xc54   :  { %2460 = vperm.xlu2 %4263, %v4167_v27   ;;  %2470 = vperm.xlu1 %4264, %v4169_v21  }
 0xc55   :  { %2465 = vperm.xlu0 %4262, %v4168_v8  }
 0xc88   :  { %v6424_v16 = vpop.permute.xlu2 %2419 }
 0xc9e   :  { %v6426_v56 = vpop.permute.xlu2 %2425 }
 0xc9f   :  { %8127 = vst [vmem:[#allocation19_spill] sm:$0xff] %v6426_v56  ;;  %v6442_v17 = vpop.permute.xlu0 %2421  ;;  %v6447_v28 = vpop.permute.xlu1 %2423 }
 0xca6   :  { %v6428_v59 = vpop.permute.xlu2 %2431 }
 0xcae   :  { %v2461_v13 = vpop.permute.xlu2 %2460 }
 0xcaf   :  { %v2473_v23 = vmul.f32 %v2461_v13, %v6432_v18  ;;  %v2474_v60 = vmul.f32 %v2461_v13, %v6436_v48  ;;  %v2475_v4 = vmul.f32 %v2461_v13, %v6440_v36  ;;  %v4172_v13 = vld [vmem:[%s7584_s4 + $0x88] sm:$0xff] }
 0xcb1   :  { %2495 = vrot.lane.b32.xlu1 %v2475_v4, %s4315_s14  ;;  %2493 = vrot.lane.b32.xlu0 %v2474_v60, %s4315_s14 }
 0xcb2   :  { %2491 = vrot.lane.b32.xlu2 %v2473_v23, %s4315_s14  ;;  %v4171_v23 = vld [vmem:[%s7584_s4 + $0x80] sm:$0xff] }
 0xcb6   :  { %v6454_v42 = vpop.permute.xlu1 %2429 }
 0xcb7   :  { %v6452_v55 = vpop.permute.xlu0 %2427  ;;  %8132 = vst [vmem:[#allocation18_spill] sm:$0xff] %v6454_v42 }
 0xcb8   :  { %8131 = vst [vmem:[#allocation21_spill] sm:$0xff] %v6452_v55 }
 0xcbe   :  { %v6458_v29 = vpop.permute.xlu1 %2435 }
 0xcbf   :  { %v6456_v41 = vpop.permute.xlu0 %2433 }
 0xcc6   :  { %v2471_v21 = vpop.permute.xlu1 %2470 }
 0xcc7   :  { %v2466_v39 = vpop.permute.xlu0 %2465  ;;  %v2479_v8 = vmul.f32 %v2471_v21, %v6432_v18  ;;  %v2480_v45 = vmul.f32 %v2471_v21, %v6436_v48  ;;  %v2481_v57 = vmul.f32 %v2471_v21, %v6440_v36 }
 0xcc8   :  { %v2476_v44 = vmul.f32 %v2466_v39, %v6432_v18  ;;  %v2477_v62 = vmul.f32 %v2466_v39, %v6436_v48  ;;  %v2478_v27 = vmul.f32 %v2466_v39, %v6440_v36 }
 0xcca   :  { %2497 = vrot.lane.b32.xlu2 %v2476_v44, %s4315_s14  ;;  %2501 = vrot.lane.b32.xlu1 %v2478_v27, %s4315_s14  ;;  %v8135_v44 = vld [vmem:[#allocation5_spill] sm:$0xff]  ;;  %v8136_v27 = vld [vmem:[#allocation6_spill] sm:$0xff] }
 0xccb   :  { %2499 = vrot.lane.b32.xlu0 %v2477_v62, %s4315_s14  ;;  %v6489_v62 = vmul.f32 %v8135_v44, %v6252_v61  ;;  %v6493_v21 = vmul.f32 %v8136_v27, %v6270_v37 }
 0xcd2   :  { %2503 = vrot.lane.b32.xlu2 %v2479_v8, %s4315_s14  ;;  %2507 = vrot.lane.b32.xlu1 %v2481_v57, %s4315_s14  ;;  %v8137_v8 = vld [vmem:[#allocation7_spill] sm:$0xff] }
 0xcd3   :  { %2505 = vrot.lane.b32.xlu0 %v2480_v45, %s4315_s14  ;;  %v6497_v45 = vmul.f32 %v8137_v8, %v6273_v30 }
 0xcd5   :  { %8138 = vst [vmem:[#allocation20_spill] sm:$0xff] %v6497_v45 }
 0xcda   :  { %2532 = vperm.xlu2 %4263, %v4170_v20   ;;  %2542 = vperm.xlu1 %4264, %v4172_v13  }
 0xcdb   :  { %2537 = vperm.xlu0 %4262, %v4171_v23  }
 0xd0c   :  { %v6481_v60 = vpop.permute.xlu2 %2491 }
 0xd0d   :  { %8133 = vst [vmem:[#allocation22_spill] sm:$0xff] %v6481_v60 }
 0xd23   :  { %v6499_v20 = vpop.permute.xlu0 %2493  ;;  %v6504_v35 = vpop.permute.xlu1 %2495 }
 0xd24   :  { %v6483_v4 = vpop.permute.xlu2 %2497  ;;  %8139 = vst [vmem:[#allocation24_spill] sm:$0xff] %v6499_v20 }
 0xd25   :  { %8134 = vst [vmem:[#allocation23_spill] sm:$0xff] %v6483_v4 }
 0xd26   :  { %8140 = vst [vmem:[#allocation25_spill] sm:$0xff] %v6504_v35 }
 0xd2c   :  { %v6485_v39 = vpop.permute.xlu2 %2503 }
 0xd34   :  { %v2533_v57 = vpop.permute.xlu2 %2532 }
 0xd35   :  { %v2545_v13 = vmul.f32 %v2533_v57, %v6489_v62  ;;  %v2546_v23 = vmul.f32 %v2533_v57, %v6493_v21  ;;  %v2547_v24 = vmul.f32 %v2533_v57, %v6497_v45 }
 0xd37   :  { %2567 = vrot.lane.b32.xlu1 %v2547_v24, %s4316_s15  ;;  %2565 = vrot.lane.b32.xlu0 %v2546_v23, %s4316_s15 }
 0xd38   :  { %2563 = vrot.lane.b32.xlu2 %v2545_v13, %s4316_s15 }
 0xd3c   :  { %v6511_v27 = vpop.permute.xlu1 %2501 }
 0xd3d   :  { %v6509_v44 = vpop.permute.xlu0 %2499  ;;  %8142 = vst [vmem:[#allocation50_spill] sm:$0xff] %v6511_v27 }
 0xd3e   :  { %8141 = vst [vmem:[#allocation49_spill] sm:$0xff] %v6509_v44 }
 0xd44   :  { %v6515_v33 = vpop.permute.xlu1 %2507 }
 0xd45   :  { %v6513_v8 = vpop.permute.xlu0 %2505 }
 0xd4c   :  { %v2543_v24 = vpop.permute.xlu1 %2542 }
 0xd4d   :  { %v2538_v26 = vpop.permute.xlu0 %2537  ;;  %v2551_v13 = vmul.f32 %v2543_v24, %v6489_v62  ;;  %v2552_v23 = vmul.f32 %v2543_v24, %v6493_v21  ;;  %v2553_v1 = vmul.f32 %v2543_v24, %v6497_v45 }
 0xd4e   :  { %v2548_v15 = vmul.f32 %v2538_v26, %v6489_v62  ;;  %v2549_v57 = vmul.f32 %v2538_v26, %v6493_v21  ;;  %v2550_v22 = vmul.f32 %v2538_v26, %v6497_v45  ;;  %v4174_v26 = vld [vmem:[%s7584_s4 + $0x98] sm:$0xff] }
 0xd50   :  { %2569 = vrot.lane.b32.xlu2 %v2548_v15, %s4316_s15  ;;  %2573 = vrot.lane.b32.xlu1 %v2550_v22, %s4316_s15  ;;  %v4173_v15 = vld [vmem:[%s7584_s4 + $0x90] sm:$0xff]  ;;  %v4175_v22 = vld [vmem:[%s7584_s4 + $0xa0] sm:$0xff] }
 0xd51   :  { %2571 = vrot.lane.b32.xlu0 %v2549_v57, %s4316_s15 }
 0xd58   :  { %2575 = vrot.lane.b32.xlu2 %v2551_v13, %s4316_s15  ;;  %2579 = vrot.lane.b32.xlu1 %v2553_v1, %s4316_s15 }
 0xd59   :  { %2577 = vrot.lane.b32.xlu0 %v2552_v23, %s4316_s15 }
 0xd60   :  { %2604 = vperm.xlu2 %4263, %v4173_v15   ;;  %2614 = vperm.xlu1 %4264, %v4175_v22  }
 0xd61   :  { %2609 = vperm.xlu0 %4262, %v4174_v26  }
 0xd92   :  { %v6538_v57 = vpop.permute.xlu2 %2563 }
 0xd93   :  { %8143 = vst [vmem:[#allocation54_spill] sm:$0xff] %v6538_v57 }
 0xda9   :  { %v6544_v23 = vpop.permute.xlu0 %2565  ;;  %v6549_v4 = vpop.permute.xlu1 %2567 }
 0xdaa   :  { %v6540_v1 = vpop.permute.xlu2 %2569  ;;  %8145 = vst [vmem:[#allocation53_spill] sm:$0xff] %v6544_v23 }
 0xdab   :  { %8144 = vst [vmem:[#allocation52_spill] sm:$0xff] %v6540_v1 }
 0xdac   :  { %8146 = vst [vmem:[#allocation57_spill] sm:$0xff] %v6549_v4 }
 0xdb2   :  { %v6542_v24 = vpop.permute.xlu2 %2575 }
 0xdba   :  { %v2605_v13 = vpop.permute.xlu2 %2604 }
 0xdbb   :  { %v2617_v12 = vmul.f32 %v2605_v13, %v6258_v52  ;;  %v2618_v63 = vmul.f32 %v2605_v13, %v6277_v5  ;;  %v2619_v27 = vmul.f32 %v2605_v13, %v6281_v53 }
 0xdbd   :  { %2639 = vrot.lane.b32.xlu1 %v2619_v27, %s4317_s16  ;;  %2637 = vrot.lane.b32.xlu0 %v2618_v63, %s4317_s16 }
 0xdbe   :  { %2635 = vrot.lane.b32.xlu2 %v2617_v12, %s4317_s16 }
 0xdc2   :  { %v6556_v22 = vpop.permute.xlu1 %2573 }
 0xdc3   :  { %v6554_v15 = vpop.permute.xlu0 %2571  ;;  %8148 = vst [vmem:[#allocation56_spill] sm:$0xff] %v6556_v22 }
 0xdc4   :  { %8147 = vst [vmem:[#allocation55_spill] sm:$0xff] %v6554_v15 }
 0xdca   :  { %v6560_v1 = vpop.permute.xlu1 %2579 }
 0xdcb   :  { %v6558_v26 = vpop.permute.xlu0 %2577 }
 0xdd2   :  { %v2615_v63 = vpop.permute.xlu1 %2614 }
 0xdd3   :  { %v2610_v44 = vpop.permute.xlu0 %2609  ;;  %v2623_v12 = vmul.f32 %v2615_v63, %v6258_v52  ;;  %v2624_v27 = vmul.f32 %v2615_v63, %v6277_v5  ;;  %v2625_v22 = vmul.f32 %v2615_v63, %v6281_v53 }
 0xdd4   :  { %v2620_v42 = vmul.f32 %v2610_v44, %v6258_v52  ;;  %v2621_v13 = vmul.f32 %v2610_v44, %v6277_v5  ;;  %v2622_v56 = vmul.f32 %v2610_v44, %v6281_v53  ;;  %v4177_v44 = vld [vmem:[%s7584_s4 + $0xb0] sm:$0xff] }
 0xdd6   :  { %2641 = vrot.lane.b32.xlu2 %v2620_v42, %s4317_s16  ;;  %2645 = vrot.lane.b32.xlu1 %v2622_v56, %s4317_s16  ;;  %v4176_v42 = vld [vmem:[%s7584_s4 + $0xa8] sm:$0xff]  ;;  %v4178_v56 = vld [vmem:[%s7584_s4 + $0xb8] sm:$0xff] }
 0xdd7   :  { %2643 = vrot.lane.b32.xlu0 %v2621_v13, %s4317_s16 }
 0xdde   :  { %2647 = vrot.lane.b32.xlu2 %v2623_v12, %s4317_s16  ;;  %2651 = vrot.lane.b32.xlu1 %v2625_v22, %s4317_s16 }
 0xddf   :  { %2649 = vrot.lane.b32.xlu0 %v2624_v27, %s4317_s16  ;;  %s8315_s16 = smov 62  }
 0xde6   :  { %2676 = vperm.xlu2 %4263, %v4176_v42   ;;  %2686 = vperm.xlu1 %4264, %v4178_v56  }
 0xde7   :  { %2681 = vperm.xlu0 %4262, %v4177_v44  }
 0xe18   :  { %v6583_v13 = vpop.permute.xlu2 %2635 }
 0xe19   :  { %8149 = vst [vmem:[#allocation58_spill] sm:$0xff] %v6583_v13 }
 0xe2f   :  { %v6589_v27 = vpop.permute.xlu0 %2637  ;;  %v6594_v7 = vpop.permute.xlu1 %2639 }
 0xe30   :  { %v6585_v22 = vpop.permute.xlu2 %2641  ;;  %8151 = vst [vmem:[#allocation60_spill] sm:$0xff] %v6589_v27 }
 0xe31   :  { %8150 = vst [vmem:[#allocation59_spill] sm:$0xff] %v6585_v22 }
 0xe32   :  { %8152 = vst [vmem:[#allocation61_spill] sm:$0xff] %v6594_v7 }
 0xe38   :  { %v6587_v63 = vpop.permute.xlu2 %2647 }
 0xe40   :  { %v2677_v12 = vpop.permute.xlu2 %2676 }
 0xe41   :  { %v2689_v15 = vmul.f32 %v2677_v12, %v6252_v61  ;;  %v2690_v55 = vmul.f32 %v2677_v12, %v6270_v37  ;;  %v2691_v38 = vmul.f32 %v2677_v12, %v6273_v30 }
 0xe43   :  { %2711 = vrot.lane.b32.xlu1 %v2691_v38, %s4312_s3  ;;  %2709 = vrot.lane.b32.xlu0 %v2690_v55, %s4312_s3 }
 0xe44   :  { %2707 = vrot.lane.b32.xlu2 %v2689_v15, %s4312_s3 }
 0xe48   :  { %v6601_v56 = vpop.permute.xlu1 %2645 }
 0xe49   :  { %v6599_v42 = vpop.permute.xlu0 %2643  ;;  %8154 = vst [vmem:[#allocation63_spill] sm:$0xff] %v6601_v56 }
 0xe4a   :  { %8153 = vst [vmem:[#allocation65_spill] sm:$0xff] %v6599_v42 }
 0xe50   :  { %v6605_v22 = vpop.permute.xlu1 %2651 }
 0xe51   :  { %v6603_v44 = vpop.permute.xlu0 %2649 }
 0xe58   :  { %v2687_v38 = vpop.permute.xlu1 %2686 }
 0xe59   :  { %v2682_v32 = vpop.permute.xlu0 %2681  ;;  %v2695_v55 = vmul.f32 %v2687_v38, %v6252_v61  ;;  %v2696_v15 = vmul.f32 %v2687_v38, %v6270_v37  ;;  %v2697_v56 = vmul.f32 %v2687_v38, %v6273_v30 }
 0xe5a   :  { %v2692_v2 = vmul.f32 %v2682_v32, %v6252_v61  ;;  %v2693_v12 = vmul.f32 %v2682_v32, %v6270_v37  ;;  %v2694_v6 = vmul.f32 %v2682_v32, %v6273_v30  ;;  %v4180_v32 = vld [vmem:[%s7584_s4 + $0xc8] sm:$0xff] }
 0xe5c   :  { %2713 = vrot.lane.b32.xlu2 %v2692_v2, %s4312_s3  ;;  %2717 = vrot.lane.b32.xlu1 %v2694_v6, %s4312_s3  ;;  %v4179_v2 = vld [vmem:[%s7584_s4 + $0xc0] sm:$0xff]  ;;  %v4181_v6 = vld [vmem:[%s7584_s4 + $0xd0] sm:$0xff] }
 0xe5d   :  { %2715 = vrot.lane.b32.xlu0 %v2693_v12, %s4312_s3 }
 0xe64   :  { %2719 = vrot.lane.b32.xlu2 %v2695_v55, %s4312_s3  ;;  %2723 = vrot.lane.b32.xlu1 %v2697_v56, %s4312_s3 }
 0xe65   :  { %2721 = vrot.lane.b32.xlu0 %v2696_v15, %s4312_s3 }
 0xe6c   :  { %2748 = vperm.xlu2 %4263, %v4179_v2   ;;  %2758 = vperm.xlu1 %4264, %v4181_v6  }
 0xe6d   :  { %2753 = vperm.xlu0 %4262, %v4180_v32  }
 0xe9e   :  { %v6628_v12 = vpop.permute.xlu2 %2707 }
 0xe9f   :  { %8155 = vst [vmem:[#allocation62_spill] sm:$0xff] %v6628_v12 }
 0xeb5   :  { %v6634_v15 = vpop.permute.xlu0 %2709  ;;  %v6639_v7 = vpop.permute.xlu1 %2711 }
 0xeb6   :  { %v6630_v56 = vpop.permute.xlu2 %2713  ;;  %8157 = vst [vmem:[#allocation66_spill] sm:$0xff] %v6634_v15 }
 0xeb7   :  { %8156 = vst [vmem:[#allocation67_spill] sm:$0xff] %v6630_v56 }
 0xeb8   :  { %8158 = vst [vmem:[#allocation64_spill] sm:$0xff] %v6639_v7 }
 0xebe   :  { %v6632_v38 = vpop.permute.xlu2 %2719 }
 0xec6   :  { %v2749_v55 = vpop.permute.xlu2 %2748 }
 0xec7   :  { %v2761_v42 = vmul.f32 %v2749_v55, %v6375_v14  ;;  %v2762_v31 = vmul.f32 %v2749_v55, %v6379_v11  ;;  %v2763_v40 = vmul.f32 %v2749_v55, %v6383_v43 }
 0xec9   :  { %2783 = vrot.lane.b32.xlu1 %v2763_v40, %s4318_s17  ;;  %2781 = vrot.lane.b32.xlu0 %v2762_v31, %s4318_s17 }
 0xeca   :  { %2779 = vrot.lane.b32.xlu2 %v2761_v42, %s4318_s17 }
 0xece   :  { %v6646_v6 = vpop.permute.xlu1 %2717 }
 0xecf   :  { %v6644_v2 = vpop.permute.xlu0 %2715  ;;  %8160 = vst [vmem:[#allocation68_spill] sm:$0xff] %v6646_v6 }
 0xed0   :  { %8159 = vst [vmem:[#allocation70_spill] sm:$0xff] %v6644_v2 }
 0xed6   :  { %v6650_v56 = vpop.permute.xlu1 %2723 }
 0xed7   :  { %v6648_v32 = vpop.permute.xlu0 %2721 }
 0xede   :  { %v2759_v31 = vpop.permute.xlu1 %2758 }
 0xedf   :  { %v2754_v12 = vpop.permute.xlu0 %2753  ;;  %v2767_v40 = vmul.f32 %v2759_v31, %v6375_v14  ;;  %v2768_v42 = vmul.f32 %v2759_v31, %v6379_v11  ;;  %v2769_v6 = vmul.f32 %v2759_v31, %v6383_v43 }
 0xee0   :  { %v2764_v15 = vmul.f32 %v2754_v12, %v6375_v14  ;;  %v2765_v55 = vmul.f32 %v2754_v12, %v6379_v11  ;;  %v2766_v7 = vmul.f32 %v2754_v12, %v6383_v43  ;;  %v4182_v12 = vld [vmem:[%s7584_s4 + $0xd8] sm:$0xff] }
 0xee2   :  { %2785 = vrot.lane.b32.xlu2 %v2764_v15, %s4318_s17  ;;  %2789 = vrot.lane.b32.xlu1 %v2766_v7, %s4318_s17  ;;  %v4184_v7 = vld [vmem:[%s7584_s4 + $0xe8] sm:$0xff]  ;;  %v4183_v15 = vld [vmem:[%s7584_s4 + $0xe0] sm:$0xff] }
 0xee3   :  { %2787 = vrot.lane.b32.xlu0 %v2765_v55, %s4318_s17 }
 0xeea   :  { %2791 = vrot.lane.b32.xlu2 %v2767_v40, %s4318_s17  ;;  %2795 = vrot.lane.b32.xlu1 %v2769_v6, %s4318_s17 }
 0xeeb   :  { %2793 = vrot.lane.b32.xlu0 %v2768_v42, %s4318_s17 }
 0xef2   :  { %2820 = vperm.xlu2 %4263, %v4182_v12   ;;  %2830 = vperm.xlu1 %4264, %v4184_v7  }
 0xef3   :  { %2825 = vperm.xlu0 %4262, %v4183_v15  }
 0xf24   :  { %v6673_v55 = vpop.permute.xlu2 %2779 }
 0xf25   :  { %8161 = vst [vmem:[#allocation69_spill] sm:$0xff] %v6673_v55 }
 0xf3b   :  { %v6679_v42 = vpop.permute.xlu0 %2781  ;;  %v6684_v4 = vpop.permute.xlu1 %2783 }
 0xf3c   :  { %v6675_v6 = vpop.permute.xlu2 %2785  ;;  %8163 = vst [vmem:[#allocation72_spill] sm:$0xff] %v6679_v42 }
 0xf3d   :  { %8162 = vst [vmem:[#allocation74_spill] sm:$0xff] %v6675_v6 }
 0xf3e   :  { %8164 = vst [vmem:[#allocation71_spill] sm:$0xff] %v6684_v4 }
 0xf44   :  { %v6677_v31 = vpop.permute.xlu2 %2791 }
 0xf4c   :  { %v2821_v40 = vpop.permute.xlu2 %2820 }
 0xf4d   :  { %v2833_v2 = vmul.f32 %v2821_v40, %v6432_v18  ;;  %v2834_v13 = vmul.f32 %v2821_v40, %v6436_v48  ;;  %v2835_v27 = vmul.f32 %v2821_v40, %v6440_v36 }
 0xf4f   :  { %2855 = vrot.lane.b32.xlu1 %v2835_v27, %s4319_s23  ;;  %2853 = vrot.lane.b32.xlu0 %v2834_v13, %s4319_s23 }
 0xf50   :  { %2851 = vrot.lane.b32.xlu2 %v2833_v2, %s4319_s23 }
 0xf54   :  { %v6691_v7 = vpop.permute.xlu1 %2789 }
 0xf55   :  { %v6689_v12 = vpop.permute.xlu0 %2787  ;;  %8166 = vst [vmem:[#allocation75_spill] sm:$0xff] %v6691_v7 }
 0xf56   :  { %8165 = vst [vmem:[#allocation76_spill] sm:$0xff] %v6689_v12 }
 0xf5c   :  { %v6695_v6 = vpop.permute.xlu1 %2795 }
 0xf5d   :  { %v6693_v15 = vpop.permute.xlu0 %2793 }
 0xf64   :  { %v2831_v13 = vpop.permute.xlu1 %2830 }
 0xf65   :  { %v2826_v55 = vpop.permute.xlu0 %2825  ;;  %v2839_v27 = vmul.f32 %v2831_v13, %v6432_v18  ;;  %v2840_v2 = vmul.f32 %v2831_v13, %v6436_v48  ;;  %v2841_v7 = vmul.f32 %v2831_v13, %v6440_v36 }
 0xf66   :  { %v2836_v42 = vmul.f32 %v2826_v55, %v6432_v18  ;;  %v2837_v40 = vmul.f32 %v2826_v55, %v6436_v48  ;;  %v2838_v4 = vmul.f32 %v2826_v55, %v6440_v36  ;;  %v4185_v55 = vld [vmem:[%s7584_s4 + $0xf0] sm:$0xff] }
 0xf68   :  { %2857 = vrot.lane.b32.xlu2 %v2836_v42, %s4319_s23  ;;  %2861 = vrot.lane.b32.xlu1 %v2838_v4, %s4319_s23  ;;  %v4187_v4 = vld [vmem:[%s7584_s4 + $0x100] sm:$0xff]  ;;  %v4186_v42 = vld [vmem:[%s7584_s4 + $0xf8] sm:$0xff] }
 0xf69   :  { %2859 = vrot.lane.b32.xlu0 %v2837_v40, %s4319_s23 }
 0xf70   :  { %2863 = vrot.lane.b32.xlu2 %v2839_v27, %s4319_s23  ;;  %2867 = vrot.lane.b32.xlu1 %v2841_v7, %s4319_s23 }
 0xf71   :  { %2865 = vrot.lane.b32.xlu0 %v2840_v2, %s4319_s23 }
 0xf78   :  { %2892 = vperm.xlu2 %4263, %v4185_v55   ;;  %2902 = vperm.xlu1 %4264, %v4187_v4  }
 0xf79   :  { %2897 = vperm.xlu0 %4262, %v4186_v42  }
 0xfaa   :  { %v6718_v40 = vpop.permute.xlu2 %2851 }
 0xfab   :  { %8167 = vst [vmem:[#allocation73_spill] sm:$0xff] %v6718_v40 }
 0xfc1   :  { %v6724_v2 = vpop.permute.xlu0 %2853  ;;  %v6729_v35 = vpop.permute.xlu1 %2855 }
 0xfc2   :  { %v6720_v7 = vpop.permute.xlu2 %2857  ;;  %8169 = vst [vmem:[#allocation77_spill] sm:$0xff] %v6724_v2 }
 0xfc3   :  { %8168 = vst [vmem:[#allocation79_spill] sm:$0xff] %v6720_v7 }
 0xfc4   :  { %8170 = vst [vmem:[#allocation78_spill] sm:$0xff] %v6729_v35 }
 0xfca   :  { %v6722_v13 = vpop.permute.xlu2 %2863 }
 0xfd2   :  { %v2893_v27 = vpop.permute.xlu2 %2892 }
 0xfd3   :  { %v2905_v12 = vmul.f32 %v2893_v27, %v6489_v62  ;;  %v2906_v57 = vmul.f32 %v2893_v27, %v6493_v21  ;;  %v2907_v23 = vmul.f32 %v2893_v27, %v6497_v45 }
 0xfd5   :  { %2927 = vrot.lane.b32.xlu1 %v2907_v23, %s4320_s1  ;;  %2925 = vrot.lane.b32.xlu0 %v2906_v57, %s4320_s1 }
 0xfd6   :  { %2923 = vrot.lane.b32.xlu2 %v2905_v12, %s4320_s1 }
 0xfda   :  { %v6736_v4 = vpop.permute.xlu1 %2861 }
 0xfdb   :  { %v6734_v55 = vpop.permute.xlu0 %2859  ;;  %8172 = vst [vmem:[#allocation81_spill] sm:$0xff] %v6736_v4 }
 0xfdc   :  { %8171 = vst [vmem:[#allocation83_spill] sm:$0xff] %v6734_v55 }
 0xfe2   :  { %v6740_v7 = vpop.permute.xlu1 %2867 }
 0xfe3   :  { %v6738_v42 = vpop.permute.xlu0 %2865 }
 0xfea   :  { %v2903_v57 = vpop.permute.xlu1 %2902 }
 0xfeb   :  { %v2898_v40 = vpop.permute.xlu0 %2897  ;;  %v2911_v23 = vmul.f32 %v2903_v57, %v6489_v62  ;;  %v2912_v12 = vmul.f32 %v2903_v57, %v6493_v21  ;;  %v2913_v4 = vmul.f32 %v2903_v57, %v6497_v45 }
 0xfec   :  { %v2908_v2 = vmul.f32 %v2898_v40, %v6489_v62  ;;  %v2909_v27 = vmul.f32 %v2898_v40, %v6493_v21  ;;  %v2910_v35 = vmul.f32 %v2898_v40, %v6497_v45  ;;  %v4188_v40 = vld [vmem:[%s7584_s4 + $0x108] sm:$0xff] }
 0xfee   :  { %2929 = vrot.lane.b32.xlu2 %v2908_v2, %s4320_s1  ;;  %2933 = vrot.lane.b32.xlu1 %v2910_v35, %s4320_s1  ;;  %v4190_v35 = vld [vmem:[%s7584_s4 + $0x118] sm:$0xff]  ;;  %v4189_v2 = vld [vmem:[%s7584_s4 + $0x110] sm:$0xff] }
 0xfef   :  { %2931 = vrot.lane.b32.xlu0 %v2909_v27, %s4320_s1 }
 0xff6   :  { %2935 = vrot.lane.b32.xlu2 %v2911_v23, %s4320_s1  ;;  %2939 = vrot.lane.b32.xlu1 %v2913_v4, %s4320_s1 }
 0xff7   :  { %2937 = vrot.lane.b32.xlu0 %v2912_v12, %s4320_s1  ;;  %s8314_s1 = smov 63  }
 0xffe   :  { %2964 = vperm.xlu2 %4263, %v4188_v40   ;;  %2974 = vperm.xlu1 %4264, %v4190_v35  }
 0xfff   :  { %2969 = vperm.xlu0 %4262, %v4189_v2  }
0x1030   :  { %v6763_v27 = vpop.permute.xlu2 %2923 }
0x1031   :  { %8173 = vst [vmem:[#allocation80_spill] sm:$0xff] %v6763_v27 }
0x1047   :  { %v6769_v12 = vpop.permute.xlu0 %2925  ;;  %v6774_v20 = vpop.permute.xlu1 %2927 }
0x1048   :  { %v6765_v4 = vpop.permute.xlu2 %2929  ;;  %8175 = vst [vmem:[#allocation84_spill] sm:$0xff] %v6769_v12 }
0x1049   :  { %8174 = vst [vmem:[#allocation85_spill] sm:$0xff] %v6765_v4 }
0x104a   :  { %8176 = vst [vmem:[#allocation82_spill] sm:$0xff] %v6774_v20 }
0x1050   :  { %v6767_v57 = vpop.permute.xlu2 %2935 }
0x1058   :  { %v2965_v23 = vpop.permute.xlu2 %2964 }
0x1059   :  { %v2977_v45 = vmul.f32 %v2965_v23, %v6258_v52  ;;  %v2978_v55 = vmul.f32 %v2965_v23, %v6277_v5  ;;  %v2979_v60 = vmul.f32 %v2965_v23, %v6281_v53 }
0x105b   :  { %2999 = vrot.lane.b32.xlu1 %v2979_v60, %s4321_s22  ;;  %2997 = vrot.lane.b32.xlu0 %v2978_v55, %s4321_s22 }
0x105c   :  { %2995 = vrot.lane.b32.xlu2 %v2977_v45, %s4321_s22 }
0x1060   :  { %v6781_v35 = vpop.permute.xlu1 %2933 }
0x1061   :  { %v6779_v40 = vpop.permute.xlu0 %2931  ;;  %8178 = vst [vmem:[#allocation86_spill] sm:$0xff] %v6781_v35 }
0x1062   :  { %8177 = vst [vmem:[#allocation88_spill] sm:$0xff] %v6779_v40 }
0x1068   :  { %v6785_v4 = vpop.permute.xlu1 %2939 }
0x1069   :  { %v6783_v2 = vpop.permute.xlu0 %2937 }
0x1070   :  { %v2975_v60 = vpop.permute.xlu1 %2974 }
0x1071   :  { %v2970_v27 = vpop.permute.xlu0 %2969  ;;  %v2983_v45 = vmul.f32 %v2975_v60, %v6258_v52  ;;  %v2984_v55 = vmul.f32 %v2975_v60, %v6277_v5  ;;  %v2985_v35 = vmul.f32 %v2975_v60, %v6281_v53 }
0x1072   :  { %v2980_v12 = vmul.f32 %v2970_v27, %v6258_v52  ;;  %v2981_v23 = vmul.f32 %v2970_v27, %v6277_v5  ;;  %v2982_v20 = vmul.f32 %v2970_v27, %v6281_v53  ;;  %v4191_v27 = vld [vmem:[%s7584_s4 + $0x120] sm:$0xff] }
0x1074   :  { %3001 = vrot.lane.b32.xlu2 %v2980_v12, %s4321_s22  ;;  %3005 = vrot.lane.b32.xlu1 %v2982_v20, %s4321_s22  ;;  %v4193_v20 = vld [vmem:[%s7584_s4 + $0x130] sm:$0xff]  ;;  %v4192_v12 = vld [vmem:[%s7584_s4 + $0x128] sm:$0xff] }
0x1075   :  { %3003 = vrot.lane.b32.xlu0 %v2981_v23, %s4321_s22 }
0x107c   :  { %3007 = vrot.lane.b32.xlu2 %v2983_v45, %s4321_s22  ;;  %3011 = vrot.lane.b32.xlu1 %v2985_v35, %s4321_s22 }
0x107d   :  { %3009 = vrot.lane.b32.xlu0 %v2984_v55, %s4321_s22 }
0x1084   :  { %3036 = vperm.xlu2 %4263, %v4191_v27   ;;  %3046 = vperm.xlu1 %4264, %v4193_v20  }
0x1085   :  { %3041 = vperm.xlu0 %4262, %v4192_v12  }
0x10b6   :  { %v6808_v23 = vpop.permute.xlu2 %2995 }
0x10b7   :  { %8179 = vst [vmem:[#allocation87_spill] sm:$0xff] %v6808_v23 }
0x10cd   :  { %v6814_v55 = vpop.permute.xlu0 %2997  ;;  %v6819_v40 = vpop.permute.xlu1 %2999 }
0x10ce   :  { %v6810_v35 = vpop.permute.xlu2 %3001  ;;  %8181 = vst [vmem:[#allocation90_spill] sm:$0xff] %v6814_v55 }
0x10cf   :  { %8180 = vst [vmem:[#allocation92_spill] sm:$0xff] %v6810_v35 }
0x10d0   :  { %8182 = vst [vmem:[#allocation89_spill] sm:$0xff] %v6819_v40 }
0x10d6   :  { %v6812_v60 = vpop.permute.xlu2 %3007 }
0x10de   :  { %v3037_v45 = vpop.permute.xlu2 %3036 }
0x10df   :  { %v3049_v53 = vmul.f32 %v3037_v45, %v6252_v61  ;;  %v3050_v5 = vmul.f32 %v3037_v45, %v6270_v37  ;;  %v3051_v52 = vmul.f32 %v3037_v45, %v6273_v30 }
0x10e1   :  { %3071 = vrot.lane.b32.xlu1 %v3051_v52, %s4322_s29  ;;  %3069 = vrot.lane.b32.xlu0 %v3050_v5, %s4322_s29 }
0x10e2   :  { %3067 = vrot.lane.b32.xlu2 %v3049_v53, %s4322_s29 }
0x10e6   :  { %v6826_v20 = vpop.permute.xlu1 %3005 }
0x10e7   :  { %v6824_v27 = vpop.permute.xlu0 %3003  ;;  %8184 = vst [vmem:[#allocation93_spill] sm:$0xff] %v6826_v20 }
0x10e8   :  { %8183 = vst [vmem:[#allocation94_spill] sm:$0xff] %v6824_v27 }
0x10ee   :  { %v6830_v35 = vpop.permute.xlu1 %3011 }
0x10ef   :  { %v6828_v12 = vpop.permute.xlu0 %3009 }
0x10f6   :  { %v3047_v52 = vpop.permute.xlu1 %3046 }
0x10f7   :  { %v3042_v23 = vpop.permute.xlu0 %3041  ;;  %v3055_v5 = vmul.f32 %v3047_v52, %v6252_v61  ;;  %v3056_v53 = vmul.f32 %v3047_v52, %v6270_v37  ;;  %v3057_v20 = vmul.f32 %v3047_v52, %v6273_v30 }
0x10f8   :  { %v3052_v55 = vmul.f32 %v3042_v23, %v6252_v61  ;;  %v3053_v45 = vmul.f32 %v3042_v23, %v6270_v37  ;;  %v3054_v40 = vmul.f32 %v3042_v23, %v6273_v30  ;;  %v4194_v23 = vld [vmem:[%s7584_s4 + $0x138] sm:$0xff] }
0x10fa   :  { %3073 = vrot.lane.b32.xlu2 %v3052_v55, %s4322_s29  ;;  %3077 = vrot.lane.b32.xlu1 %v3054_v40, %s4322_s29  ;;  %v4196_v40 = vld [vmem:[%s7584_s4 + $0x148] sm:$0xff]  ;;  %v4195_v55 = vld [vmem:[%s7584_s4 + $0x140] sm:$0xff] }
0x10fb   :  { %3075 = vrot.lane.b32.xlu0 %v3053_v45, %s4322_s29 }
0x1102   :  { %3079 = vrot.lane.b32.xlu2 %v3055_v5, %s4322_s29  ;;  %3083 = vrot.lane.b32.xlu1 %v3057_v20, %s4322_s29 }
0x1103   :  { %3081 = vrot.lane.b32.xlu0 %v3056_v53, %s4322_s29 }
0x110a   :  { %3108 = vperm.xlu2 %4263, %v4194_v23   ;;  %3118 = vperm.xlu1 %4264, %v4196_v40  }
0x110b   :  { %3113 = vperm.xlu0 %4262, %v4195_v55  }
0x113c   :  { %v6853_v45 = vpop.permute.xlu2 %3067 }
0x113d   :  { %8185 = vst [vmem:[#allocation91_spill] sm:$0xff] %v6853_v45 }
0x1153   :  { %v6857_v53 = vpop.permute.xlu1 %3071  ;;  %v6859_v30 = vpop.permute.xlu0 %3069 }
0x1154   :  { %v6855_v20 = vpop.permute.xlu2 %3073  ;;  %8187 = vst [vmem:[#allocation95_spill] sm:$0xff] %v6857_v53 }
0x1155   :  { %8186 = vst [vmem:[#allocation97_spill] sm:$0xff] %v6855_v20 }
0x1156   :  { %8188 = vst [vmem:[#allocation96_spill] sm:$0xff] %v6859_v30 }
0x115c   :  { %v3080_v52 = vpop.permute.xlu2 %3079 }
0x1164   :  { %v3109_v5 = vpop.permute.xlu2 %3108 }
0x1165   :  { %v3121_v37 = vmul.f32 %v3109_v5, %v6375_v14  ;;  %v3122_v61 = vmul.f32 %v3109_v5, %v6379_v11  ;;  %v3123_v27 = vmul.f32 %v3109_v5, %v6383_v43 }
0x1167   :  { %3143 = vrot.lane.b32.xlu1 %v3123_v27, %s4323_s25  ;;  %3141 = vrot.lane.b32.xlu0 %v3122_v61, %s4323_s25 }
0x1168   :  { %3139 = vrot.lane.b32.xlu2 %v3121_v37, %s4323_s25 }
0x116c   :  { %v6867_v23 = vpop.permute.xlu1 %3077 }
0x116d   :  { %8189 = vst [vmem:[#allocation101_spill] sm:$0xff] %v6867_v23  ;;  %v6869_v40 = vpop.permute.xlu0 %3075 }
0x116e   :  { %8190 = vst [vmem:[#allocation99_spill] sm:$0xff] %v6869_v40 }
0x1174   :  { %v3084_v55 = vpop.permute.xlu1 %3083 }
0x1175   :  { %v3082_v20 = vpop.permute.xlu0 %3081 }
0x1176   :  { %v6872_v53 = vsel %vm1109_vm1, %v3080_v52, %v3082_v20  ;;  %v6875_v45 = vsel %vm1109_vm1, %v3082_v20, %v3084_v55  ;;  %v4199_v55 = vld [vmem:[%s7584_s4 + $0x160] sm:$0xff] }
0x117c   :  { %v3119_v37 = vpop.permute.xlu1 %3118 }
0x117d   :  { %v3114_v30 = vpop.permute.xlu0 %3113  ;;  %v3127_v52 = vmul.f32 %v3119_v37, %v6375_v14  ;;  %v3128_v23 = vmul.f32 %v3119_v37, %v6379_v11  ;;  %v3129_v20 = vmul.f32 %v3119_v37, %v6383_v43 }
0x117e   :  { %v3124_v5 = vmul.f32 %v3114_v30, %v6375_v14  ;;  %v3125_v27 = vmul.f32 %v3114_v30, %v6379_v11  ;;  %v3126_v61 = vmul.f32 %v3114_v30, %v6383_v43  ;;  %v4197_v30 = vld [vmem:[%s7584_s4 + $0x150] sm:$0xff]  ;;  %v2297_v43 = vsel %vm295_vm4, %v6314_v34, %v6334_v50 }
0x117f   :  { %v2231_v11 = vmul.f32 %v6288_v49, %v6489_v62  ;;  %v2370_v34 = vsel %vm369_vm5, %v6399_v3, %v6401_v54  ;;  %v2441_v14 = vsel %vm443_vm6, %v6428_v59, %v6456_v41  ;;  %v2585_v54 = vsel %vm591_vm10, %v6542_v24, %v6558_v26 }
0x1180   :  { %3145 = vrot.lane.b32.xlu2 %v3124_v5, %s4323_s25  ;;  %3149 = vrot.lane.b32.xlu1 %v3126_v61, %s4323_s25  ;;  %v4198_v5 = vld [vmem:[%s7584_s4 + $0x158] sm:$0xff]  ;;  %v2586_v59 = vsel %vm591_vm10, %v6558_v26, %v6560_v1  ;;  %v2729_v1 = vsel %vm739_vm8, %v6632_v38, %v6648_v32  ;;  %v2730_v26 = vsel %vm739_vm8, %v6648_v32, %v6650_v56 }
0x1181   :  { %3147 = vrot.lane.b32.xlu0 %v3125_v27, %s4323_s25  ;;  %v2873_v38 = vsel %vm887_vm13, %v6722_v13, %v6738_v42  ;;  %v2874_v56 = vsel %vm887_vm13, %v6738_v42, %v6740_v7  ;;  %v3017_v42 = vsel %vm8194_vm15, %v6812_v60, %v6828_v12  ;;  %vm8218_vm15 = vmmov %vm8192_vm9 }
0x1188   :  { %3151 = vrot.lane.b32.xlu2 %v3127_v52, %s4323_s25  ;;  %3155 = vrot.lane.b32.xlu1 %v3129_v20, %s4323_s25 }
0x1189   :  { %3153 = vrot.lane.b32.xlu0 %v3128_v23, %s4323_s25  ;;  %s8191_s25 = smov 92  }
0x1190   :  { %3180 = vperm.xlu2 %4263, %v4197_v30   ;;  %3190 = vperm.xlu1 %4264, %v4199_v55   ;;  %v2298_v30 = vsel %vm295_vm4, %v6334_v50, %v6336_v51  ;;  %v2442_v50 = vsel %vm443_vm6, %v6456_v41, %v6458_v29  ;;  %v2513_v51 = vsel %vm517_vm7, %v6485_v39, %v6513_v8 }
0x1191   :  { %3185 = vperm.xlu0 %4262, %v4198_v5   ;;  %v2232_v5 = vmul.f32 %v6288_v49, %v6493_v21 }
0x11c2   :  { %v3140_v27 = vpop.permute.xlu2 %3139 }
0x11d9   :  { %v3144_v61 = vpop.permute.xlu1 %3143  ;;  %v3142_v37 = vpop.permute.xlu0 %3141 }
0x11da   :  { %v6899_v23 = vsel %vm1183_vm2, %v3140_v27, %v3142_v37  ;;  %v6902_v52 = vsel %vm1183_vm2, %v3142_v37, %v3144_v61  ;;  %v3146_v20 = vpop.permute.xlu2 %3145  ;;  %v2369_v27 = vsel %vm369_vm5, %v6371_v10, %v6399_v3  ;;  %v2309_v61 = vadd.f32 %v2297_v43, %v2231_v11 }
0x11db   :  { %v2310_v37 = vadd.f32 %v2298_v30, %v2232_v5  ;;  %v2514_v11 = vsel %vm517_vm7, %v6513_v8, %v6515_v33  ;;  %v2657_v33 = vsel %vm665_vm11, %v6587_v63, %v6603_v44  ;;  %v2658_v8 = vsel %vm665_vm11, %v6603_v44, %v6605_v22 }
0x11dc   :  { %v2381_v40 = vadd.f32 %v2369_v27, %v2309_v61  ;;  %v2801_v22 = vsel %vm813_vm12, %v6677_v31, %v6693_v15  ;;  %v2802_v44 = vsel %vm813_vm12, %v6693_v15, %v6695_v6  ;;  %v2945_v31 = vsel %vm8192_vm9, %v6767_v57, %v6783_v2 }
0x11dd   :  { %v2382_v49 = vadd.f32 %v2370_v34, %v2310_v37  ;;  %v2946_v6 = vsel %vm8193_vm14, %v6783_v2, %v6785_v4  ;;  %v3018_v57 = vsel %vm8195_vm3, %v6828_v12, %v6830_v35  ;;  %vm8216_vm14 = vmmov %vm8192_vm9  ;;  %vm8234_vm9 = vcmask 752640  }
0x11de   :  { %v2453_v10 = vadd.f32 %v2441_v14, %v2381_v40 }
0x11df   :  { %v2454_v43 = vadd.f32 %v2442_v50, %v2382_v49 }
0x11e0   :  { %v2525_v3 = vadd.f32 %v2513_v51, %v2453_v10 }
0x11e1   :  { %v2526_v29 = vadd.f32 %v2514_v11, %v2454_v43 }
0x11e2   :  { %v3152_v55 = vpop.permute.xlu2 %3151  ;;  %v2597_v24 = vadd.f32 %v2585_v54, %v2525_v3 }
0x11e3   :  { %v2598_v40 = vadd.f32 %v2586_v59, %v2526_v29 }
0x11e4   :  { %v2669_v63 = vadd.f32 %v2657_v33, %v2597_v24  ;;  %v4202_v33 = vld [vmem:[%s7584_s4 + $0x178] sm:$0xff]  ;;  %v2293_v24 = vsel %vm295_vm4, %v6310_v0, %v6319_v25 }
0x11e5   :  { %v2670_v5 = vadd.f32 %v2658_v8, %v2598_v40  ;;  %v4201_v8 = vld [vmem:[%s7584_s4 + $0x170] sm:$0xff]  ;;  %v2294_v40 = vsel %vm295_vm4, %v6319_v25, %v6323_v19  ;;  %v2437_v25 = vsel %vm443_vm6, %v6424_v16, %v6442_v17  ;;  %v2438_v19 = vsel %vm443_vm6, %v6442_v17, %v6447_v28 }
0x11e6   :  { %v2741_v27 = vadd.f32 %v2729_v1, %v2669_v63  ;;  %v2227_v1 = vmul.f32 %v6239_v9, %v6489_v62  ;;  %v2365_v63 = vsel %vm369_vm5, %v6367_v58, %v6385_v47 }
0x11e7   :  { %v2742_v61 = vadd.f32 %v2730_v26, %v2670_v5  ;;  %v2228_v26 = vmul.f32 %v6239_v9, %v6493_v21  ;;  %v2366_v5 = vsel %vm369_vm5, %v6385_v47, %v6387_v46 }
0x11e8   :  { %v2813_v32 = vadd.f32 %v2801_v22, %v2741_v27  ;;  %v2305_v22 = vadd.f32 %v2293_v24, %v2227_v1  ;;  %v8196_v27 = vld [vmem:[#allocation24_spill] sm:$0xff] }
0x11e9   :  { %v2814_v34 = vadd.f32 %v2802_v44, %v2742_v61  ;;  %v2306_v0 = vadd.f32 %v2294_v40, %v2228_v26  ;;  %v8197_v61 = vld [vmem:[#allocation22_spill] sm:$0xff]  ;;  %v8214_v40 = vld [vmem:[#allocation84_spill] sm:$0xff] }
0x11ea   :  { %v3181_v41 = vpop.permute.xlu2 %3180  ;;  %v2885_v49 = vadd.f32 %v2873_v38, %v2813_v32  ;;  %v2377_v44 = vadd.f32 %v2365_v63, %v2305_v22  ;;  %v2509_v58 = vsel %vm517_vm7, %v8197_v61, %v8196_v27  ;;  %v8198_v38 = vld [vmem:[#allocation25_spill] sm:$0xff]  ;;  %v8215_v1 = vld [vmem:[#allocation80_spill] sm:$0xff]  ;;  %v8217_v63 = vld [vmem:[#allocation82_spill] sm:$0xff] }
0x11eb   :  { %v3193_v30 = vmul.f32 %v3181_v41, %v6432_v18  ;;  %v3194_v14 = vmul.f32 %v3181_v41, %v6436_v48  ;;  %v3195_v39 = vmul.f32 %v3181_v41, %v6440_v36  ;;  %v2886_v7 = vadd.f32 %v2874_v56, %v2814_v34  ;;  %v8199_v32 = vld [vmem:[#allocation53_spill] sm:$0xff]  ;;  %v8200_v34 = vld [vmem:[#allocation54_spill] sm:$0xff] }
0x11ec   :  { %v2957_v51 = vadd.f32 %v2945_v31, %v2885_v49  ;;  %v2378_v9 = vadd.f32 %v2366_v5, %v2306_v0  ;;  %v2510_v47 = vsel %vm517_vm7, %v8196_v27, %v8198_v38  ;;  %v2449_v46 = vadd.f32 %v2437_v25, %v2377_v44  ;;  %v8202_v31 = vld [vmem:[#allocation60_spill] sm:$0xff]  ;;  %v8219_v25 = vld [vmem:[#allocation90_spill] sm:$0xff] }
0x11ed   :  { %3215 = vrot.lane.b32.xlu1 %v3195_v39, %s8191_s25  ;;  %3213 = vrot.lane.b32.xlu0 %v3194_v14, %s8191_s25  ;;  %v2958_v10 = vadd.f32 %v2946_v6, %v2886_v7  ;;  %v4200_v39 = vld [vmem:[%s7584_s4 + $0x168] sm:$0xff]  ;;  %v2581_v16 = vsel %vm591_vm10, %v8200_v34, %v8199_v32  ;;  %v8204_v7 = vld [vmem:[#allocation61_spill] sm:$0xff]  ;;  %v2941_v26 = vsel %vm8216_vm14, %v8215_v1, %v8214_v40  ;;  %v8240_v1 = vld [vmem:[#allocation23_spill] sm:$0xff] }
0x11ee   :  { %3211 = vrot.lane.b32.xlu2 %v3193_v30, %s8191_s25  ;;  %v3029_v11 = vadd.f32 %v3017_v42, %v2957_v51  ;;  %v2450_v56 = vadd.f32 %v2438_v19, %v2378_v9  ;;  %v2521_v28 = vadd.f32 %v2509_v58, %v2449_v46  ;;  %v8203_v6 = vld [vmem:[#allocation58_spill] sm:$0xff]  ;;  %v2654_v42 = vsel %vm665_vm11, %v8202_v31, %v8204_v7  ;;  %v8220_v19 = vld [vmem:[#allocation87_spill] sm:$0xff]  ;;  %v8222_v9 = vld [vmem:[#allocation89_spill] sm:$0xff] }
0x11ef   :  { %v3030_v4 = vadd.f32 %v3018_v57, %v2958_v10  ;;  %v2653_v49 = vsel %vm665_vm11, %v8203_v6, %v8202_v31  ;;  %v8205_v10 = vld [vmem:[#allocation66_spill] sm:$0xff]  ;;  %v2942_v5 = vsel %vm8218_vm15, %v8214_v40, %v8217_v63  ;;  %v8225_v46 = vld [vmem:[#allocation91_spill] sm:$0xff]  ;;  %v8239_v40 = vld [vmem:[#allocation49_spill] sm:$0xff] }
0x11f0   :  { %v3101_v2 = vadd.f32 %v6872_v53, %v3029_v11  ;;  %v2593_v57 = vadd.f32 %v2581_v16, %v2521_v28  ;;  %v8206_v11 = vld [vmem:[#allocation62_spill] sm:$0xff]  ;;  %v8228_v28 = vld [vmem:[#allocation39_spill] sm:$0xff] }
0x11f2   :  { %v3150_v37 = vpop.permute.xlu1 %3149 }
0x11f3   :  { %v3148_v50 = vpop.permute.xlu0 %3147 }
0x11f4   :  { %v6975_v15 = vsel %vm1183_vm2, %v3146_v20, %v3148_v50  ;;  %v6978_v13 = vsel %vm1183_vm2, %v3148_v50, %v3150_v37  ;;  %v3102_v20 = vadd.f32 %v6875_v45, %v3030_v4  ;;  %v8201_v37 = vld [vmem:[#allocation57_spill] sm:$0xff]  ;;  %v2522_v50 = vadd.f32 %v2510_v47, %v2450_v56  ;;  %v8224_v47 = vld [vmem:[#allocation96_spill] sm:$0xff] }
0x11f5   :  { %v2582_v17 = vsel %vm591_vm10, %v8199_v32, %v8201_v37  ;;  %v2725_v4 = vsel %vm739_vm8, %v8206_v11, %v8205_v10  ;;  %v3085_v56 = vsel %vm1109_vm1, %v8225_v46, %v8224_v47  ;;  %v8226_v32 = vld [vmem:[#allocation95_spill] sm:$0xff]  ;;  %v8232_v11 = vld [vmem:[#allocation45_spill] sm:$0xff] }
0x11f6   :  { %v2594_v51 = vadd.f32 %v2582_v17, %v2522_v50  ;;  %v3086_v34 = vsel %vm1109_vm1, %v8224_v47, %v8226_v32  ;;  %v8227_v17 = vld [vmem:[#allocation42_spill] sm:$0xff]  ;;  %v8246_v47 = vld [vmem:[#allocation59_spill] sm:$0xff] }
0x11f7   :  { %v2295_v50 = vsel %vm295_vm4, %v8228_v28, %v8227_v17  ;;  %v8247_v32 = vld [vmem:[#allocation63_spill] sm:$0xff] }
0x11f8   :  { %v8249_v28 = vld [vmem:[#allocation67_spill] sm:$0xff] }
0x11fa   :  { %v3156_v43 = vpop.permute.xlu1 %3155 }
0x11fb   :  { %v3154_v3 = vpop.permute.xlu0 %3153 }
0x11fc   :  { %v3161_v54 = vsel %vm1183_vm2, %v3152_v55, %v3154_v3  ;;  %v3162_v59 = vsel %vm1183_vm2, %v3154_v3, %v3156_v43  ;;  %v2665_v43 = vadd.f32 %v2653_v49, %v2593_v57  ;;  %v2666_v3 = vadd.f32 %v2654_v42, %v2594_v51  ;;  %vm8221_vm2 = vmmov %vm8195_vm3  ;;  %v8229_v49 = vld [vmem:[#allocation37_spill] sm:$0xff]  ;;  %v8230_v42 = vld [vmem:[#allocation43_spill] sm:$0xff] }
0x11fd   :  { %v6990_v41 = vadd.f32 %v3161_v54, %v3101_v2  ;;  %v6992_v60 = vadd.f32 %v3162_v59, %v3102_v20  ;;  %v8207_v2 = vld [vmem:[#allocation64_spill] sm:$0xff]  ;;  %v8209_v59 = vld [vmem:[#allocation69_spill] sm:$0xff]  ;;  %v3013_v44 = vsel %vm8221_vm2, %v8220_v19, %v8219_v25  ;;  %vm8223_vm3 = vmmov %vm8221_vm2  ;;  %v2229_v7 = vmul.f32 %v8229_v49, %v6489_v62 }
0x11fe   :  { %v2726_v20 = vsel %vm739_vm8, %v8205_v10, %v8207_v2  ;;  %v8208_v54 = vld [vmem:[#allocation72_spill] sm:$0xff]  ;;  %v3014_v27 = vsel %vm8223_vm3, %v8219_v25, %v8222_v9  ;;  %v2296_v57 = vsel %vm295_vm4, %v8227_v17, %v8230_v42  ;;  %v2230_v51 = vmul.f32 %v8229_v49, %v6493_v21  ;;  %v8231_v10 = vld [vmem:[#allocation51_spill] sm:$0xff]  ;;  %vm8235_vm4 = vmmov %vm8234_vm9 }
0x11ff   :  { %v8242_v25 = vld [vmem:[#allocation55_spill] sm:$0xff]  ;;  %v8243_v19 = vld [vmem:[#allocation52_spill] sm:$0xff]  ;;  %v8248_v17 = vld [vmem:[#allocation70_spill] sm:$0xff] }
0x1200   :  { %v8251_v42 = vld [vmem:[#allocation76_spill] sm:$0xff] }
0x1202   :  { %v3191_v45 = vpop.permute.xlu1 %3190 }
0x1203   :  { %v3186_v29 = vpop.permute.xlu0 %3185  ;;  %v3199_v53 = vmul.f32 %v3191_v45, %v6432_v18  ;;  %v3200_v55 = vmul.f32 %v3191_v45, %v6436_v48  ;;  %v3201_v14 = vmul.f32 %v3191_v45, %v6440_v36  ;;  %v2738_v45 = vadd.f32 %v2726_v20, %v2666_v3 }
0x1204   :  { %v3196_v35 = vmul.f32 %v3186_v29, %v6432_v18  ;;  %v3197_v12 = vmul.f32 %v3186_v29, %v6436_v48  ;;  %v3198_v30 = vmul.f32 %v3186_v29, %v6440_v36  ;;  %v2797_v29 = vsel %vm813_vm12, %v8209_v59, %v8208_v54  ;;  %v8233_v59 = vld [vmem:[#allocation17_spill] sm:$0xff] }
0x1206   :  { %3217 = vrot.lane.b32.xlu2 %v3196_v35, %s8191_s25  ;;  %3221 = vrot.lane.b32.xlu1 %v3198_v30, %s8191_s25  ;;  %v8210_v35 = vld [vmem:[#allocation71_spill] sm:$0xff]  ;;  %v2737_v30 = vadd.f32 %v2725_v4, %v2665_v43  ;;  %v2367_v4 = vsel %vm369_vm5, %v8232_v11, %v8231_v10 }
0x1207   :  { %3219 = vrot.lane.b32.xlu0 %v3197_v12, %s8191_s25  ;;  %v2798_v12 = vsel %vm813_vm12, %v8208_v54, %v8210_v35  ;;  %v2307_v54 = vadd.f32 %v2295_v50, %v2229_v7  ;;  %v2727_v50 = vsel %vm739_vm8, %v8249_v28, %v8248_v17  ;;  %v8253_v11 = vld [vmem:[#allocation75_spill] sm:$0xff] }
0x1208   :  { %v2810_v24 = vadd.f32 %v2798_v12, %v2738_v45  ;;  %v2308_v45 = vadd.f32 %v2296_v57, %v2230_v51  ;;  %v8252_v57 = vld [vmem:[#allocation74_spill] sm:$0xff] }
0x1209   :  { %v2799_v51 = vsel %vm813_vm12, %v8252_v57, %v8251_v42 }
0x120e   :  { %3223 = vrot.lane.b32.xlu2 %v3199_v53, %s8191_s25  ;;  %3227 = vrot.lane.b32.xlu1 %v3201_v14, %s8191_s25  ;;  %v8211_v53 = vld [vmem:[#allocation77_spill] sm:$0xff] }
0x120f   :  { %3225 = vrot.lane.b32.xlu0 %v3200_v55, %s8191_s25  ;;  %v8212_v55 = vld [vmem:[#allocation73_spill] sm:$0xff]  ;;  %s8301_s25 = smov 77  }
0x1210   :  { %v2869_v14 = vsel %vm887_vm13, %v8212_v55, %v8211_v53  ;;  %v8237_v55 = vld [vmem:[#allocation19_spill] sm:$0xff] }
0x1216   :  { %3252 = vperm.xlu2 %4263, %v4200_v39   ;;  %3262 = vperm.xlu1 %4264, %v4202_v33   ;;  %v8213_v39 = vld [vmem:[#allocation78_spill] sm:$0xff] }
0x1217   :  { %3257 = vperm.xlu0 %4262, %v4201_v8   ;;  %v2870_v33 = vsel %vm887_vm13, %v8211_v53, %v8213_v39  ;;  %v2809_v8 = vadd.f32 %v2797_v29, %v2737_v30  ;;  %v2368_v29 = vsel %vm369_vm5, %v8231_v10, %v8233_v59  ;;  %v8236_v53 = vld [vmem:[#allocation21_spill] sm:$0xff]  ;;  %v2379_v39 = vadd.f32 %v2367_v4, %v2307_v54  ;;  %vm8259_vm5 = vmmov %vm8216_vm14 }
0x1218   :  { %v2882_v0 = vadd.f32 %v2870_v33, %v2810_v24  ;;  %v8238_v33 = vld [vmem:[#allocation18_spill] sm:$0xff]  ;;  %v2380_v24 = vadd.f32 %v2368_v29, %v2308_v45  ;;  %v2800_v4 = vsel %vm813_vm12, %v8251_v42, %v8253_v11  ;;  %v8256_v59 = vld [vmem:[#allocation81_spill] sm:$0xff]  ;;  %v8257_v45 = vld [vmem:[#allocation88_spill] sm:$0xff] }
0x1219   :  { %v2881_v22 = vadd.f32 %v2869_v14, %v2809_v8  ;;  %v2439_v14 = vsel %vm443_vm6, %v8237_v55, %v8236_v53  ;;  %v2440_v8 = vsel %vm443_vm6, %v8236_v53, %v8238_v33  ;;  %v8258_v53 = vld [vmem:[#allocation85_spill] sm:$0xff]  ;;  %vm8261_vm6 = vmmov %vm8259_vm5 }
0x121a   :  { %v2954_v38 = vadd.f32 %v2942_v5, %v2882_v0  ;;  %v2451_v63 = vadd.f32 %v2439_v14, %v2379_v39  ;;  %v8241_v5 = vld [vmem:[#allocation50_spill] sm:$0xff]  ;;  %v2452_v0 = vadd.f32 %v2440_v8, %v2380_v24  ;;  %v2943_v55 = vsel %vm8259_vm5, %v8258_v53, %v8257_v45  ;;  %vm8274_vm12 = vmmov %vm8235_vm4 }
0x121b   :  { %v2953_v58 = vadd.f32 %v2941_v26, %v2881_v22  ;;  %v2511_v26 = vsel %vm517_vm7, %v8240_v1, %v8239_v40  ;;  %v2512_v22 = vsel %vm517_vm7, %v8239_v40, %v8241_v5  ;;  %v8260_v14 = vld [vmem:[#allocation86_spill] sm:$0xff]  ;;  %v8262_v1 = vld [vmem:[#allocation20_spill] sm:$0xff]  ;;  %vm8265_vm7 = vmmov %vm8221_vm2 }
0x121c   :  { %v3026_v37 = vadd.f32 %v3014_v27, %v2954_v38  ;;  %v2523_v9 = vadd.f32 %v2511_v26, %v2451_v63  ;;  %v8244_v27 = vld [vmem:[#allocation56_spill] sm:$0xff]  ;;  %v8245_v38 = vld [vmem:[#allocation65_spill] sm:$0xff]  ;;  %v2944_v39 = vsel %vm8261_vm6, %v8257_v45, %v8260_v14  ;;  %v8263_v63 = vld [vmem:[#allocation94_spill] sm:$0xff] }
0x121d   :  { %v3025_v16 = vadd.f32 %v3013_v44, %v2953_v58  ;;  %v2583_v44 = vsel %vm591_vm10, %v8243_v19, %v8242_v25  ;;  %v2524_v58 = vadd.f32 %v2512_v22, %v2452_v0  ;;  %v2655_v46 = vsel %vm665_vm11, %v8246_v47, %v8245_v38  ;;  %v8264_v5 = vld [vmem:[#allocation92_spill] sm:$0xff]  ;;  %v8266_v0 = vld [vmem:[#allocation93_spill] sm:$0xff] }
0x121e   :  { %v3098_v6 = vadd.f32 %v3086_v34, %v3026_v37  ;;  %v2656_v34 = vsel %vm665_vm11, %v8245_v38, %v8247_v32  ;;  %v3015_v22 = vsel %vm8265_vm7, %v8264_v5, %v8263_v63  ;;  %vm8273_vm11 = vmmov %vm8235_vm4 }
0x121f   :  { %v3097_v31 = vadd.f32 %v3085_v56, %v3025_v16  ;;  %v2595_v56 = vadd.f32 %v2583_v44, %v2523_v9  ;;  %v8269_v9 = vld [vmem:[#allocation99_spill] sm:$0xff] }
0x1220   :  { %v3170_v20 = vadd.f32 %v6902_v52, %v3098_v6  ;;  %v8250_v6 = vld [vmem:[#allocation68_spill] sm:$0xff] }
0x1221   :  { %v3169_v2 = vadd.f32 %v6899_v23, %v3097_v31  ;;  %v2667_v31 = vadd.f32 %v2655_v46, %v2595_v56  ;;  %v2728_v49 = vsel %vm739_vm8, %v8248_v17, %v8250_v6  ;;  %vm8267_vm8 = vmmov %vm8221_vm2 }
0x1223   :  { %v2739_v10 = vadd.f32 %v2727_v50, %v2667_v31 }
0x1225   :  { %v2811_v54 = vadd.f32 %v2799_v51, %v2739_v10 }
0x1248   :  { %v3212_v61 = vpop.permute.xlu2 %3211 }
0x125f   :  { %v3216_v43 = vpop.permute.xlu1 %3215  ;;  %v3214_v3 = vpop.permute.xlu0 %3213 }
0x1260   :  { %v3229_v35 = vsel %vm8234_vm9, %v3212_v61, %v3214_v3  ;;  %v3230_v12 = vsel %vm8235_vm4, %v3214_v3, %v3216_v43  ;;  %v3218_v30 = vpop.permute.xlu2 %3217  ;;  %v2584_v61 = vsel %vm591_vm10, %v8242_v25, %v8244_v27  ;;  %v8255_v43 = vld [vmem:[#allocation79_spill] sm:$0xff]  ;;  %v3016_v25 = vsel %vm8267_vm8, %v8263_v63, %v8266_v0  ;;  %v8270_v27 = vld [vmem:[#allocation97_spill] sm:$0xff]  ;;  %vm8272_vm10 = vmmov %vm8235_vm4 }
0x1261   :  { %v7114_v23 = vadd.f32 %v3229_v35, %v3169_v2  ;;  %v7116_v52 = vadd.f32 %v3230_v12, %v3170_v20  ;;  %v2596_v37 = vadd.f32 %v2584_v61, %v2524_v58  ;;  %v8254_v20 = vld [vmem:[#allocation83_spill] sm:$0xff]  ;;  %v3087_v61 = vsel %vm1109_vm1, %v8270_v27, %v8269_v9  ;;  %v8271_v58 = vld [vmem:[#allocation101_spill] sm:$0xff] }
0x1262   :  { %v2871_v3 = vsel %vm887_vm13, %v8255_v43, %v8254_v20  ;;  %v2872_v29 = vsel %vm887_vm13, %v8254_v20, %v8256_v59  ;;  %v3088_v38 = vsel %vm1109_vm1, %v8269_v9, %v8271_v58  ;;  %vm8275_vm13 = vmmov %vm8235_vm4  ;;  %v4203_v20 = vld [vmem:[%s7584_s4 + $0x180] sm:$0xff]  ;;  %v4205_v43 = vld [vmem:[%s7584_s4 + $0x190] sm:$0xff]  ;;  %vm8276_vm1 = vcmask 654336  }
0x1263   :  { %v2668_v7 = vadd.f32 %v2656_v34, %v2596_v37  ;;  %v2883_v12 = vadd.f32 %v2871_v3, %v2811_v54  ;;  %v4204_v3 = vld [vmem:[%s7584_s4 + $0x188] sm:$0xff]  ;;  %vm8277_vm14 = vmmov %vm8276_vm1  ;;  %vm8286_vm4 = vcmask 646144  }
0x1264   :  { %vm8282_vm15 = vmmov %vm8276_vm1 }
0x1265   :  { %v2740_v2 = vadd.f32 %v2728_v49, %v2668_v7  ;;  %v2955_v19 = vadd.f32 %v2943_v55, %v2883_v12  ;;  %vm8283_vm2 = vmmov %vm8276_vm1 }
0x1266   :  { %vm8284_vm3 = vmmov %vm8276_vm1 }
0x1267   :  { %v2812_v35 = vadd.f32 %v2800_v4, %v2740_v2  ;;  %v3027_v47 = vadd.f32 %v3015_v22, %v2955_v19  ;;  %vm8285_vm9 = vmmov %vm8276_vm1 }
0x1268   :  { %v3224_v16 = vpop.permute.xlu2 %3223  ;;  %vm8287_vm5 = vmmov %vm8286_vm4 }
0x1269   :  { %v2884_v8 = vadd.f32 %v2872_v29, %v2812_v35  ;;  %v3099_v56 = vadd.f32 %v3087_v61, %v3027_v47  ;;  %vm8292_vm6 = vmmov %vm8286_vm4 }
0x126a   :  { %vm8293_vm7 = vmmov %vm8286_vm4 }
0x126b   :  { %v2956_v44 = vadd.f32 %v2944_v39, %v2884_v8  ;;  %v3171_v34 = vadd.f32 %v6975_v15, %v3099_v56  ;;  %vm8294_vm8 = vmmov %vm8286_vm4 }
0x126d   :  { %v3028_v46 = vadd.f32 %v3016_v25, %v2956_v44 }
0x126f   :  { %v3100_v32 = vadd.f32 %v3088_v38, %v3028_v46 }
0x1270   :  { %v3253_v33 = vpop.permute.xlu2 %3252 }
0x1271   :  { %v3265_v24 = vmul.f32 %v3253_v33, %v6489_v62  ;;  %v3266_v40 = vmul.f32 %v3253_v33, %v6493_v21  ;;  %v3267_v26 = vmul.f32 %v3253_v33, %v8262_v1  ;;  %v3172_v37 = vadd.f32 %v6978_v13, %v3100_v32  ;;  %v8278_v33 = vld [vmem:[#allocation36_spill] sm:$0xff] }
0x1273   :  { %3287 = vrot.lane.b32.xlu1 %v3267_v26, %s8268_s5  ;;  %3285 = vrot.lane.b32.xlu0 %v3266_v40, %s8268_s5  ;;  %v8280_v26 = vld [vmem:[#allocation41_spill] sm:$0xff] }
0x1274   :  { %3283 = vrot.lane.b32.xlu2 %v3265_v24, %s8268_s5  ;;  %v8279_v24 = vld [vmem:[#allocation40_spill] sm:$0xff] }
0x1278   :  { %v3222_v17 = vpop.permute.xlu1 %3221 }
0x1279   :  { %v3220_v28 = vpop.permute.xlu0 %3219 }
0x127a   :  { %v3231_v50 = vsel %vm8272_vm10, %v3218_v30, %v3220_v28  ;;  %v3232_v31 = vsel %vm8273_vm11, %v3220_v28, %v3222_v17  ;;  %v4206_v28 = vld [vmem:[%s7584_s4 + $0x198] sm:$0xff]  ;;  %vm8295_vm10 = vmmov %vm8286_vm4  ;;  %vm8296_vm11 = vcmask 637952  }
0x127b   :  { %v3243_v6 = vadd.f32 %v3231_v50, %v3171_v34  ;;  %v3244_v49 = vadd.f32 %v3232_v31, %v3172_v37  ;;  %v4208_v50 = vld [vmem:[%s7584_s4 + $0x1a8] sm:$0xff]  ;;  %v4207_v31 = vld [vmem:[%s7584_s4 + $0x1a0] sm:$0xff] }
0x1280   :  { %v3228_v7 = vpop.permute.xlu1 %3227 }
0x1281   :  { %v3226_v42 = vpop.permute.xlu0 %3225 }
0x1282   :  { %v3233_v57 = vsel %vm8274_vm12, %v3224_v16, %v3226_v42  ;;  %v3234_v51 = vsel %vm8275_vm13, %v3226_v42, %v3228_v7  ;;  %vm8297_vm12 = vmmov %vm8296_vm11 }
0x1283   :  { %v3245_v10 = vadd.f32 %v3233_v57, %v6990_v41  ;;  %v3246_v15 = vadd.f32 %v3234_v51, %v6992_v60  ;;  %vm8302_vm13 = vmmov %vm8296_vm11 }
0x1288   :  { %v3263_v16 = vpop.permute.xlu1 %3262 }
0x1289   :  { %v3258_v11 = vpop.permute.xlu0 %3257  ;;  %v3271_v2 = vmul.f32 %v3263_v16, %v6489_v62  ;;  %v3272_v41 = vmul.f32 %v3263_v16, %v6493_v21  ;;  %v3273_v60 = vmul.f32 %v3263_v16, %v8262_v1  ;;  %v8289_v16 = vld [vmem:[#allocation35_spill] sm:$0xff] }
0x128a   :  { %v3268_v13 = vmul.f32 %v3258_v11, %v6489_v62  ;;  %v3269_v4 = vmul.f32 %v3258_v11, %v6493_v21  ;;  %v3270_v30 = vmul.f32 %v3258_v11, %v8262_v1 }
0x128c   :  { %3289 = vrot.lane.b32.xlu2 %v3268_v13, %s8268_s5  ;;  %3293 = vrot.lane.b32.xlu1 %v3270_v30, %s8268_s5 }
0x128d   :  { %3291 = vrot.lane.b32.xlu0 %v3269_v4, %s8268_s5  ;;  %v8288_v4 = vld [vmem:[#allocation34_spill] sm:$0xff] }
0x1294   :  { %3295 = vrot.lane.b32.xlu2 %v3271_v2, %s8268_s5  ;;  %3299 = vrot.lane.b32.xlu1 %v3273_v60, %s8268_s5 }
0x1295   :  { %3297 = vrot.lane.b32.xlu0 %v3272_v41, %s8268_s5  ;;  %v8290_v41 = vld [vmem:[#allocation38_spill] sm:$0xff] }
0x129c   :  { %3324 = vperm.xlu2 %4263, %v4203_v20   ;;  %3334 = vperm.xlu1 %4264, %v4205_v43  }
0x129d   :  { %3329 = vperm.xlu0 %4262, %v4204_v3  }
0x12ce   :  { %v3284_v54 = vpop.permute.xlu2 %3283 }
0x12e5   :  { %v3288_v59 = vpop.permute.xlu1 %3287  ;;  %v3286_v29 = vpop.permute.xlu0 %3285 }
0x12e6   :  { %v3301_v35 = vsel %vm8276_vm1, %v3284_v54, %v3286_v29  ;;  %v3302_v12 = vsel %vm8277_vm14, %v3286_v29, %v3288_v59  ;;  %v3290_v45 = vpop.permute.xlu2 %3289  ;;  %vm8303_vm1 = vmmov %vm8296_vm11 }
0x12e7   :  { %v3313_v53 = vadd.f32 %v3301_v35, %v7114_v23  ;;  %v3314_v55 = vadd.f32 %v3302_v12, %v7116_v52  ;;  %vm8304_vm14 = vmmov %vm8303_vm1 }
0x12ee   :  { %v3296_v14 = vpop.permute.xlu2 %3295 }
0x12f6   :  { %v3325_v39 = vpop.permute.xlu2 %3324 }
0x12f7   :  { %v3337_v8 = vmul.f32 %v3325_v39, %v8278_v33  ;;  %v3338_v40 = vmul.f32 %v3325_v39, %v8279_v24  ;;  %v3339_v63 = vmul.f32 %v3325_v39, %v8280_v26 }
0x12f9   :  { %3359 = vrot.lane.b32.xlu1 %v3339_v63, %s8281_s13  ;;  %3357 = vrot.lane.b32.xlu0 %v3338_v40, %s8281_s13 }
0x12fa   :  { %3355 = vrot.lane.b32.xlu2 %v3337_v8, %s8281_s13 }
0x12fe   :  { %v3294_v5 = vpop.permute.xlu1 %3293 }
0x12ff   :  { %v3292_v22 = vpop.permute.xlu0 %3291 }
0x1300   :  { %v3303_v23 = vsel %vm8282_vm15, %v3290_v45, %v3292_v22  ;;  %v3304_v52 = vsel %vm8283_vm2, %v3292_v22, %v3294_v5  ;;  %vm8305_vm15 = vmmov %vm8303_vm1  ;;  %vm8306_vm2 = vcmask 629760  }
0x1301   :  { %v3315_v0 = vadd.f32 %v3303_v23, %v3243_v6  ;;  %v3316_v25 = vadd.f32 %v3304_v52, %v3244_v49 }
0x1306   :  { %v3300_v19 = vpop.permute.xlu1 %3299 }
0x1307   :  { %v3298_v44 = vpop.permute.xlu0 %3297 }
0x1308   :  { %v3305_v9 = vsel %vm8284_vm3, %v3296_v14, %v3298_v44  ;;  %v3306_v27 = vsel %vm8285_vm9, %v3298_v44, %v3300_v19  ;;  %v4210_v19 = vld [vmem:[%s7584_s4 + $0x1b8] sm:$0xff]  ;;  %vm8307_vm3 = vmmov %vm8306_vm2 }
0x1309   :  { %v3317_v61 = vadd.f32 %v3305_v9, %v3245_v10  ;;  %v3318_v58 = vadd.f32 %v3306_v27, %v3246_v15  ;;  %vm8308_vm9 = vmmov %vm8306_vm2 }
0x130e   :  { %v3335_v32 = vpop.permute.xlu1 %3334 }
0x130f   :  { %v3330_v38 = vpop.permute.xlu0 %3329  ;;  %v3343_v34 = vmul.f32 %v3335_v32, %v8278_v33  ;;  %v3344_v37 = vmul.f32 %v3335_v32, %v8279_v24  ;;  %v3345_v17 = vmul.f32 %v3335_v32, %v8280_v26 }
0x1310   :  { %v3340_v47 = vmul.f32 %v3330_v38, %v8278_v33  ;;  %v3341_v46 = vmul.f32 %v3330_v38, %v8279_v24  ;;  %v3342_v56 = vmul.f32 %v3330_v38, %v8280_v26 }
0x1312   :  { %3361 = vrot.lane.b32.xlu2 %v3340_v47, %s8281_s13  ;;  %3365 = vrot.lane.b32.xlu1 %v3342_v56, %s8281_s13 }
0x1313   :  { %3363 = vrot.lane.b32.xlu0 %v3341_v46, %s8281_s13 }
0x131a   :  { %3367 = vrot.lane.b32.xlu2 %v3343_v34, %s8281_s13  ;;  %3371 = vrot.lane.b32.xlu1 %v3345_v17, %s8281_s13  ;;  %v8298_v34 = vld [vmem:[#allocation46_spill] sm:$0xff]  ;;  %v8299_v17 = vld [vmem:[#allocation47_spill] sm:$0xff] }
0x131b   :  { %3369 = vrot.lane.b32.xlu0 %v3344_v37, %s8281_s13 }
0x1322   :  { %3396 = vperm.xlu2 %4263, %v4206_v28   ;;  %3406 = vperm.xlu1 %4264, %v4208_v50   ;;  %v8300_v50 = vld [vmem:[#allocation48_spill] sm:$0xff] }
0x1323   :  { %3401 = vperm.xlu0 %4262, %v4207_v31  }
0x1354   :  { %v3356_v6 = vpop.permute.xlu2 %3355 }
0x136b   :  { %v3360_v49 = vpop.permute.xlu1 %3359  ;;  %v3358_v7 = vpop.permute.xlu0 %3357 }
0x136c   :  { %v3373_v42 = vsel %vm8286_vm4, %v3356_v6, %v3358_v7  ;;  %v3374_v57 = vsel %vm8287_vm5, %v3358_v7, %v3360_v49  ;;  %v3362_v51 = vpop.permute.xlu2 %3361  ;;  %vm8309_vm4 = vmmov %vm8306_vm2 }
0x136d   :  { %v3385_v10 = vadd.f32 %v3373_v42, %v3313_v53  ;;  %v3386_v15 = vadd.f32 %v3374_v57, %v3314_v55  ;;  %vm8310_vm5 = vmmov %vm8306_vm2 }
0x1374   :  { %v3368_v11 = vpop.permute.xlu2 %3367 }
0x137c   :  { %v3397_v13 = vpop.permute.xlu2 %3396 }
0x137d   :  { %v3409_v30 = vmul.f32 %v3397_v13, %v8288_v4  ;;  %v3410_v2 = vmul.f32 %v3397_v13, %v8289_v16  ;;  %v3411_v60 = vmul.f32 %v3397_v13, %v8290_v41 }
0x137f   :  { %3431 = vrot.lane.b32.xlu1 %v3411_v60, %s8291_s8  ;;  %3429 = vrot.lane.b32.xlu0 %v3410_v2, %s8291_s8 }
0x1380   :  { %3427 = vrot.lane.b32.xlu2 %v3409_v30, %s8291_s8 }
0x1384   :  { %v3366_v20 = vpop.permute.xlu1 %3365 }
0x1385   :  { %v3364_v43 = vpop.permute.xlu0 %3363 }
0x1386   :  { %v3375_v3 = vsel %vm8292_vm6, %v3362_v51, %v3364_v43  ;;  %v3376_v54 = vsel %vm8293_vm7, %v3364_v43, %v3366_v20  ;;  %vm8311_vm6 = vmmov %vm8306_vm2  ;;  %vm8318_vm7 = vcmask 621568  }
0x1387   :  { %v3387_v59 = vadd.f32 %v3375_v3, %v3315_v0  ;;  %v3388_v29 = vadd.f32 %v3376_v54, %v3316_v25  ;;  %v4209_v0 = vld [vmem:[%s7584_s4 + $0x1b0] sm:$0xff]  ;;  %v4211_v25 = vld [vmem:[%s7584_s4 + $0x1c0] sm:$0xff] }
0x138c   :  { %v3372_v35 = vpop.permute.xlu1 %3371 }
0x138d   :  { %v3370_v12 = vpop.permute.xlu0 %3369 }
0x138e   :  { %v3377_v45 = vsel %vm8294_vm8, %v3368_v11, %v3370_v12  ;;  %v3378_v53 = vsel %vm8295_vm10, %v3370_v12, %v3372_v35  ;;  %v4212_v12 = vld [vmem:[%s7584_s4 + $0x1c8] sm:$0xff]  ;;  %vm8319_vm8 = vmmov %vm8318_vm7  ;;  %vm8320_vm10 = vcmask 523264  }
0x138f   :  { %v3389_v55 = vadd.f32 %v3377_v45, %v3317_v61  ;;  %v3390_v14 = vadd.f32 %v3378_v53, %v3318_v58  ;;  %v4217_v45 = vld [vmem:[%s7584_s4 + $0x1f0] sm:$0xff]  ;;  %v4214_v53 = vld [vmem:[%s7584_s4 + $0x1d8] sm:$0xff] }
0x1394   :  { %v3407_v5 = vpop.permute.xlu1 %3406 }
0x1395   :  { %v3402_v39 = vpop.permute.xlu0 %3401  ;;  %v3415_v22 = vmul.f32 %v3407_v5, %v8288_v4  ;;  %v3416_v23 = vmul.f32 %v3407_v5, %v8289_v16  ;;  %v3417_v52 = vmul.f32 %v3407_v5, %v8290_v41  ;;  %v4218_v5 = vld [vmem:[%s7584_s4 + $0x1f8] sm:$0xff] }
0x1396   :  { %v3412_v8 = vmul.f32 %v3402_v39, %v8288_v4  ;;  %v3413_v40 = vmul.f32 %v3402_v39, %v8289_v16  ;;  %v3414_v63 = vmul.f32 %v3402_v39, %v8290_v41  ;;  %v4213_v39 = vld [vmem:[%s7584_s4 + $0x1d0] sm:$0xff] }
0x1398   :  { %3433 = vrot.lane.b32.xlu2 %v3412_v8, %s8291_s8  ;;  %3437 = vrot.lane.b32.xlu1 %v3414_v63, %s8291_s8  ;;  %v4215_v8 = vld [vmem:[%s7584_s4 + $0x1e0] sm:$0xff]  ;;  %v4216_v63 = vld [vmem:[%s7584_s4 + $0x1e8] sm:$0xff] }
0x1399   :  { %3435 = vrot.lane.b32.xlu0 %v3413_v40, %s8291_s8  ;;  %v4226_v40 = vld [vmem:[%s7584_s4 + $0x238] sm:$0xff] }
0x13a0   :  { %3439 = vrot.lane.b32.xlu2 %v3415_v22, %s8291_s8  ;;  %3443 = vrot.lane.b32.xlu1 %v3417_v52, %s8291_s8  ;;  %v4229_v22 = vld [vmem:[%s7584_s4 + $0x250] sm:$0xff] }
0x13a1   :  { %3441 = vrot.lane.b32.xlu0 %v3416_v23, %s8291_s8  ;;  %v4219_v23 = vld [vmem:[%s7584_s4 + $0x200] sm:$0xff]  ;;  %v4221_v52 = vld [vmem:[%s7584_s4 + $0x210] sm:$0xff]  ;;  %s4337_s8 = smov 16  }
0x13a8   :  { %3468 = vperm.xlu2 %4263, %v4209_v0   ;;  %3478 = vperm.xlu1 %4264, %v4211_v25   ;;  %v4224_v0 = vld [vmem:[%s7584_s4 + $0x228] sm:$0xff]  ;;  %v4222_v25 = vld [vmem:[%s7584_s4 + $0x218] sm:$0xff] }
0x13a9   :  { %3473 = vperm.xlu0 %4262, %v4210_v19   ;;  %v4225_v19 = vld [vmem:[%s7584_s4 + $0x230] sm:$0xff] }
0x13da   :  { %v3428_v44 = vpop.permute.xlu2 %3427 }
0x13f1   :  { %v3432_v9 = vpop.permute.xlu1 %3431  ;;  %v3430_v27 = vpop.permute.xlu0 %3429 }
0x13f2   :  { %v3445_v61 = vsel %vm8296_vm11, %v3428_v44, %v3430_v27  ;;  %v3446_v58 = vsel %vm8297_vm12, %v3430_v27, %v3432_v9  ;;  %v3434_v38 = vpop.permute.xlu2 %3433  ;;  %v4228_v44 = vld [vmem:[%s7584_s4 + $0x248] sm:$0xff]  ;;  %v4227_v9 = vld [vmem:[%s7584_s4 + $0x240] sm:$0xff]  ;;  %vm8321_vm11 = vmmov %vm8320_vm10  ;;  %vm8322_vm12 = vcmask 515072  }
0x13f3   :  { %v7280_v47 = vadd.f32 %v3445_v61, %v3385_v10  ;;  %v7282_v46 = vadd.f32 %v3446_v58, %v3386_v15 }
0x13fa   :  { %v3440_v56 = vpop.permute.xlu2 %3439 }
0x1402   :  { %v3469_v32 = vpop.permute.xlu2 %3468 }
0x1403   :  { %v3481_v37 = vmul.f32 %v3469_v32, %v8298_v34  ;;  %v3482_v28 = vmul.f32 %v3469_v32, %v8299_v17  ;;  %v3483_v31 = vmul.f32 %v3469_v32, %v8300_v50 }
0x1405   :  { %3503 = vrot.lane.b32.xlu1 %v3483_v31, %s8301_s25  ;;  %3501 = vrot.lane.b32.xlu0 %v3482_v28, %s8301_s25 }
0x1406   :  { %3499 = vrot.lane.b32.xlu2 %v3481_v37, %s8301_s25 }
0x140a   :  { %v3438_v6 = vpop.permute.xlu1 %3437 }
0x140b   :  { %v3436_v49 = vpop.permute.xlu0 %3435 }
0x140c   :  { %v3447_v7 = vsel %vm8302_vm13, %v3434_v38, %v3436_v49  ;;  %v3448_v42 = vsel %vm8303_vm1, %v3436_v49, %v3438_v6  ;;  %vm8323_vm13 = vmmov %vm8318_vm7 }
0x140d   :  { %v7292_v57 = vadd.f32 %v3447_v7, %v3387_v59  ;;  %v7294_v51 = vadd.f32 %v3448_v42, %v3388_v29  ;;  %vm8324_vm1 = vmmov %vm8322_vm12 }
0x1412   :  { %v3444_v10 = vpop.permute.xlu1 %3443 }
0x1413   :  { %v3442_v15 = vpop.permute.xlu0 %3441 }
0x1414   :  { %v3449_v11 = vsel %vm8304_vm14, %v3440_v56, %v3442_v15  ;;  %v3450_v13 = vsel %vm8305_vm15, %v3442_v15, %v3444_v10  ;;  %vm8325_vm14 = vmmov %vm8318_vm7 }
0x1415   :  { %v7298_v30 = vadd.f32 %v3449_v11, %v3389_v55  ;;  %v7300_v2 = vadd.f32 %v3450_v13, %v3390_v14  ;;  %v4220_v55 = vld [vmem:[%s7584_s4 + $0x208] sm:$0xff]  ;;  %v4223_v14 = vld [vmem:[%s7584_s4 + $0x220] sm:$0xff]  ;;  %s8312_s4 = smov 76   ;;  %vm8326_vm15 = vmmov %vm8318_vm7 }
0x141a   :  { %v3479_v54 = vpop.permute.xlu1 %3478 }
0x141b   :  { %v3474_v60 = vpop.permute.xlu0 %3473  ;;  %v3487_v59 = vmul.f32 %v3479_v54, %v8298_v34  ;;  %v3488_v29 = vmul.f32 %v3479_v54, %v8299_v17  ;;  %v3489_v35 = vmul.f32 %v3479_v54, %v8300_v50 }
0x141c   :  { %v3484_v20 = vmul.f32 %v3474_v60, %v8298_v34  ;;  %v3485_v43 = vmul.f32 %v3474_v60, %v8299_v17  ;;  %v3486_v3 = vmul.f32 %v3474_v60, %v8300_v50 }
0x141e   :  { %3505 = vrot.lane.b32.xlu2 %v3484_v20, %s8301_s25  ;;  %3509 = vrot.lane.b32.xlu1 %v3486_v3, %s8301_s25 }
0x141f   :  { %3507 = vrot.lane.b32.xlu0 %v3485_v43, %s8301_s25 }
0x1426   :  { %3511 = vrot.lane.b32.xlu2 %v3487_v59, %s8301_s25  ;;  %3515 = vrot.lane.b32.xlu1 %v3489_v35, %s8301_s25 }
0x1427   :  { %3513 = vrot.lane.b32.xlu0 %v3488_v29, %s8301_s25 }
0x142e   :  { %3540 = vperm.xlu2 %4263, %v4212_v12   ;;  %3622 = vperm.xlu1 %4264, %v4217_v45  }
0x142f   :  { %3550 = vperm.xlu0 %4262, %v4214_v53  }
0x1436   :  { %3694 = vperm.xlu2 %4263, %v4220_v55   ;;  %3766 = vperm.xlu1 %4264, %v4223_v14  }
0x1437   :  { %3545 = vperm.xlu0 %4262, %v4213_v39  }
0x143e   :  { %3612 = vperm.xlu2 %4263, %v4215_v8   ;;  %3838 = vperm.xlu1 %4264, %v4226_v40  }
0x143f   :  { %3617 = vperm.xlu0 %4262, %v4216_v63  }
0x1446   :  { %3684 = vperm.xlu2 %4263, %v4218_v5   ;;  %3910 = vperm.xlu1 %4264, %v4229_v22  }
0x1447   :  { %3689 = vperm.xlu0 %4262, %v4219_v23  }
0x144e   :  { %3756 = vperm.xlu2 %4263, %v4221_v52   ;;  %3828 = vperm.xlu1 %4264, %v4224_v0  }
0x144f   :  { %3761 = vperm.xlu0 %4262, %v4222_v25  }
0x1456   :  { %3833 = vperm.xlu2 %4263, %v4225_v19   ;;  %3905 = vperm.xlu1 %4264, %v4228_v44  }
0x1457   :  { %3900 = vperm.xlu0 %4262, %v4227_v9  }
0x1460   :  { %v3500_v27 = vpop.permute.xlu2 %3499 }
0x1477   :  { %v3504_v61 = vpop.permute.xlu1 %3503  ;;  %v3502_v58 = vpop.permute.xlu0 %3501 }
0x1478   :  { %v3517_v38 = vsel %vm8306_vm2, %v3500_v27, %v3502_v58  ;;  %v3518_v56 = vsel %vm8307_vm3, %v3502_v58, %v3504_v61  ;;  %v3506_v28 = vpop.permute.xlu2 %3505  ;;  %vm8327_vm2 = vmmov %vm8320_vm10 }
0x1479   :  { %v7371_v32 = vadd.f32 %v3517_v38, %v7280_v47  ;;  %v7374_v37 = vadd.f32 %v3518_v56, %v7282_v46  ;;  %vm8328_vm3 = vmmov %vm8318_vm7 }
0x1480   :  { %v3512_v15 = vpop.permute.xlu2 %3511 }
0x1488   :  { %v3541_v54 = vpop.permute.xlu2 %3540 }
0x1489   :  { %v3554_v12 = vmul.f32 %v3541_v54, %v6436_v48  ;;  %v3555_v39 = vmul.f32 %v3541_v54, %v6440_v36  ;;  %v3553_v0 = vmul.f32 %v3541_v54, %v6432_v18 }
0x1490   :  { %v3510_v31 = vpop.permute.xlu1 %3509  ;;  %v3695_v35 = vpop.permute.xlu2 %3694 }
0x1491   :  { %v3508_v6 = vpop.permute.xlu0 %3507  ;;  %v3704_v45 = vmul.f32 %v3695_v35, %v8279_v24  ;;  %v3705_v53 = vmul.f32 %v3695_v35, %v8280_v26  ;;  %v3703_v5 = vmul.f32 %v3695_v35, %v8278_v33 }
0x1492   :  { %v3519_v49 = vsel %vm8308_vm9, %v3506_v28, %v3508_v6  ;;  %v3520_v7 = vsel %vm8309_vm4, %v3508_v6, %v3510_v31  ;;  %vm8329_vm9 = vmmov %vm8327_vm2 }
0x1493   :  { %v7379_v42 = vadd.f32 %v3519_v49, %v7292_v57  ;;  %v7382_v10 = vadd.f32 %v3520_v7, %v7294_v51  ;;  %vm8330_vm4 = vmmov %vm8327_vm2 }
0x1498   :  { %v3516_v11 = vpop.permute.xlu1 %3515  ;;  %v3613_v23 = vpop.permute.xlu2 %3612 }
0x1499   :  { %v3514_v47 = vpop.permute.xlu0 %3513  ;;  %v3626_v52 = vmul.f32 %v3613_v23, %v6493_v21  ;;  %v3627_v9 = vmul.f32 %v3613_v23, %v8262_v1  ;;  %v3625_v28 = vmul.f32 %v3613_v23, %v6489_v62 }
0x149a   :  { %v3521_v13 = vsel %vm8310_vm5, %v3512_v15, %v3514_v47  ;;  %v3522_v46 = vsel %vm8311_vm6, %v3514_v47, %v3516_v11  ;;  %vm8331_vm5 = vmmov %vm8324_vm1 }
0x149b   :  { %v7387_v60 = vadd.f32 %v3521_v13, %v7298_v30  ;;  %v7390_v20 = vadd.f32 %v3522_v46, %v7300_v2  ;;  %vm8332_vm6 = vmmov %vm8327_vm2 }
0x14a0   :  { %v3623_v59 = vpop.permute.xlu1 %3622 }
0x14a1   :  { %v3551_v43 = vpop.permute.xlu0 %3550  ;;  %v3631_v30 = vmul.f32 %v3623_v59, %v6489_v62  ;;  %v3632_v2 = vmul.f32 %v3623_v59, %v6493_v21  ;;  %v3633_v29 = vmul.f32 %v3623_v59, %v8262_v1 }
0x14a2   :  { %v3559_v57 = vmul.f32 %v3551_v43, %v6432_v18  ;;  %v3560_v3 = vmul.f32 %v3551_v43, %v6436_v48  ;;  %v3561_v51 = vmul.f32 %v3551_v43, %v6440_v36 }
0x14a4   :  { %3583 = vrot.lane.b32.xlu1 %v3559_v57, %s8312_s4  ;;  %3587 = vrot.lane.b32.xlu0 %v3561_v51, %s8312_s4 }
0x14a5   :  { %3585 = vrot.lane.b32.xlu2 %v3560_v3, %s8312_s4 }
0x14a8   :  { %v3767_v40 = vpop.permute.xlu1 %3766 }
0x14a9   :  { %v3546_v55 = vpop.permute.xlu0 %3545  ;;  %v3777_v63 = vmul.f32 %v3767_v40, %v8290_v41  ;;  %v3776_v22 = vmul.f32 %v3767_v40, %v8289_v16  ;;  %v3775_v38 = vmul.f32 %v3767_v40, %v8288_v4 }
0x14aa   :  { %v3558_v14 = vmul.f32 %v3546_v55, %v6440_v36  ;;  %v3557_v8 = vmul.f32 %v3546_v55, %v6436_v48  ;;  %v3556_v25 = vmul.f32 %v3546_v55, %v6432_v18 }
0x14ac   :  { %3655 = vrot.lane.b32.xlu1 %v3631_v30, %s8313_s30  ;;  %3659 = vrot.lane.b32.xlu0 %v3633_v29, %s8313_s30 }
0x14ad   :  { %3657 = vrot.lane.b32.xlu2 %v3632_v2, %s8313_s30 }
0x14b0   :  { %v3839_v61 = vpop.permute.xlu1 %3838 }
0x14b1   :  { %v3618_v19 = vpop.permute.xlu0 %3617  ;;  %v3849_v58 = vmul.f32 %v3839_v61, %v8300_v50  ;;  %v3848_v56 = vmul.f32 %v3839_v61, %v8299_v17  ;;  %v3847_v13 = vmul.f32 %v3839_v61, %v8298_v34 }
0x14b2   :  { %v3630_v44 = vmul.f32 %v3618_v19, %v8262_v1  ;;  %v3629_v27 = vmul.f32 %v3618_v19, %v6493_v21  ;;  %v3685_v21 = vpop.permute.xlu2 %3684  ;;  %v3628_v31 = vmul.f32 %v3618_v19, %v6489_v62 }
0x14b3   :  { %v3698_v1 = vmul.f32 %v3685_v21, %v8279_v24  ;;  %v3699_v7 = vmul.f32 %v3685_v21, %v8280_v26  ;;  %v3697_v43 = vmul.f32 %v3685_v21, %v8278_v33 }
0x14b4   :  { %3573 = vrot.lane.b32.xlu1 %v3554_v12, %s8312_s4  ;;  %3731 = vrot.lane.b32.xlu0 %v3705_v53, %s8314_s1 }
0x14b5   :  { %3729 = vrot.lane.b32.xlu2 %v3704_v45, %s8314_s1 }
0x14b8   :  { %v3911_v62 = vpop.permute.xlu1 %3910 }
0x14b9   :  { %v3690_v6 = vpop.permute.xlu0 %3689  ;;  %v3921_v47 = vmul.f32 %v3911_v62, %v6440_v36  ;;  %v3920_v46 = vmul.f32 %v3911_v62, %v6436_v48  ;;  %v3919_v12 = vmul.f32 %v3911_v62, %v6432_v18 }
0x14ba   :  { %v3702_v49 = vmul.f32 %v3690_v6, %v8280_v26  ;;  %v3701_v15 = vmul.f32 %v3690_v6, %v8279_v24  ;;  %v3757_v11 = vpop.permute.xlu2 %3756  ;;  %v3700_v57 = vmul.f32 %v3690_v6, %v8278_v33 }
0x14bb   :  { %v3770_v26 = vmul.f32 %v3757_v11, %v8289_v16  ;;  %v3771_v59 = vmul.f32 %v3757_v11, %v8290_v41  ;;  %v3769_v35 = vmul.f32 %v3757_v11, %v8288_v4 }
0x14bc   :  { %3581 = vrot.lane.b32.xlu1 %v3558_v14, %s8312_s4  ;;  %3579 = vrot.lane.b32.xlu0 %v3557_v8, %s8312_s4 }
0x14bd   :  { %3575 = vrot.lane.b32.xlu2 %v3555_v39, %s8312_s4 }
0x14c0   :  { %v3829_v2 = vpop.permute.xlu1 %3828 }
0x14c1   :  { %v3762_v3 = vpop.permute.xlu0 %3761  ;;  %v3842_v55 = vmul.f32 %v3829_v2, %v8299_v17  ;;  %v3843_v14 = vmul.f32 %v3829_v2, %v8300_v50 }
0x14c2   :  { %v3834_v24 = vpop.permute.xlu2 %3833  ;;  %v3774_v54 = vmul.f32 %v3762_v3, %v8290_v41  ;;  %v3773_v30 = vmul.f32 %v3762_v3, %v8289_v16  ;;  %v3772_v29 = vmul.f32 %v3762_v3, %v8288_v4 }
0x14c3   :  { %v3845_v53 = vmul.f32 %v3834_v24, %v8299_v17  ;;  %v3844_v17 = vmul.f32 %v3834_v24, %v8298_v34  ;;  %v3846_v23 = vmul.f32 %v3834_v24, %v8300_v50 }
0x14c4   :  { %3803 = vrot.lane.b32.xlu1 %v3777_v63, %s8315_s16  ;;  %3801 = vrot.lane.b32.xlu0 %v3776_v22, %s8315_s16 }
0x14c5   :  { %3727 = vrot.lane.b32.xlu2 %v3703_v5, %s8314_s1 }
0x14c8   :  { %v3906_v16 = vpop.permute.xlu1 %3905 }
0x14c9   :  { %v3901_v41 = vpop.permute.xlu0 %3900  ;;  %v3917_v50 = vmul.f32 %v3906_v16, %v6436_v48 }
0x14ca   :  { %v3914_v61 = vmul.f32 %v3901_v41, %v6436_v48  ;;  %v3913_v11 = vmul.f32 %v3901_v41, %v6432_v18 }
0x14cc   :  { %3645 = vrot.lane.b32.xlu1 %v3626_v52, %s8313_s30  ;;  %3577 = vrot.lane.b32.xlu0 %v3556_v25, %s8312_s4  ;;  %v3841_v52 = vmul.f32 %v3829_v2, %v8298_v34 }
0x14cd   :  { %3571 = vrot.lane.b32.xlu2 %v3553_v0, %s8312_s4 }
0x14d4   :  { %3653 = vrot.lane.b32.xlu1 %v3630_v44, %s8313_s30  ;;  %3651 = vrot.lane.b32.xlu0 %v3629_v27, %s8313_s30 }
0x14d5   :  { %3647 = vrot.lane.b32.xlu2 %v3627_v9, %s8313_s30 }
0x14dc   :  { %3875 = vrot.lane.b32.xlu1 %v3849_v58, %s8316_s28  ;;  %3873 = vrot.lane.b32.xlu0 %v3848_v56, %s8316_s28  ;;  %v3915_v58 = vmul.f32 %v3901_v41, %v6440_v36 }
0x14dd   :  { %3799 = vrot.lane.b32.xlu2 %v3775_v38, %s8315_s16 }
0x14e4   :  { %3717 = vrot.lane.b32.xlu1 %v3698_v1, %s8314_s1  ;;  %3649 = vrot.lane.b32.xlu0 %v3628_v31, %s8313_s30 }
0x14e5   :  { %3643 = vrot.lane.b32.xlu2 %v3625_v28, %s8313_s30 }
0x14ec   :  { %3725 = vrot.lane.b32.xlu1 %v3702_v49, %s8314_s1  ;;  %3723 = vrot.lane.b32.xlu0 %v3701_v15, %s8314_s1  ;;  %v3918_v15 = vmul.f32 %v3906_v16, %v6440_v36 }
0x14ed   :  { %3719 = vrot.lane.b32.xlu2 %v3699_v7, %s8314_s1  ;;  %v3916_v7 = vmul.f32 %v3906_v16, %v6432_v18 }
0x14f4   :  { %3947 = vrot.lane.b32.xlu1 %v3921_v47, %s8317_s20  ;;  %3945 = vrot.lane.b32.xlu0 %v3920_v46, %s8317_s20 }
0x14f5   :  { %3871 = vrot.lane.b32.xlu2 %v3847_v13, %s8316_s28 }
0x14fc   :  { %3789 = vrot.lane.b32.xlu1 %v3770_v26, %s8315_s16  ;;  %3721 = vrot.lane.b32.xlu0 %v3700_v57, %s8314_s1 }
0x14fd   :  { %3715 = vrot.lane.b32.xlu2 %v3697_v43, %s8314_s1 }
0x14ff   :  { %v3586_v51 = vpop.permute.xlu2 %3585 }
0x1504   :  { %3797 = vrot.lane.b32.xlu1 %v3774_v54, %s8315_s16  ;;  %3795 = vrot.lane.b32.xlu0 %v3773_v30, %s8315_s16 }
0x1505   :  { %3791 = vrot.lane.b32.xlu2 %v3771_v59, %s8315_s16 }
0x1507   :  { %v3658_v33 = vpop.permute.xlu2 %3657 }
0x150c   :  { %3793 = vrot.lane.b32.xlu1 %v3772_v29, %s8315_s16  ;;  %3787 = vrot.lane.b32.xlu0 %v3769_v35, %s8315_s16 }
0x150d   :  { %3943 = vrot.lane.b32.xlu2 %v3919_v12, %s8317_s20 }
0x150f   :  { %v3730_v45 = vpop.permute.xlu2 %3729 }
0x1514   :  { %3867 = vrot.lane.b32.xlu1 %v3845_v53, %s8316_s28  ;;  %3863 = vrot.lane.b32.xlu0 %v3843_v14, %s8316_s28 }
0x1515   :  { %3861 = vrot.lane.b32.xlu2 %v3842_v55, %s8316_s28 }
0x1516   :  { %v3584_v4 = vpop.permute.xlu1 %3583  ;;  %v3588_v8 = vpop.permute.xlu0 %3587 }
0x1517   :  { %v3593_v39 = vsel %vm8318_vm7, %v3584_v4, %v3586_v51  ;;  %v3576_v40 = vpop.permute.xlu2 %3575  ;;  %v3594_v5 = vsel %vm8319_vm8, %v3586_v51, %v3588_v8  ;;  %vm8333_vm7 = vmmov %vm8324_vm1  ;;  %vm8334_vm8 = vcmask 506880  }
0x1518   :  { %v3605_v63 = vadd.f32 %v3593_v39, %v7387_v60  ;;  %v3606_v22 = vadd.f32 %v3594_v5, %v7390_v20 }
0x151c   :  { %3865 = vrot.lane.b32.xlu1 %v3844_v17, %s8316_s28  ;;  %3859 = vrot.lane.b32.xlu0 %v3841_v52, %s8316_s28 }
0x151d   :  { %3869 = vrot.lane.b32.xlu2 %v3846_v23, %s8316_s28 }
0x151e   :  { %v3656_v0 = vpop.permute.xlu1 %3655  ;;  %v3660_v60 = vpop.permute.xlu0 %3659 }
0x151f   :  { %v3665_v25 = vsel %vm8320_vm10, %v3656_v0, %v3658_v33  ;;  %v3728_v19 = vpop.permute.xlu2 %3727  ;;  %v3666_v20 = vsel %vm8321_vm11, %v3658_v33, %v3660_v60  ;;  %vm8335_vm10 = vmmov %vm8334_vm8  ;;  %vm8336_vm11 = vcmask 498688  }
0x1520   :  { %v3677_v44 = vadd.f32 %v3665_v25, %v3605_v63  ;;  %v3737_v9 = vsel %vm8322_vm12, %v3728_v19, %v3730_v45  ;;  %v3678_v27 = vadd.f32 %v3666_v20, %v3606_v22  ;;  %vm8337_vm12 = vmmov %vm8336_vm11 }
0x1522   :  { %v7496_v34 = vadd.f32 %v3737_v9, %v3677_v44 }
0x1524   :  { %3939 = vrot.lane.b32.xlu1 %v3917_v50, %s8317_s20  ;;  %3935 = vrot.lane.b32.xlu0 %v3915_v58, %s8317_s20 }
0x1525   :  { %3933 = vrot.lane.b32.xlu2 %v3914_v61, %s8317_s20 }
0x1526   :  { %v3574_v38 = vpop.permute.xlu1 %3573  ;;  %v3732_v21 = vpop.permute.xlu0 %3731 }
0x1527   :  { %v3590_v56 = vsel %vm8323_vm13, %v3574_v38, %v3576_v40  ;;  %v3572_v1 = vpop.permute.xlu2 %3571  ;;  %v3738_v31 = vsel %vm8324_vm1, %v3730_v45, %v3732_v21  ;;  %vm8338_vm13 = vcmask 490496  }
0x1528   :  { %v3602_v28 = vadd.f32 %v3590_v56, %v7374_v37  ;;  %v3589_v6 = vsel %vm8325_vm14, %v3572_v1, %v3574_v38  ;;  %v3750_v48 = vadd.f32 %v3738_v31, %v3678_v27  ;;  %vm8339_vm1 = vmmov %vm8338_vm13  ;;  %v8340_v56 = vld [vmem:[#allocation30_spill] sm:$0xff]  ;;  %vm8342_vm14 = vcmask 1043456  }
0x1529   :  { %v3601_v49 = vadd.f32 %v3589_v6, %v7371_v32 }
0x152c   :  { %3937 = vrot.lane.b32.xlu1 %v3916_v7, %s8317_s20  ;;  %3931 = vrot.lane.b32.xlu0 %v3913_v11, %s8317_s20 }
0x152d   :  { %3941 = vrot.lane.b32.xlu2 %v3918_v15, %s8317_s20 }
0x152e   :  { %v3582_v37 = vpop.permute.xlu1 %3581  ;;  %v3580_v62 = vpop.permute.xlu0 %3579 }
0x152f   :  { %v3648_v47 = vpop.permute.xlu2 %3647  ;;  %v3592_v13 = vsel %vm8326_vm15, %v3580_v62, %v3582_v37  ;;  %vm8343_vm15 = vmmov %vm8342_vm14 }
0x1530   :  { %v3604_v46 = vadd.f32 %v3592_v13, %v7382_v10 }
0x1536   :  { %v3804_v32 = vpop.permute.xlu1 %3803  ;;  %v3802_v24 = vpop.permute.xlu0 %3801 }
0x1537   :  { %v3800_v26 = vpop.permute.xlu2 %3799  ;;  %v3810_v17 = vsel %vm8334_vm8, %v3802_v24, %v3804_v32 }
0x1538   :  { %v3809_v23 = vsel %vm8335_vm10, %v3800_v26, %v3802_v24  ;;  %v3822_v25 = vadd.f32 %v3810_v17, %v3750_v48 }
0x1539   :  { %v3821_v60 = vadd.f32 %v3809_v23, %v7496_v34 }
0x153e   :  { %v3646_v43 = vpop.permute.xlu1 %3645  ;;  %v3578_v36 = vpop.permute.xlu0 %3577 }
0x153f   :  { %v3662_v18 = vsel %vm8327_vm2, %v3646_v43, %v3648_v47  ;;  %v3644_v57 = vpop.permute.xlu2 %3643  ;;  %v3591_v3 = vsel %vm8328_vm3, %v3578_v36, %v3580_v62  ;;  %vm8344_vm2 = vmmov %vm8331_vm5 }
0x1540   :  { %v3674_v51 = vadd.f32 %v3662_v18, %v3602_v28  ;;  %v3661_v54 = vsel %vm8329_vm9, %v3644_v57, %v3646_v43  ;;  %v3603_v59 = vadd.f32 %v3591_v3, %v7379_v42  ;;  %v8341_v28 = vld [vmem:[#allocation29_spill] sm:$0xff]  ;;  %vm8345_vm3 = vmmov %vm8334_vm8 }
0x1541   :  { %v3673_v30 = vadd.f32 %v3661_v54, %v3601_v49  ;;  %vm8346_vm9 = vmmov %vm8345_vm3 }
0x1542   :  { %vm8351_vm8 = vmmov %vm8339_vm1 }
0x1543   :  { %vm8352_vm10 = vmmov %vm8345_vm3 }
0x1546   :  { %v3654_v2 = vpop.permute.xlu1 %3653  ;;  %v3652_v33 = vpop.permute.xlu0 %3651 }
0x1547   :  { %v3720_v29 = vpop.permute.xlu2 %3719  ;;  %v3664_v10 = vsel %vm8330_vm4, %v3652_v33, %v3654_v2  ;;  %vm8347_vm4 = vmmov %vm8336_vm11 }
0x1548   :  { %v3676_v35 = vadd.f32 %v3664_v10, %v3604_v46 }
0x154e   :  { %v3876_v12 = vpop.permute.xlu1 %3875  ;;  %v3874_v16 = vpop.permute.xlu0 %3873 }
0x154f   :  { %v3872_v41 = vpop.permute.xlu2 %3871  ;;  %v3882_v52 = vsel %vm8336_vm11, %v3874_v16, %v3876_v12  ;;  %vm8353_vm11 = vmmov %vm8345_vm3 }
0x1550   :  { %v3881_v0 = vsel %vm8337_vm12, %v3872_v41, %v3874_v16  ;;  %v3894_v44 = vadd.f32 %v3882_v52, %v3822_v25  ;;  %vm8355_vm12 = vmmov %vm8347_vm4 }
0x1551   :  { %v3893_v20 = vadd.f32 %v3881_v0, %v3821_v60  ;;  %v8356_v0 = vld [vmem:[#allocation31_spill] sm:$0xff] }
0x1556   :  { %v3718_v45 = vpop.permute.xlu1 %3717  ;;  %v3650_v53 = vpop.permute.xlu0 %3649 }
0x1557   :  { %v3734_v55 = vsel %vm8331_vm5, %v3718_v45, %v3720_v29  ;;  %v3716_v14 = vpop.permute.xlu2 %3715  ;;  %v3663_v4 = vsel %vm8332_vm6, %v3650_v53, %v3652_v33  ;;  %vm8348_vm5 = vmmov %vm8347_vm4 }
0x1558   :  { %v3746_v39 = vadd.f32 %v3734_v55, %v3674_v51  ;;  %v3733_v42 = vsel %vm8333_vm7, %v3716_v14, %v3718_v45  ;;  %v7524_v8 = vadd.f32 %v3663_v4, %v3603_v59  ;;  %vm8349_vm6 = vmmov %vm8344_vm2 }
0x1559   :  { %v7526_v40 = vadd.f32 %v3733_v42, %v3673_v30  ;;  %vm8350_vm7 = vmmov %vm8339_vm1 }
0x155e   :  { %v3726_v63 = vpop.permute.xlu1 %3725  ;;  %v3724_v5 = vpop.permute.xlu0 %3723 }
0x155f   :  { %v3792_v22 = vpop.permute.xlu2 %3791  ;;  %v3736_v3 = vsel %vm8344_vm2, %v3724_v5, %v3726_v63 }
0x1560   :  { %v3748_v59 = vadd.f32 %v3736_v3, %v3676_v35 }
0x1566   :  { %v3948_v19 = vpop.permute.xlu1 %3947  ;;  %v3946_v9 = vpop.permute.xlu0 %3945 }
0x1567   :  { %v3944_v27 = vpop.permute.xlu2 %3943  ;;  %v3954_v50 = vsel %vm8338_vm13, %v3946_v9, %v3948_v19  ;;  %vm8357_vm13 = vmmov %vm8347_vm4  ;;  %v8358_v19 = vld [vmem:[#allocation28_spill] sm:$0xff] }
0x1568   :  { %v3953_v61 = vsel %vm8339_vm1, %v3944_v27, %v3946_v9  ;;  %v3966_v58 = vadd.f32 %v3954_v50, %v3894_v44  ;;  %v8359_v9 = vld [vmem:[#allocation33_spill] sm:$0xff] }
0x1569   :  { %v3965_v38 = vadd.f32 %v3953_v61, %v3893_v20 }
0x156a   :  { %v3972_v21 = vmul.f32 %v3966_v58, %v8340_v56 }
0x156b   :  { %v3971_v1 = vmul.f32 %v3965_v38, %v8340_v56 }
0x156c   :  { %v3978_v6 = vadd.f32 %v3972_v21, %v8341_v28 }
0x156d   :  { %v3977_v31 = vadd.f32 %v3971_v1, %v8341_v28 }
0x156e   :  { %v3790_v34 = vpop.permute.xlu1 %3789  ;;  %v3722_v48 = vpop.permute.xlu0 %3721  ;;  %v3984_v7 = vmax.f32 %v3978_v6, 0.0 }
0x156f   :  { %v3983_v49 = vmax.f32 %v3977_v31, 0.0  ;;  %v3862_v46 = vpop.permute.xlu2 %3861  ;;  %v3806_v30 = vsel %vm8346_vm9, %v3790_v34, %v3792_v22  ;;  %v3735_v45 = vsel %vm8349_vm6, %v3722_v48, %v3724_v5 }
0x1570   :  { %v3988_v11 = vpack.c.bf16 %v3984_v7, %v3984_v7  ;;  %v3818_v10 = vadd.f32 %v3806_v30, %v3746_v39  ;;  %v3747_v22 = vadd.f32 %v3735_v45, %v7524_v8  ;;  %v8354_v39 = vld [vmem:[#allocation27_spill] sm:$0xff]  ;;  %v4281_v7 = vld [vmem:[%s7587_s7] sm:$0xf]  ;;  %s4335_s7 = smov [#allocation2]  }
0x1571   :  { %v3987_v15 = vpack.c.bf16 %v3983_v49, %v3983_v49  ;;  %s4049_s22 = sshll.u32 %s4335_s7, 4  ;;  %s4050_s22 = int_to_ptr.vmem [resolvable:$true] %s4049_s22 }
0x1572   :  { %v3993_v62 = vsel %vm8343_vm15, %v3988_v11, 0  ;;  %vm8361_vm15 = vcmask 195584  }
0x1573   :  { %v3990_v37 = vsel %vm8342_vm14, %v3987_v15, 0  ;;  %4014 = vmatpush.bf16.msrb.mxu3 %v3993_v62  ;;  %vm8360_vm14 = vmmov %vm8339_vm1 }
0x1574   :  { %4001 = vmatpush.bf16.msrb.mxu2 %v3990_v37  ;;  %vm8362_vm2 = vmmov %vm8361_vm15 }
0x1576   :  { %v3798_v47 = vpop.permute.xlu1 %3797  ;;  %v3796_v13 = vpop.permute.xlu0 %3795 }
0x1577   :  { %v3870_v26 = vpop.permute.xlu2 %3869  ;;  %v3808_v54 = vsel %vm8345_vm3, %v3796_v13, %v3798_v47  ;;  %v8363_v47 = vld [vmem:[#allocation32_spill] sm:$0xff]  ;;  %vm8365_vm3 = vcmask 1040384  }
0x1578   :  { %v3820_v33 = vadd.f32 %v3808_v54, %v3748_v59 }
0x157e   :  { %v3794_v32 = vpop.permute.xlu1 %3793  ;;  %v3788_v24 = vpop.permute.xlu0 %3787 }
0x157f   :  { %v3934_v18 = vpop.permute.xlu2 %3933  ;;  %v3807_v42 = vsel %vm8352_vm10, %v3794_v32, %v3796_v13  ;;  %v3805_v17 = vsel %vm8353_vm11, %v3788_v24, %v3790_v34 }
0x1580   :  { %v3819_v25 = vadd.f32 %v3807_v42, %v3747_v22  ;;  %v3817_v20 = vadd.f32 %v3805_v17, %v7526_v40 }
0x1586   :  { %v3868_v43 = vpop.permute.xlu1 %3867  ;;  %v3864_v36 = vpop.permute.xlu0 %3863 }
0x1587   :  { %v3880_v2 = vsel %vm8347_vm4, %v3868_v43, %v3870_v26  ;;  %v3878_v29 = vsel %vm8348_vm5, %v3862_v46, %v3864_v36  ;;  %v3942_v16 = vpop.permute.xlu2 %3941 }
0x1588   :  { %v3892_v12 = vadd.f32 %v3880_v2, %v3820_v33  ;;  %v3890_v53 = vadd.f32 %v3878_v29, %v3818_v10 }
0x158e   :  { %v3866_v57 = vpop.permute.xlu1 %3865  ;;  %v3860_v51 = vpop.permute.xlu0 %3859 }
0x158f   :  { %v3879_v52 = vsel %vm8355_vm12, %v3866_v57, %v3868_v43  ;;  %v3877_v60 = vsel %vm8357_vm13, %v3860_v51, %v3862_v46  ;;  %v8364_v46 = vld [vmem:[#allocation26_spill] sm:$0xff] }
0x1590   :  { %v3891_v50 = vadd.f32 %v3879_v52, %v3819_v25  ;;  %v3889_v58 = vadd.f32 %v3877_v60, %v3817_v20 }
0x1596   :  { %v3940_v41 = vpop.permute.xlu1 %3939  ;;  %v3936_v55 = vpop.permute.xlu0 %3935 }
0x1597   :  { %v3952_v14 = vsel %vm8350_vm7, %v3940_v41, %v3942_v16  ;;  %v3950_v4 = vsel %vm8351_vm8, %v3934_v18, %v3936_v55 }
0x1598   :  { %v3964_v35 = vadd.f32 %v3952_v14, %v3892_v12  ;;  %v3962_v63 = vadd.f32 %v3950_v4, %v3890_v53 }
0x159a   :  { %v3970_v23 = vmul.f32 %v3964_v35, %v8354_v39  ;;  %v3968_v5 = vmul.f32 %v3962_v63, %v8356_v0 }
0x159c   :  { %v3976_v44 = vadd.f32 %v3970_v23, %v8358_v19  ;;  %v3974_v27 = vadd.f32 %v3968_v5, %v8359_v9 }
0x159e   :  { %v3938_v61 = vpop.permute.xlu1 %3937  ;;  %v3982_v8 = vmax.f32 %v3976_v44, 0.0  ;;  %v3932_v38 = vpop.permute.xlu0 %3931  ;;  %v3980_v21 = vmax.f32 %v3974_v27, 0.0 }
0x159f   :  { %v3951_v56 = vsel %vm8339_vm1, %v3938_v61, %v3940_v41  ;;  %v3949_v1 = vsel %vm8360_vm14, %v3932_v38, %v3934_v18 }
0x15a0   :  { %v3963_v28 = vadd.f32 %v3951_v56, %v3891_v50  ;;  %v3961_v31 = vadd.f32 %v3949_v1, %v3889_v58  ;;  %v3986_v6 = vpack.c.bf16 %v3982_v8, %v3980_v21 }
0x15a2   :  { %v3969_v34 = vmul.f32 %v3963_v28, %v8354_v39  ;;  %v3967_v48 = vmul.f32 %v3961_v31, %v8356_v0  ;;  %4015 = vmatpush.bf16.msrb.mxu3 %v3986_v6 }
0x15a4   :  { %v3975_v40 = vadd.f32 %v3969_v34, %v8358_v19  ;;  %v3973_v49 = vadd.f32 %v3967_v48, %v8359_v9 }
0x15a5   :  { %4231 = vmatmul.msk.bf16.vlgmr.msrb.gmra.mxu3 %vm8361_vm15, %v4281_v7 }
0x15a6   :  { %v3981_v15 = vmax.f32 %v3975_v40, 0.0  ;;  %v3979_v11 = vmax.f32 %v3973_v49, 0.0 }
0x15a8   :  { %v3985_v37 = vpack.c.bf16 %v3981_v15, %v3979_v11 }
0x15aa   :  { %4002 = vmatpush.bf16.msrb.mxu2 %v3985_v37 }
0x15ad   :  { %4230 = vmatmul.msk.bf16.vlgmr.msrb.gmra.mxu2 %vm8362_vm2, %v4281_v7 }
0x1628   :  { %v4017_v62 = vpop.f32.mrf.mxu3 }
0x1629   :  { %v4022_v13 = vmul.f32 %v4017_v62, %v8363_v47 }
0x162b   :  { %v4024_v32 = vadd.f32 %v4022_v13, %v8364_v46 }
0x162d   :  { %4027 = vst [vmem:[#allocation2 + $0x18] sm:$0xff] %v4024_v32  ;;  %v4029_v24 = vsub.f32 0.0, %v4024_v32 }
0x162f   :  { %v4032_v26 = vmul.f32 1.442695, %v4029_v24 }
0x1630   :  { %v4004_v43 = vpop.f32.mrf.mxu2  ;;  %v4019_v36 = vpop.f32.mrf.mxu3 }
0x1631   :  { %4273 = vpow2.f32 %v4032_v26  ;;  %v4021_v18 = vmul.f32 %v4004_v43, %v8363_v47 }
0x1633   :  { %v4023_v57 = vadd.f32 %v4021_v18, %v8364_v46 }
0x1635   :  { %4026 = vst [vmem:[#allocation2 + $0x10] sm:$0xff] %v4023_v57  ;;  %v4028_v3 = vsub.f32 0.0, %v4023_v57 }
0x1637   :  { %v4274_v51 = vpop.eup %4273  ;;  %v4030_v54 = vmul.f32 1.442695, %v4028_v3 }
0x1638   :  { %v4006_v59 = vpop.f32.mrf.mxu2  ;;  %v4035_v30 = vadd.f32 1.0, %v4274_v51 }
0x1639   :  { %4275 = vpow2.f32 %v4030_v54 }
0x163a   :  { %4277 = vrcp.f32 %v4035_v30 }
0x163f   :  { %v4276_v2 = vpop.eup %4275 }
0x1640   :  { %v4034_v33 = vadd.f32 1.0, %v4276_v2  ;;  %v4278_v29 = vpop.eup %4277 }
0x1641   :  { %v4040_v10 = vrot.slane %v4278_v29, 7 }
0x1642   :  { %4279 = vrcp.f32 %v4034_v33 }
0x1648   :  { %v4280_v12 = vpop.eup %4279 }
0x1649   :  { %v4041_v16 = vsel %vm8365_vm3, %v4280_v12, %v4040_v10 }
0x164a   :  { %4043 = vst.msk [vmem:[#allocation2 + $0x10] ss:$8 sm:$0x3] %vm6347_vm0, %v4041_v16 }
0x164b   :  { %4057 = dma.vmem_to_hbm [thread:$0]  %s4050_s22, 512, %s4052_s27, [#allocation3], %s4336_s9, %s4336_s9, %s4337_s8  }
0x164c   :  { %4306 = dma.done.wait [#allocation3], 512  }
0x164d   :  { %4307 = vsyncadd [#allocation3], 4294966784 }
0x164e   :  { %4062 = vsyncpa [#allocation3], 1 }

</bundles_post_ra>
